<compile_context>
chip_gen: v6e
topology: v6e:2x2x1
jax: 0.10.0
libtpu: 0.0.40
codegen_flags: <defaults>
</compile_context>

<pallas_src>
import functools

import numpy as np
import jax
import jax.numpy as jnp
from jax import lax
from jax.experimental import pallas as pl
from jax.experimental.pallas import tpu as pltpu

LATENT = 128
MESSAGE_PASSING_STEPS = 15
VMEM_LIMIT = 32 * 1024 * 1024


# ----------------------------------------------------------------------------
# Backbone kernel: conv3x3 (as matmul on im2col patches) -> ReLU -> global
# average pool (as a tiny (B, B*H*W) matmul) -> FC -> ReLU.  One pallas_call,
# no intermediate ever touches HBM.
# ----------------------------------------------------------------------------
def _backbone_kernel(patches_ref, pool_ref, cw_ref, cb_ref, fw_ref, fb_ref, out_ref):
    f32 = jnp.float32
    dot = functools.partial(jnp.dot, preferred_element_type=f32)
    conv = jnp.maximum(dot(patches_ref[...], cw_ref[...]) + cb_ref[...], 0.0)   # (B*H*W, Cout)
    gap = dot(pool_ref[...], conv)                                              # (B, Cout)
    out_ref[...] = jnp.maximum(dot(gap, fw_ref[...]) + fb_ref[...], 0.0)        # (B, L)


def backbone_forward(batch_img, params):
    # NCHW -> NHWC and im2col (pure data rearrangement, JAX glue).
    x = jnp.transpose(batch_img, (0, 2, 3, 1))
    B, H, W, C = x.shape
    xp = jnp.pad(x, ((0, 0), (1, 1), (1, 1), (0, 0)))
    cols = [xp[:, dh:dh + H, dw:dw + W, :] for dh in range(3) for dw in range(3)]
    patches = jnp.concatenate(cols, axis=-1).reshape(B * H * W, 9 * C)

    # Global-average-pool expressed as a (B, B*H*W) matmul so the whole
    # conv -> ReLU -> GAP -> FC chain stays inside one kernel.
    pool = np.repeat(np.eye(B, dtype=np.float32), H * W, axis=1) / float(H * W)

    M, K = B * H * W, 9 * C
    Cout = params["conv_w"].shape[1]
    L = params["fc_img_w"].shape[1]

    return pl.pallas_call(
        _backbone_kernel,
        out_shape=jax.ShapeDtypeStruct((B, L), jnp.float32),
        grid=(1,),
        in_specs=[
            pl.BlockSpec((M, K), lambda i: (0, 0)),
            pl.BlockSpec((B, M), lambda i: (0, 0)),
            pl.BlockSpec((K, Cout), lambda i: (0, 0)),
            pl.BlockSpec((1, Cout), lambda i: (0, 0)),
            pl.BlockSpec((Cout, L), lambda i: (0, 0)),
            pl.BlockSpec((1, L), lambda i: (0, 0)),
        ],
        out_specs=pl.BlockSpec((B, L), lambda i: (0, 0)),
        compiler_params=pltpu.CompilerParams(
            dimension_semantics=("arbitrary",),
            vmem_limit_bytes=VMEM_LIMIT),
    )(patches, pool,
      params["conv_w"], params["conv_b"].reshape(1, -1),
      params["fc_img_w"], params["fc_img_b"].reshape(1, -1))


# ----------------------------------------------------------------------------
# Fused graph-net kernel (one grid point per batch element):
#   edge features -> node/edge encoders -> image conditioning ->
#   15 GAT-style message-passing steps (in-kernel fori_loop, everything
#   resident in VMEM/vregs) -> decoder (output lane-padded to 128).
# ----------------------------------------------------------------------------
def _graph_net_kernel(imgf_ref, pos_ref, s_ref, r_ref, rt_ref,
                      nw1_ref, nb1_ref, nw2_ref, nb2_ref,
                      ew1a_ref, ew1b_ref, eb1_ref, ew2_ref, eb2_ref,
                      pw_ref, pb_ref,
                      wm_ref, bm_ref, as_ref, ar_ref, wn_ref, bn_ref,
                      dw1_ref, db1_ref, dw2_ref, db2_ref,
                      out_ref):
    f32 = jnp.float32
    dot = functools.partial(jnp.dot, preferred_element_type=f32)

    pos = pos_ref[...]          # (N, 3)
    S = s_ref[...]              # (2E, N)  sender one-hot
    R = r_ref[...]              # (2E, N)  receiver one-hot
    RT = rt_ref[...]            # (N, 2E)

    # --- template-graph edge features: rel = pos[sender] - pos[receiver], |rel|
    rel = dot(S, pos) - dot(R, pos)                                    # (2E, 3)
    norm = jnp.sqrt(jnp.sum(rel * rel, axis=-1, keepdims=True))        # (2E, 1)

    # --- encoders (2-layer MLPs); edge-encoder first layer is pre-split so no
    #     narrow lane concat is needed: [rel, norm] @ W == rel@Wa + norm@Wb.
    node_lat = jnp.maximum(dot(pos, nw1_ref[...]) + nb1_ref[...], 0.0)
    node_lat = dot(node_lat, nw2_ref[...]) + nb2_ref[...]              # (N, L)

    edge_lat = jnp.maximum(dot(rel, ew1a_ref[...]) + dot(norm, ew1b_ref[...])
                           + eb1_ref[...], 0.0)
    edge_lat = dot(edge_lat, ew2_ref[...]) + eb2_ref[...]              # (2E, L)

    img_cond = dot(imgf_ref[0], pw_ref[...]) + pb_ref[...]             # (1, L)

    h0 = node_lat + img_cond                                           # (N, L)
    e0 = edge_lat                                                      # (2E, L)

    # --- hoist shared weights / biases once; loop over 15 MP steps in-kernel.
    Wm = wm_ref[...]            # (3L, L)  stacked [w1; w2; w3]
    bm = bm_ref[...]
    Wn = wn_ref[...]            # (2L, L)  stacked [w4; w5]
    bn = bn_ref[...]
    a_s = as_ref[...]           # (L, 1)
    a_r = ar_ref[...]           # (L, 1)

    def mp_body(_, carry):
        h, e = carry
        hs = dot(S, h)                                                 # (2E, L)
        hr = dot(R, h)                                                 # (2E, L)

        # Edge message / edge-latent update (deep-K matmul, residual).
        m = jnp.maximum(dot(jnp.concatenate([hs, hr, e], axis=-1), Wm) + bm, 0.0)
        e_new = e + m

        # GAT attention: per-node matvecs then gather via one-hots; softmax
        # over incoming edges of each node via RT / R matmuls.
        z = dot(S, dot(h, a_s)) + dot(R, dot(h, a_r))                  # (2E, 1)
        z = jnp.where(z > 0, z, 0.2 * z)                               # LeakyReLU(0.2)
        ez = jnp.exp(z - jnp.max(z, axis=0, keepdims=True))
        d_e = dot(R, dot(RT, ez))                                      # (2E, 1)
        alpha = ez * pl.reciprocal(jnp.maximum(d_e, 1e-9), approx=True)

        agg = dot(RT, alpha * m)                                       # (N, L)
        upd = jnp.maximum(dot(jnp.concatenate([h, agg], axis=-1), Wn) + bn, 0.0)
        return h + upd, e_new

    h, _ = lax.fori_loop(0, MESSAGE_PASSING_STEPS, mp_body, (h0, e0))

    # --- decoder: per-node latent -> 3-D position (lane-padded to 128 wide).
    d = jnp.maximum(dot(h, dw1_ref[...]) + db1_ref[...], 0.0)
    out_ref[0] = dot(d, dw2_ref[...]) + db2_ref[...]                   # (N, 128)


def graph_net_forward(image_feature, params, template):
    mesh_pos, S, R, RT = template
    B, L = image_feature.shape
    N = mesh_pos.shape[0]
    E2 = S.shape[0]

    # Pre-stack MP weights (deep-K matmuls), pre-split edge-encoder layer 1,
    # and lane-pad the decoder output head (slice first 3 columns outside).
    wm = jnp.concatenate([params["mp_w1"], params["mp_w2"], params["mp_w3"]], axis=0)
    wn = jnp.concatenate([params["mp_w4"], params["mp_w5"]], axis=0)
    ew1a = params["edge_enc_w1"][:3, :]
    ew1b = params["edge_enc_w1"][3:4, :]
    dec_w2p = jnp.zeros((L, L), jnp.float32).at[:, :3].set(params["dec_w2"])
    dec_b2p = jnp.zeros((1, L), jnp.float32).at[:, :3].set(params["dec_b2"].reshape(1, 3))

    img3 = image_feature.reshape(B, 1, L)

    def shared(shape):
        return pl.BlockSpec(shape, lambda b: (0,) * len(shape))

    out = pl.pallas_call(
        _graph_net_kernel,
        out_shape=jax.ShapeDtypeStruct((B, N, L), jnp.float32),
        grid=(B,),
        in_specs=[
            pl.BlockSpec((1, 1, L), lambda b: (b, 0, 0)),               # image feature
            shared((N, 3)), shared((E2, N)), shared((E2, N)), shared((N, E2)),
            shared((3, L)), shared((1, L)), shared((L, L)), shared((1, L)),     # node enc
            shared((3, L)), shared((1, L)), shared((1, L)), shared((L, L)), shared((1, L)),  # edge enc
            shared((L, L)), shared((1, L)),                                     # img proj
            shared((3 * L, L)), shared((1, L)),                                 # mp Wm, bm
            shared((L, 1)), shared((L, 1)),                                     # attention vecs
            shared((2 * L, L)), shared((1, L)),                                 # mp Wn, bn
            shared((L, L)), shared((1, L)), shared((L, L)), shared((1, L)),     # decoder
        ],
        out_specs=pl.BlockSpec((1, N, L), lambda b: (b, 0, 0)),
        compiler_params=pltpu.CompilerParams(
            dimension_semantics=("parallel",),          # v7x: one batch elem per TC
            vmem_limit_bytes=VMEM_LIMIT),
    )(img3, mesh_pos, S, R, RT,
      params["node_enc_w1"], params["node_enc_b1"].reshape(1, L),
      params["node_enc_w2"], params["node_enc_b2"].reshape(1, L),
      ew1a, ew1b, params["edge_enc_b1"].reshape(1, L),
      params["edge_enc_w2"], params["edge_enc_b2"].reshape(1, L),
      params["img_proj_w"], params["img_proj_b"].reshape(1, L),
      wm, params["mp_bm"], params["mp_as"], params["mp_ar"], wn, params["mp_bn"],
      params["dec_w1"], params["dec_b1"].reshape(1, L), dec_w2p, dec_b2p)

    return out[..., :3]


# ----------------------------------------------------------------------------
# Full forward pass (two pallas_calls total).
# ----------------------------------------------------------------------------
def cloth_model_forward(batch_img, params, template):
    image_feature = backbone_forward(batch_img, params)                # (B, 128)
    return graph_net_forward(image_feature, params, template)          # (B, N, 3)


# ----------------------------------------------------------------------------
# Deterministic parameter init and template mesh construction.
# ----------------------------------------------------------------------------
def init_params(key):
    ks = jax.random.split(key, 18)
    L = LATENT

    def w(k, shape, scale=None):
        s = scale if scale is not None else 0.5 / np.sqrt(shape[0])
        return jax.random.normal(k, shape, jnp.float32) * s

    return dict(
        conv_w=w(ks[0], (27, 16)), conv_b=jnp.zeros((16,), jnp.float32),
        fc_img_w=w(ks[1], (16, L)), fc_img_b=jnp.zeros((L,), jnp.float32),
        img_proj_w=w(ks[2], (L, L)), img_proj_b=jnp.zeros((L,), jnp.float32),
        node_enc_w1=w(ks[3], (3, L)), node_enc_b1=jnp.zeros((L,), jnp.float32),
        node_enc_w2=w(ks[4], (L, L)), node_enc_b2=jnp.zeros((L,), jnp.float32),
        edge_enc_w1=w(ks[5], (4, L)), edge_enc_b1=jnp.zeros((L,), jnp.float32),
        edge_enc_w2=w(ks[6], (L, L)), edge_enc_b2=jnp.zeros((L,), jnp.float32),
        mp_w1=w(ks[7], (L, L)), mp_w2=w(ks[8], (L, L)), mp_w3=w(ks[9], (L, L)),
        mp_bm=jnp.zeros((1, L), jnp.float32),
        mp_as=w(ks[10], (L, 1), 0.05), mp_ar=w(ks[11], (L, 1), 0.05),
        mp_w4=w(ks[12], (L, L)), mp_w5=w(ks[13], (L, L)),
        mp_bn=jnp.zeros((1, L), jnp.float32),
        dec_w1=w(ks[14], (L, L)), dec_b1=jnp.zeros((L,), jnp.float32),
        dec_w2=w(ks[15], (L, 3)), dec_b2=jnp.zeros((3,), jnp.float32),
    )


def build_template_mesh(n=4):
    xs, ys = np.meshgrid(np.linspace(0.0, 1.0, n), np.linspace(0.0, 1.0, n), indexing="ij")
    mesh_pos = np.stack([xs.ravel(), ys.ravel(), np.zeros(n * n)], axis=-1).astype(np.float32)
    edges = []
    idx = lambda i, j: i * n + j
    for i in range(n):
        for j in range(n):
            if j + 1 < n:
                edges.append((idx(i, j), idx(i, j + 1)))
            if i + 1 < n:
                edges.append((idx(i, j), idx(i + 1, j)))
    return mesh_pos, np.array(edges, dtype=np.int64)


if __name__ == "__main__":
    key = jax.random.PRNGKey(0)
    k_img, k_par = jax.random.split(key)

    # image batch, NCHW like PyTorch
    batch = jax.random.normal(k_img, (2, 3, 16, 16), jnp.float32)
    params = init_params(k_par)

    # template_info: mesh positions + undirected edge index (doubled like PyTorch code)
    mesh_pos_np, edge_idx_np = build_template_mesh(4)
    N = mesh_pos_np.shape[0]
    senders, receivers = edge_idx_np[:, 0], edge_idx_np[:, 1]
    sender = np.concatenate([senders, receivers], 0)
    receiver = np.concatenate([receivers, senders], 0)
    # One-hot gather/scatter matrices (dense is fine at this template size).
    # TODO(synk): for large meshes (N > ~1k) replace with index-gather / segment-sum.
    S = jax.nn.one_hot(jnp.asarray(sender), N, dtype=jnp.float32)     # (2E, N)
    R = jax.nn.one_hot(jnp.asarray(receiver), N, dtype=jnp.float32)   # (2E, N)
    RT = R.T
    mesh_pos = jnp.asarray(mesh_pos_np)

    fwd = jax.jit(functools.partial(cloth_model_forward, template=(mesh_pos, S, R, RT)))
    pred_mesh = fwd(batch, params)
    jax.block_until_ready(pred_mesh)
    assert pred_mesh.shape == (2, N, 3)
    assert bool(jnp.all(jnp.isfinite(pred_mesh)))
    print("KERNEL_OK")
</pallas_src>

<mosaic_0001>
module attributes {stable_mosaic.version = 11 : i64} {
  func.func @_backbone_kernel(%arg0: i32, %arg1: memref<512x27xf32, #tpu.memory_space<vmem>>, %arg2: memref<2x512xf32, #tpu.memory_space<vmem>>, %arg3: memref<27x16xf32, #tpu.memory_space<vmem>>, %arg4: memref<1x16xf32, #tpu.memory_space<vmem>>, %arg5: memref<16x128xf32, #tpu.memory_space<vmem>>, %arg6: memref<1x128xf32, #tpu.memory_space<vmem>>, %arg7: memref<2x128xf32, #tpu.memory_space<vmem>>) attributes {dimension_semantics = [#tpu.dimension_semantics<arbitrary>], iteration_bounds = array<i64: 1>, scalar_prefetch = 0 : i64, scratch_operands = 0 : i64, tpu.core_type = #tpu.core_type<tc>, window_params = [{pipeline_mode = #tpu.pipeline_mode<synchronous>, transform_indices = @transform_0, window_bounds = array<i64: 512, 27>}, {pipeline_mode = #tpu.pipeline_mode<synchronous>, transform_indices = @transform_1, window_bounds = array<i64: 2, 512>}, {pipeline_mode = #tpu.pipeline_mode<synchronous>, transform_indices = @transform_2, window_bounds = array<i64: 27, 16>}, {pipeline_mode = #tpu.pipeline_mode<synchronous>, transform_indices = @transform_3, window_bounds = array<i64: 1, 16>}, {pipeline_mode = #tpu.pipeline_mode<synchronous>, transform_indices = @transform_4, window_bounds = array<i64: 16, 128>}, {pipeline_mode = #tpu.pipeline_mode<synchronous>, transform_indices = @transform_5, window_bounds = array<i64: 1, 128>}, {pipeline_mode = #tpu.pipeline_mode<synchronous>, transform_indices = @transform_6, window_bounds = array<i64: 2, 128>}]} {
    %c0 = arith.constant 0 : index
    %c0_0 = arith.constant 0 : index
    %0 = vector.load %arg1[%c0, %c0_0] : memref<512x27xf32, #tpu.memory_space<vmem>>, vector<512x27xf32>
    %c0_1 = arith.constant 0 : index
    %c0_2 = arith.constant 0 : index
    %1 = vector.load %arg3[%c0_1, %c0_2] : memref<27x16xf32, #tpu.memory_space<vmem>>, vector<27x16xf32>
    %cst = arith.constant dense<0.000000e+00> : vector<512x16xf32>
    %2 = tpu.matmul %0, %1, %cst {dimension_numbers = #tpu.dot_dimension_numbers<[1], [0], [0], [1], [0, 0, 1, 1], [], []>} : vector<512x27xf32>, vector<27x16xf32>, vector<512x16xf32> -> vector<512x16xf32>
    %c0_3 = arith.constant 0 : index
    %c0_4 = arith.constant 0 : index
    %3 = vector.load %arg4[%c0_3, %c0_4] : memref<1x16xf32, #tpu.memory_space<vmem>>, vector<1x16xf32>
    %4 = vector.broadcast %3 : vector<1x16xf32> to vector<512x16xf32>
    %5 = arith.addf %2, %4 : vector<512x16xf32>
    %cst_5 = arith.constant 0.000000e+00 : f32
    %6 = vector.broadcast %cst_5 : f32 to vector<512x16xf32>
    %7 = arith.maximumf %5, %6 : vector<512x16xf32>
    %c0_6 = arith.constant 0 : index
    %c0_7 = arith.constant 0 : index
    %8 = vector.load %arg2[%c0_6, %c0_7] : memref<2x512xf32, #tpu.memory_space<vmem>>, vector<2x512xf32>
    %cst_8 = arith.constant dense<0.000000e+00> : vector<2x16xf32>
    %9 = tpu.matmul %8, %7, %cst_8 {dimension_numbers = #tpu.dot_dimension_numbers<[1], [0], [0], [1], [0, 0, 1, 1], [], []>} : vector<2x512xf32>, vector<512x16xf32>, vector<2x16xf32> -> vector<2x16xf32>
    %c0_9 = arith.constant 0 : index
    %c0_10 = arith.constant 0 : index
    %10 = vector.load %arg5[%c0_9, %c0_10] : memref<16x128xf32, #tpu.memory_space<vmem>>, vector<16x128xf32>
    %cst_11 = arith.constant dense<0.000000e+00> : vector<2x128xf32>
    %11 = tpu.matmul %9, %10, %cst_11 {dimension_numbers = #tpu.dot_dimension_numbers<[1], [0], [0], [1], [0, 0, 1, 1], [], []>} : vector<2x16xf32>, vector<16x128xf32>, vector<2x128xf32> -> vector<2x128xf32>
    %c0_12 = arith.constant 0 : index
    %c0_13 = arith.constant 0 : index
    %12 = vector.load %arg6[%c0_12, %c0_13] : memref<1x128xf32, #tpu.memory_space<vmem>>, vector<1x128xf32>
    %13 = vector.broadcast %12 : vector<1x128xf32> to vector<2x128xf32>
    %14 = arith.addf %11, %13 : vector<2x128xf32>
    %cst_14 = arith.constant 0.000000e+00 : f32
    %15 = vector.broadcast %cst_14 : f32 to vector<2x128xf32>
    %16 = arith.maximumf %14, %15 : vector<2x128xf32>
    %c0_15 = arith.constant 0 : index
    %c0_16 = arith.constant 0 : index
    %17 = vector.load %arg7[%c0_15, %c0_16] : memref<2x128xf32, #tpu.memory_space<vmem>>, vector<2x128xf32>
    tpu.vector_store %arg7[%c0_15, %c0_16], %16 {strides = array<i32>} : memref<2x128xf32, #tpu.memory_space<vmem>>, vector<2x128xf32>,
    return
  }
  func.func @transform_0(%arg0: i32) -> (i32, i32) {
    %c0_i32 = arith.constant 0 : i32
    %c0_i32_0 = arith.constant 0 : i32
    %c0_i32_1 = arith.constant 0 : i32
    return %c0_i32, %c0_i32_0 : i32, i32
  }
  func.func @transform_1(%arg0: i32) -> (i32, i32) {
    %c0_i32 = arith.constant 0 : i32
    %c0_i32_0 = arith.constant 0 : i32
    %c0_i32_1 = arith.constant 0 : i32
    return %c0_i32, %c0_i32_0 : i32, i32
  }
  func.func @transform_2(%arg0: i32) -> (i32, i32) {
    %c0_i32 = arith.constant 0 : i32
    %c0_i32_0 = arith.constant 0 : i32
    %c0_i32_1 = arith.constant 0 : i32
    return %c0_i32, %c0_i32_0 : i32, i32
  }
  func.func @transform_3(%arg0: i32) -> (i32, i32) {
    %c0_i32 = arith.constant 0 : i32
    %c0_i32_0 = arith.constant 0 : i32
    %c0_i32_1 = arith.constant 0 : i32
    return %c0_i32, %c0_i32_0 : i32, i32
  }
  func.func @transform_4(%arg0: i32) -> (i32, i32) {
    %c0_i32 = arith.constant 0 : i32
    %c0_i32_0 = arith.constant 0 : i32
    %c0_i32_1 = arith.constant 0 : i32
    return %c0_i32, %c0_i32_0 : i32, i32
  }
  func.func @transform_5(%arg0: i32) -> (i32, i32) {
    %c0_i32 = arith.constant 0 : i32
    %c0_i32_0 = arith.constant 0 : i32
    %c0_i32_1 = arith.constant 0 : i32
    return %c0_i32, %c0_i32_0 : i32, i32
  }
  func.func @transform_6(%arg0: i32) -> (i32, i32) {
    %c0_i32 = arith.constant 0 : i32
    %c0_i32_0 = arith.constant 0 : i32
    %c0_i32_1 = arith.constant 0 : i32
    return %c0_i32, %c0_i32_0 : i32, i32
  }
}

module attributes {stable_mosaic.version = 11 : i64} {
  func.func @_graph_net_kernel(%arg0: i32, %arg1: memref<1x1x128xf32, #tpu.memory_space<vmem>>, %arg2: memref<16x3xf32, #tpu.memory_space<vmem>>, %arg3: memref<48x16xf32, #tpu.memory_space<vmem>>, %arg4: memref<48x16xf32, #tpu.memory_space<vmem>>, %arg5: memref<16x48xf32, #tpu.memory_space<vmem>>, %arg6: memref<3x128xf32, #tpu.memory_space<vmem>>, %arg7: memref<1x128xf32, #tpu.memory_space<vmem>>, %arg8: memref<128x128xf32, #tpu.memory_space<vmem>>, %arg9: memref<1x128xf32, #tpu.memory_space<vmem>>, %arg10: memref<3x128xf32, #tpu.memory_space<vmem>>, %arg11: memref<1x128xf32, #tpu.memory_space<vmem>>, %arg12: memref<1x128xf32, #tpu.memory_space<vmem>>, %arg13: memref<128x128xf32, #tpu.memory_space<vmem>>, %arg14: memref<1x128xf32, #tpu.memory_space<vmem>>, %arg15: memref<128x128xf32, #tpu.memory_space<vmem>>, %arg16: memref<1x128xf32, #tpu.memory_space<vmem>>, %arg17: memref<384x128xf32, #tpu.memory_space<vmem>>, %arg18: memref<1x128xf32, #tpu.memory_space<vmem>>, %arg19: memref<128x1xf32, #tpu.memory_space<vmem>>, %arg20: memref<128x1xf32, #tpu.memory_space<vmem>>, %arg21: memref<256x128xf32, #tpu.memory_space<vmem>>, %arg22: memref<1x128xf32, #tpu.memory_space<vmem>>, %arg23: memref<128x128xf32, #tpu.memory_space<vmem>>, %arg24: memref<1x128xf32, #tpu.memory_space<vmem>>, %arg25: memref<128x128xf32, #tpu.memory_space<vmem>>, %arg26: memref<1x128xf32, #tpu.memory_space<vmem>>, %arg27: memref<1x16x128xf32, #tpu.memory_space<vmem>>) attributes {dimension_semantics = [#tpu.dimension_semantics<parallel>], iteration_bounds = array<i64: 2>, scalar_prefetch = 0 : i64, scratch_operands = 0 : i64, tpu.core_type = #tpu.core_type<tc>, window_params = [{transform_indices = @transform_0, window_bounds = array<i64: 1, 1, 128>}, {pipeline_mode = #tpu.pipeline_mode<synchronous>, transform_indices = @transform_1, window_bounds = array<i64: 16, 3>}, {pipeline_mode = #tpu.pipeline_mode<synchronous>, transform_indices = @transform_2, window_bounds = array<i64: 48, 16>}, {pipeline_mode = #tpu.pipeline_mode<synchronous>, transform_indices = @transform_3, window_bounds = array<i64: 48, 16>}, {pipeline_mode = #tpu.pipeline_mode<synchronous>, transform_indices = @transform_4, window_bounds = array<i64: 16, 48>}, {pipeline_mode = #tpu.pipeline_mode<synchronous>, transform_indices = @transform_5, window_bounds = array<i64: 3, 128>}, {pipeline_mode = #tpu.pipeline_mode<synchronous>, transform_indices = @transform_6, window_bounds = array<i64: 1, 128>}, {pipeline_mode = #tpu.pipeline_mode<synchronous>, transform_indices = @transform_7, window_bounds = array<i64: 128, 128>}, {pipeline_mode = #tpu.pipeline_mode<synchronous>, transform_indices = @transform_8, window_bounds = array<i64: 1, 128>}, {pipeline_mode = #tpu.pipeline_mode<synchronous>, transform_indices = @transform_9, window_bounds = array<i64: 3, 128>}, {pipeline_mode = #tpu.pipeline_mode<synchronous>, transform_indices = @transform_10, window_bounds = array<i64: 1, 128>}, {pipeline_mode = #tpu.pipeline_mode<synchronous>, transform_indices = @transform_11, window_bounds = array<i64: 1, 128>}, {pipeline_mode = #tpu.pipeline_mode<synchronous>, transform_indices = @transform_12, window_bounds = array<i64: 128, 128>}, {pipeline_mode = #tpu.pipeline_mode<synchronous>, transform_indices = @transform_13, window_bounds = array<i64: 1, 128>}, {pipeline_mode = #tpu.pipeline_mode<synchronous>, transform_indices = @transform_14, window_bounds = array<i64: 128, 128>}, {pipeline_mode = #tpu.pipeline_mode<synchronous>, transform_indices = @transform_15, window_bounds = array<i64: 1, 128>}, {pipeline_mode = #tpu.pipeline_mode<synchronous>, transform_indices = @transform_16, window_bounds = array<i64: 384, 128>}, {pipeline_mode = #tpu.pipeline_mode<synchronous>, transform_indices = @transform_17, window_bounds = array<i64: 1, 128>}, {pipeline_mode = #tpu.pipeline_mode<synchronous>, transform_indices = @transform_18, window_bounds = array<i64: 128, 1>}, {pipeline_mode = #tpu.pipeline_mode<synchronous>, transform_indices = @transform_19, window_bounds = array<i64: 128, 1>}, {pipeline_mode = #tpu.pipeline_mode<synchronous>, transform_indices = @transform_20, window_bounds = array<i64: 256, 128>}, {pipeline_mode = #tpu.pipeline_mode<synchronous>, transform_indices = @transform_21, window_bounds = array<i64: 1, 128>}, {pipeline_mode = #tpu.pipeline_mode<synchronous>, transform_indices = @transform_22, window_bounds = array<i64: 128, 128>}, {pipeline_mode = #tpu.pipeline_mode<synchronous>, transform_indices = @transform_23, window_bounds = array<i64: 1, 128>}, {pipeline_mode = #tpu.pipeline_mode<synchronous>, transform_indices = @transform_24, window_bounds = array<i64: 128, 128>}, {pipeline_mode = #tpu.pipeline_mode<synchronous>, transform_indices = @transform_25, window_bounds = array<i64: 1, 128>}, {transform_indices = @transform_26, window_bounds = array<i64: 1, 16, 128>}]} {
    %c0 = arith.constant 0 : index
    %c0_0 = arith.constant 0 : index
    %0 = vector.load %arg2[%c0, %c0_0] : memref<16x3xf32, #tpu.memory_space<vmem>>, vector<16x3xf32>
    %c0_1 = arith.constant 0 : index
    %c0_2 = arith.constant 0 : index
    %1 = vector.load %arg3[%c0_1, %c0_2] : memref<48x16xf32, #tpu.memory_space<vmem>>, vector<48x16xf32>
    %c0_3 = arith.constant 0 : index
    %c0_4 = arith.constant 0 : index
    %2 = vector.load %arg4[%c0_3, %c0_4] : memref<48x16xf32, #tpu.memory_space<vmem>>, vector<48x16xf32>
    %c0_5 = arith.constant 0 : index
    %c0_6 = arith.constant 0 : index
    %3 = vector.load %arg5[%c0_5, %c0_6] : memref<16x48xf32, #tpu.memory_space<vmem>>, vector<16x48xf32>
    %cst = arith.constant dense<0.000000e+00> : vector<48x3xf32>
    %4 = tpu.matmul %1, %0, %cst {dimension_numbers = #tpu.dot_dimension_numbers<[1], [0], [0], [1], [0, 0, 1, 1], [], []>} : vector<48x16xf32>, vector<16x3xf32>, vector<48x3xf32> -> vector<48x3xf32>
    %cst_7 = arith.constant dense<0.000000e+00> : vector<48x3xf32>
    %5 = tpu.matmul %2, %0, %cst_7 {dimension_numbers = #tpu.dot_dimension_numbers<[1], [0], [0], [1], [0, 0, 1, 1], [], []>} : vector<48x16xf32>, vector<16x3xf32>, vector<48x3xf32> -> vector<48x3xf32>
    %6 = arith.subf %4, %5 : vector<48x3xf32>
    %7 = arith.mulf %6, %6 : vector<48x3xf32>
    %cst_8 = arith.constant dense<0.000000e+00> : vector<48xf32>
    %8 = vector.multi_reduction <add>, %7, %cst_8 [1] : vector<48x3xf32> to vector<48xf32>
    %9 = vector.shape_cast %8 : vector<48xf32> to vector<48x1xf32>
    %10 = math.sqrt %9 : vector<48x1xf32>
    %c0_9 = arith.constant 0 : index
    %c0_10 = arith.constant 0 : index
    %11 = vector.load %arg6[%c0_9, %c0_10] : memref<3x128xf32, #tpu.memory_space<vmem>>, vector<3x128xf32>
    %cst_11 = arith.constant dense<0.000000e+00> : vector<16x128xf32>
    %12 = tpu.matmul %0, %11, %cst_11 {dimension_numbers = #tpu.dot_dimension_numbers<[1], [0], [0], [1], [0, 0, 1, 1], [], []>} : vector<16x3xf32>, vector<3x128xf32>, vector<16x128xf32> -> vector<16x128xf32>
    %c0_12 = arith.constant 0 : index
    %c0_13 = arith.constant 0 : index
    %13 = vector.load %arg7[%c0_12, %c0_13] : memref<1x128xf32, #tpu.memory_space<vmem>>, vector<1x128xf32>
    %14 = vector.broadcast %13 : vector<1x128xf32> to vector<16x128xf32>
    %15 = arith.addf %12, %14 : vector<16x128xf32>
    %cst_14 = arith.constant 0.000000e+00 : f32
    %16 = vector.broadcast %cst_14 : f32 to vector<16x128xf32>
    %17 = arith.maximumf %15, %16 : vector<16x128xf32>
    %c0_15 = arith.constant 0 : index
    %c0_16 = arith.constant 0 : index
    %18 = vector.load %arg8[%c0_15, %c0_16] : memref<128x128xf32, #tpu.memory_space<vmem>>, vector<128x128xf32>
    %cst_17 = arith.constant dense<0.000000e+00> : vector<16x128xf32>
    %19 = tpu.matmul %17, %18, %cst_17 {dimension_numbers = #tpu.dot_dimension_numbers<[1], [0], [0], [1], [0, 0, 1, 1], [], []>} : vector<16x128xf32>, vector<128x128xf32>, vector<16x128xf32> -> vector<16x128xf32>
    %c0_18 = arith.constant 0 : index
    %c0_19 = arith.constant 0 : index
    %20 = vector.load %arg9[%c0_18, %c0_19] : memref<1x128xf32, #tpu.memory_space<vmem>>, vector<1x128xf32>
    %21 = vector.broadcast %20 : vector<1x128xf32> to vector<16x128xf32>
    %22 = arith.addf %19, %21 : vector<16x128xf32>
    %c0_20 = arith.constant 0 : index
    %c0_21 = arith.constant 0 : index
    %23 = vector.load %arg10[%c0_20, %c0_21] : memref<3x128xf32, #tpu.memory_space<vmem>>, vector<3x128xf32>
    %cst_22 = arith.constant dense<0.000000e+00> : vector<48x128xf32>
    %24 = tpu.matmul %6, %23, %cst_22 {dimension_numbers = #tpu.dot_dimension_numbers<[1], [0], [0], [1], [0, 0, 1, 1], [], []>} : vector<48x3xf32>, vector<3x128xf32>, vector<48x128xf32> -> vector<48x128xf32>
    %c0_23 = arith.constant 0 : index
    %c0_24 = arith.constant 0 : index
    %25 = vector.load %arg11[%c0_23, %c0_24] : memref<1x128xf32, #tpu.memory_space<vmem>>, vector<1x128xf32>
    %cst_25 = arith.constant dense<0.000000e+00> : vector<48x128xf32>
    %26 = tpu.matmul %10, %25, %cst_25 {dimension_numbers = #tpu.dot_dimension_numbers<[1], [0], [0], [1], [0, 0, 1, 1], [], []>} : vector<48x1xf32>, vector<1x128xf32>, vector<48x128xf32> -> vector<48x128xf32>
    %27 = arith.addf %24, %26 : vector<48x128xf32>
    %c0_26 = arith.constant 0 : index
    %c0_27 = arith.constant 0 : index
    %28 = vector.load %arg12[%c0_26, %c0_27] : memref<1x128xf32, #tpu.memory_space<vmem>>, vector<1x128xf32>
    %29 = vector.broadcast %28 : vector<1x128xf32> to vector<48x128xf32>
    %30 = arith.addf %27, %29 : vector<48x128xf32>
    %cst_28 = arith.constant 0.000000e+00 : f32
    %31 = vector.broadcast %cst_28 : f32 to vector<48x128xf32>
    %32 = arith.maximumf %30, %31 : vector<48x128xf32>
    %c0_29 = arith.constant 0 : index
    %c0_30 = arith.constant 0 : index
    %33 = vector.load %arg13[%c0_29, %c0_30] : memref<128x128xf32, #tpu.memory_space<vmem>>, vector<128x128xf32>
    %cst_31 = arith.constant dense<0.000000e+00> : vector<48x128xf32>
    %34 = tpu.matmul %32, %33, %cst_31 {dimension_numbers = #tpu.dot_dimension_numbers<[1], [0], [0], [1], [0, 0, 1, 1], [], []>} : vector<48x128xf32>, vector<128x128xf32>, vector<48x128xf32> -> vector<48x128xf32>
    %c0_32 = arith.constant 0 : index
    %c0_33 = arith.constant 0 : index
    %35 = vector.load %arg14[%c0_32, %c0_33] : memref<1x128xf32, #tpu.memory_space<vmem>>, vector<1x128xf32>
    %36 = vector.broadcast %35 : vector<1x128xf32> to vector<48x128xf32>
    %37 = arith.addf %34, %36 : vector<48x128xf32>
    %c0_34 = arith.constant 0 : index
    %c0_35 = arith.constant 0 : index
    %c0_36 = arith.constant 0 : index
    %38 = vector.load %arg1[%c0_34, %c0_35, %c0_36] : memref<1x1x128xf32, #tpu.memory_space<vmem>>, vector<1x1x128xf32>
    %39 = vector.shape_cast %38 : vector<1x1x128xf32> to vector<1x128xf32>
    %c0_37 = arith.constant 0 : index
    %c0_38 = arith.constant 0 : index
    %40 = vector.load %arg15[%c0_37, %c0_38] : memref<128x128xf32, #tpu.memory_space<vmem>>, vector<128x128xf32>
    %cst_39 = arith.constant dense<0.000000e+00> : vector<1x128xf32>
    %41 = tpu.matmul %39, %40, %cst_39 {dimension_numbers = #tpu.dot_dimension_numbers<[1], [0], [0], [1], [0, 0, 1, 1], [], []>} : vector<1x128xf32>, vector<128x128xf32>, vector<1x128xf32> -> vector<1x128xf32>
    %c0_40 = arith.constant 0 : index
    %c0_41 = arith.constant 0 : index
    %42 = vector.load %arg16[%c0_40, %c0_41] : memref<1x128xf32, #tpu.memory_space<vmem>>, vector<1x128xf32>
    %43 = arith.addf %41, %42 : vector<1x128xf32>
    %44 = vector.broadcast %43 : vector<1x128xf32> to vector<16x128xf32>
    %45 = arith.addf %22, %44 : vector<16x128xf32>
    %c0_42 = arith.constant 0 : index
    %c0_43 = arith.constant 0 : index
    %46 = vector.load %arg17[%c0_42, %c0_43] : memref<384x128xf32, #tpu.memory_space<vmem>>, vector<384x128xf32>
    %c0_44 = arith.constant 0 : index
    %c0_45 = arith.constant 0 : index
    %47 = vector.load %arg18[%c0_44, %c0_45] : memref<1x128xf32, #tpu.memory_space<vmem>>, vector<1x128xf32>
    %c0_46 = arith.constant 0 : index
    %c0_47 = arith.constant 0 : index
    %48 = vector.load %arg21[%c0_46, %c0_47] : memref<256x128xf32, #tpu.memory_space<vmem>>, vector<256x128xf32>
    %c0_48 = arith.constant 0 : index
    %c0_49 = arith.constant 0 : index
    %49 = vector.load %arg22[%c0_48, %c0_49] : memref<1x128xf32, #tpu.memory_space<vmem>>, vector<1x128xf32>
    %c0_50 = arith.constant 0 : index
    %c0_51 = arith.constant 0 : index
    %50 = vector.load %arg19[%c0_50, %c0_51] : memref<128x1xf32, #tpu.memory_space<vmem>>, vector<128x1xf32>
    %c0_52 = arith.constant 0 : index
    %c0_53 = arith.constant 0 : index
    %51 = vector.load %arg20[%c0_52, %c0_53] : memref<128x1xf32, #tpu.memory_space<vmem>>, vector<128x1xf32>
    %c0_i32 = arith.constant 0 : i32
    %c15_i32 = arith.constant 15 : i32
    %52 = arith.addi %c0_i32, %c15_i32 : i32
    %c1_i32 = arith.constant 1 : i32
    %53:2 = scf.for %arg28 = %c0_i32 to %52 step %c1_i32 iter_args(%arg29 = %45, %arg30 = %37) -> (vector<16x128xf32>, vector<48x128xf32>)  : i32 {
      %cst_68 = arith.constant dense<0.000000e+00> : vector<48x128xf32>
      %69 = tpu.matmul %1, %arg29, %cst_68 {dimension_numbers = #tpu.dot_dimension_numbers<[1], [0], [0], [1], [0, 0, 1, 1], [], []>} : vector<48x16xf32>, vector<16x128xf32>, vector<48x128xf32> -> vector<48x128xf32>
      %cst_69 = arith.constant dense<0.000000e+00> : vector<48x128xf32>
      %70 = tpu.matmul %2, %arg29, %cst_69 {dimension_numbers = #tpu.dot_dimension_numbers<[1], [0], [0], [1], [0, 0, 1, 1], [], []>} : vector<48x16xf32>, vector<16x128xf32>, vector<48x128xf32> -> vector<48x128xf32>
      %71 = tpu.concatenate %69, %70, %arg30 in 1 : vector<48x128xf32>, vector<48x128xf32>, vector<48x128xf32> -> vector<48x384xf32>
      %cst_70 = arith.constant dense<0.000000e+00> : vector<48x128xf32>
      %72 = tpu.matmul %71, %46, %cst_70 {dimension_numbers = #tpu.dot_dimension_numbers<[1], [0], [0], [1], [0, 0, 1, 1], [], []>} : vector<48x384xf32>, vector<384x128xf32>, vector<48x128xf32> -> vector<48x128xf32>
      %73 = vector.broadcast %47 : vector<1x128xf32> to vector<48x128xf32>
      %74 = arith.addf %72, %73 : vector<48x128xf32>
      %cst_71 = arith.constant 0.000000e+00 : f32
      %75 = vector.broadcast %cst_71 : f32 to vector<48x128xf32>
      %76 = arith.maximumf %74, %75 : vector<48x128xf32>
      %77 = arith.addf %arg30, %76 : vector<48x128xf32>
      %cst_72 = arith.constant dense<0.000000e+00> : vector<16x1xf32>
      %78 = tpu.matmul %arg29, %50, %cst_72 {dimension_numbers = #tpu.dot_dimension_numbers<[1], [0], [0], [1], [0, 0, 1, 1], [], []>} : vector<16x128xf32>, vector<128x1xf32>, vector<16x1xf32> -> vector<16x1xf32>
      %cst_73 = arith.constant dense<0.000000e+00> : vector<48x1xf32>
      %79 = tpu.matmul %1, %78, %cst_73 {dimension_numbers = #tpu.dot_dimension_numbers<[1], [0], [0], [1], [0, 0, 1, 1], [], []>} : vector<48x16xf32>, vector<16x1xf32>, vector<48x1xf32> -> vector<48x1xf32>
      %cst_74 = arith.constant dense<0.000000e+00> : vector<16x1xf32>
      %80 = tpu.matmul %arg29, %51, %cst_74 {dimension_numbers = #tpu.dot_dimension_numbers<[1], [0], [0], [1], [0, 0, 1, 1], [], []>} : vector<16x128xf32>, vector<128x1xf32>, vector<16x1xf32> -> vector<16x1xf32>
      %cst_75 = arith.constant dense<0.000000e+00> : vector<48x1xf32>
      %81 = tpu.matmul %2, %80, %cst_75 {dimension_numbers = #tpu.dot_dimension_numbers<[1], [0], [0], [1], [0, 0, 1, 1], [], []>} : vector<48x16xf32>, vector<16x1xf32>, vector<48x1xf32> -> vector<48x1xf32>
      %82 = arith.addf %79, %81 : vector<48x1xf32>
      %cst_76 = arith.constant 0.000000e+00 : f32
      %83 = vector.broadcast %cst_76 : f32 to vector<48x1xf32>
      %84 = arith.cmpf ogt, %82, %83 : vector<48x1xf32>
      %cst_77 = arith.constant 2.000000e-01 : f32
      %85 = vector.broadcast %cst_77 : f32 to vector<48x1xf32>
      %86 = arith.mulf %85, %82 : vector<48x1xf32>
      %87 = arith.select %84, %82, %86 : vector<48x1xi1>, vector<48x1xf32>
      %cst_78 = arith.constant dense<0xFF800000> : vector<1xf32>
      %88 = vector.multi_reduction <maximumf>, %87, %cst_78 [0] : vector<48x1xf32> to vector<1xf32>
      %89 = vector.shape_cast %88 : vector<1xf32> to vector<1x1xf32>
      %90 = vector.broadcast %89 : vector<1x1xf32> to vector<48x1xf32>
      %91 = arith.subf %87, %90 : vector<48x1xf32>
      %92 = math.exp %91 : vector<48x1xf32>
      %cst_79 = arith.constant dense<0.000000e+00> : vector<16x1xf32>
      %93 = tpu.matmul %3, %92, %cst_79 {dimension_numbers = #tpu.dot_dimension_numbers<[1], [0], [0], [1], [0, 0, 1, 1], [], []>} : vector<16x48xf32>, vector<48x1xf32>, vector<16x1xf32> -> vector<16x1xf32>
      %cst_80 = arith.constant dense<0.000000e+00> : vector<48x1xf32>
      %94 = tpu.matmul %2, %93, %cst_80 {dimension_numbers = #tpu.dot_dimension_numbers<[1], [0], [0], [1], [0, 0, 1, 1], [], []>} : vector<48x16xf32>, vector<16x1xf32>, vector<48x1xf32> -> vector<48x1xf32>
      %cst_81 = arith.constant 9.99999971E-10 : f32
      %95 = vector.broadcast %cst_81 : f32 to vector<48x1xf32>
      %96 = arith.maximumf %94, %95 : vector<48x1xf32>
      %97 = tpu.reciprocal %96 {approx = true} : vector<48x1xf32> -> vector<48x1xf32>
      %98 = arith.mulf %92, %97 : vector<48x1xf32>
      %99 = vector.broadcast %98 : vector<48x1xf32> to vector<48x128xf32>
      %100 = arith.mulf %99, %76 : vector<48x128xf32>
      %cst_82 = arith.constant dense<0.000000e+00> : vector<16x128xf32>
      %101 = tpu.matmul %3, %100, %cst_82 {dimension_numbers = #tpu.dot_dimension_numbers<[1], [0], [0], [1], [0, 0, 1, 1], [], []>} : vector<16x48xf32>, vector<48x128xf32>, vector<16x128xf32> -> vector<16x128xf32>
      %102 = tpu.concatenate %arg29, %101 in 1 : vector<16x128xf32>, vector<16x128xf32> -> vector<16x256xf32>
      %cst_83 = arith.constant dense<0.000000e+00> : vector<16x128xf32>
      %103 = tpu.matmul %102, %48, %cst_83 {dimension_numbers = #tpu.dot_dimension_numbers<[1], [0], [0], [1], [0, 0, 1, 1], [], []>} : vector<16x256xf32>, vector<256x128xf32>, vector<16x128xf32> -> vector<16x128xf32>
      %104 = vector.broadcast %49 : vector<1x128xf32> to vector<16x128xf32>
      %105 = arith.addf %103, %104 : vector<16x128xf32>
      %cst_84 = arith.constant 0.000000e+00 : f32
      %106 = vector.broadcast %cst_84 : f32 to vector<16x128xf32>
      %107 = arith.maximumf %105, %106 : vector<16x128xf32>
      %108 = arith.addf %arg29, %107 : vector<16x128xf32>
      scf.yield %108, %77 : vector<16x128xf32>, vector<48x128xf32>
    }
    %c0_54 = arith.constant 0 : index
    %c0_55 = arith.constant 0 : index
    %54 = vector.load %arg23[%c0_54, %c0_55] : memref<128x128xf32, #tpu.memory_space<vmem>>, vector<128x128xf32>
    %cst_56 = arith.constant dense<0.000000e+00> : vector<16x128xf32>
    %55 = tpu.matmul %53#0, %54, %cst_56 {dimension_numbers = #tpu.dot_dimension_numbers<[1], [0], [0], [1], [0, 0, 1, 1], [], []>} : vector<16x128xf32>, vector<128x128xf32>, vector<16x128xf32> -> vector<16x128xf32>
    %c0_57 = arith.constant 0 : index
    %c0_58 = arith.constant 0 : index
    %56 = vector.load %arg24[%c0_57, %c0_58] : memref<1x128xf32, #tpu.memory_space<vmem>>, vector<1x128xf32>
    %57 = vector.broadcast %56 : vector<1x128xf32> to vector<16x128xf32>
    %58 = arith.addf %55, %57 : vector<16x128xf32>
    %cst_59 = arith.constant 0.000000e+00 : f32
    %59 = vector.broadcast %cst_59 : f32 to vector<16x128xf32>
    %60 = arith.maximumf %58, %59 : vector<16x128xf32>
    %c0_60 = arith.constant 0 : index
    %c0_61 = arith.constant 0 : index
    %61 = vector.load %arg25[%c0_60, %c0_61] : memref<128x128xf32, #tpu.memory_space<vmem>>, vector<128x128xf32>
    %cst_62 = arith.constant dense<0.000000e+00> : vector<16x128xf32>
    %62 = tpu.matmul %60, %61, %cst_62 {dimension_numbers = #tpu.dot_dimension_numbers<[1], [0], [0], [1], [0, 0, 1, 1], [], []>} : vector<16x128xf32>, vector<128x128xf32>, vector<16x128xf32> -> vector<16x128xf32>
    %c0_63 = arith.constant 0 : index
    %c0_64 = arith.constant 0 : index
    %63 = vector.load %arg26[%c0_63, %c0_64] : memref<1x128xf32, #tpu.memory_space<vmem>>, vector<1x128xf32>
    %64 = vector.broadcast %63 : vector<1x128xf32> to vector<16x128xf32>
    %65 = arith.addf %62, %64 : vector<16x128xf32>
    %c0_65 = arith.constant 0 : index
    %c0_66 = arith.constant 0 : index
    %c0_67 = arith.constant 0 : index
    %66 = vector.load %arg27[%c0_65, %c0_66, %c0_67] : memref<1x16x128xf32, #tpu.memory_space<vmem>>, vector<1x16x128xf32>
    %67 = vector.shape_cast %66 : vector<1x16x128xf32> to vector<16x128xf32>
    %68 = vector.shape_cast %65 : vector<16x128xf32> to vector<1x16x128xf32>
    tpu.vector_store %arg27[%c0_65, %c0_66, %c0_67], %68 {strides = array<i32>} : memref<1x16x128xf32, #tpu.memory_space<vmem>>, vector<1x16x128xf32>,
    return
  }
  func.func @transform_0(%arg0: i32) -> (i32, i32, i32) {
    %c0_i32 = arith.constant 0 : i32
    %c0_i32_0 = arith.constant 0 : i32
    %c0_i32_1 = arith.constant 0 : i32
    return %arg0, %c0_i32, %c0_i32_0 : i32, i32, i32
  }
  func.func @transform_1(%arg0: i32) -> (i32, i32) {
    %c0_i32 = arith.constant 0 : i32
    %c0_i32_0 = arith.constant 0 : i32
    %c0_i32_1 = arith.constant 0 : i32
    return %c0_i32, %c0_i32_0 : i32, i32
  }
  func.func @transform_2(%arg0: i32) -> (i32, i32) {
    %c0_i32 = arith.constant 0 : i32
    %c0_i32_0 = arith.constant 0 : i32
    %c0_i32_1 = arith.constant 0 : i32
    return %c0_i32, %c0_i32_0 : i32, i32
  }
  func.func @transform_3(%arg0: i32) -> (i32, i32) {
    %c0_i32 = arith.constant 0 : i32
    %c0_i32_0 = arith.constant 0 : i32
    %c0_i32_1 = arith.constant 0 : i32
    return %c0_i32, %c0_i32_0 : i32, i32
  }
  func.func @transform_4(%arg0: i32) -> (i32, i32) {
    %c0_i32 = arith.constant 0 : i32
    %c0_i32_0 = arith.constant 0 : i32
    %c0_i32_1 = arith.constant 0 : i32
    return %c0_i32, %c0_i32_0 : i32, i32
  }
  func.func @transform_5(%arg0: i32) -> (i32, i32) {
    %c0_i32 = arith.constant 0 : i32
    %c0_i32_0 = arith.constant 0 : i32
    %c0_i32_1 = arith.constant 0 : i32
    return %c0_i32, %c0_i32_0 : i32, i32
  }
  func.func @transform_6(%arg0: i32) -> (i32, i32) {
    %c0_i32 = arith.constant 0 : i32
    %c0_i32_0 = arith.constant 0 : i32
    %c0_i32_1 = arith.constant 0 : i32
    return %c0_i32, %c0_i32_0 : i32, i32
  }
  func.func @transform_7(%arg0: i32) -> (i32, i32) {
    %c0_i32 = arith.constant 0 : i32
    %c0_i32_0 = arith.constant 0 : i32
    %c0_i32_1 = arith.constant 0 : i32
    return %c0_i32, %c0_i32_0 : i32, i32
  }
  func.func @transform_8(%arg0: i32) -> (i32, i32) {
    %c0_i32 = arith.constant 0 : i32
    %c0_i32_0 = arith.constant 0 : i32
    %c0_i32_1 = arith.constant 0 : i32
    return %c0_i32, %c0_i32_0 : i32, i32
  }
  func.func @transform_9(%arg0: i32) -> (i32, i32) {
    %c0_i32 = arith.constant 0 : i32
    %c0_i32_0 = arith.constant 0 : i32
    %c0_i32_1 = arith.constant 0 : i32
    return %c0_i32, %c0_i32_0 : i32, i32
  }
  func.func @transform_10(%arg0: i32) -> (i32, i32) {
    %c0_i32 = arith.constant 0 : i32
    %c0_i32_0 = arith.constant 0 : i32
    %c0_i32_1 = arith.constant 0 : i32
    return %c0_i32, %c0_i32_0 : i32, i32
  }
  func.func @transform_11(%arg0: i32) -> (i32, i32) {
    %c0_i32 = arith.constant 0 : i32
    %c0_i32_0 = arith.constant 0 : i32
    %c0_i32_1 = arith.constant 0 : i32
    return %c0_i32, %c0_i32_0 : i32, i32
  }
  func.func @transform_12(%arg0: i32) -> (i32, i32) {
    %c0_i32 = arith.constant 0 : i32
    %c0_i32_0 = arith.constant 0 : i32
    %c0_i32_1 = arith.constant 0 : i32
    return %c0_i32, %c0_i32_0 : i32, i32
  }
  func.func @transform_13(%arg0: i32) -> (i32, i32) {
    %c0_i32 = arith.constant 0 : i32
    %c0_i32_0 = arith.constant 0 : i32
    %c0_i32_1 = arith.constant 0 : i32
    return %c0_i32, %c0_i32_0 : i32, i32
  }
  func.func @transform_14(%arg0: i32) -> (i32, i32) {
    %c0_i32 = arith.constant 0 : i32
    %c0_i32_0 = arith.constant 0 : i32
    %c0_i32_1 = arith.constant 0 : i32
    return %c0_i32, %c0_i32_0 : i32, i32
  }
  func.func @transform_15(%arg0: i32) -> (i32, i32) {
    %c0_i32 = arith.constant 0 : i32
    %c0_i32_0 = arith.constant 0 : i32
    %c0_i32_1 = arith.constant 0 : i32
    return %c0_i32, %c0_i32_0 : i32, i32
  }
  func.func @transform_16(%arg0: i32) -> (i32, i32) {
    %c0_i32 = arith.constant 0 : i32
    %c0_i32_0 = arith.constant 0 : i32
    %c0_i32_1 = arith.constant 0 : i32
    return %c0_i32, %c0_i32_0 : i32, i32
  }
  func.func @transform_17(%arg0: i32) -> (i32, i32) {
    %c0_i32 = arith.constant 0 : i32
    %c0_i32_0 = arith.constant 0 : i32
    %c0_i32_1 = arith.constant 0 : i32
    return %c0_i32, %c0_i32_0 : i32, i32
  }
  func.func @transform_18(%arg0: i32) -> (i32, i32) {
    %c0_i32 = arith.constant 0 : i32
    %c0_i32_0 = arith.constant 0 : i32
    %c0_i32_1 = arith.constant 0 : i32
    return %c0_i32, %c0_i32_0 : i32, i32
  }
  func.func @transform_19(%arg0: i32) -> (i32, i32) {
    %c0_i32 = arith.constant 0 : i32
    %c0_i32_0 = arith.constant 0 : i32
    %c0_i32_1 = arith.constant 0 : i32
    return %c0_i32, %c0_i32_0 : i32, i32
  }
  func.func @transform_20(%arg0: i32) -> (i32, i32) {
    %c0_i32 = arith.constant 0 : i32
    %c0_i32_0 = arith.constant 0 : i32
    %c0_i32_1 = arith.constant 0 : i32
    return %c0_i32, %c0_i32_0 : i32, i32
  }
  func.func @transform_21(%arg0: i32) -> (i32, i32) {
    %c0_i32 = arith.constant 0 : i32
    %c0_i32_0 = arith.constant 0 : i32
    %c0_i32_1 = arith.constant 0 : i32
    return %c0_i32, %c0_i32_0 : i32, i32
  }
  func.func @transform_22(%arg0: i32) -> (i32, i32) {
    %c0_i32 = arith.constant 0 : i32
    %c0_i32_0 = arith.constant 0 : i32
    %c0_i32_1 = arith.constant 0 : i32
    return %c0_i32, %c0_i32_0 : i32, i32
  }
  func.func @transform_23(%arg0: i32) -> (i32, i32) {
    %c0_i32 = arith.constant 0 : i32
    %c0_i32_0 = arith.constant 0 : i32
    %c0_i32_1 = arith.constant 0 : i32
    return %c0_i32, %c0_i32_0 : i32, i32
  }
  func.func @transform_24(%arg0: i32) -> (i32, i32) {
    %c0_i32 = arith.constant 0 : i32
    %c0_i32_0 = arith.constant 0 : i32
    %c0_i32_1 = arith.constant 0 : i32
    return %c0_i32, %c0_i32_0 : i32, i32
  }
  func.func @transform_25(%arg0: i32) -> (i32, i32) {
    %c0_i32 = arith.constant 0 : i32
    %c0_i32_0 = arith.constant 0 : i32
    %c0_i32_1 = arith.constant 0 : i32
    return %c0_i32, %c0_i32_0 : i32, i32
  }
  func.func @transform_26(%arg0: i32) -> (i32, i32, i32) {
    %c0_i32 = arith.constant 0 : i32
    %c0_i32_0 = arith.constant 0 : i32
    %c0_i32_1 = arith.constant 0 : i32
    return %arg0, %c0_i32, %c0_i32_0 : i32, i32, i32
  }
}

</mosaic_0001>

<bundles_post_ra>
// kernel: cloth_model_forward.2
= control target key start
LH: loop header
LB: loop body
LE: loop exit
PB: predicated region body
PF: predicated region fallthrough
CT: control target
= control target key end

     0   :  { %vm291_vm0 = vcmask 1042432   ;;  %vm98_vm1 = vcmask 220160   ;;  %vm1330_vm2 = vmmov 0   ;;  %vm916_vm3 = vcmask 130048   ;;  %s1851_s2 = inlined_call_operand.vmem [shape: f32[27,16], index: 2, kind: input, shape index: {}]   ;;  %s1852_s0 = inlined_call_operand.vmem [shape: f32[512,27], index: 0, kind: input, shape index: {}]   ;;  %s1853_s1 = inlined_call_operand.vmem [shape: f32[2,512], index: 1, kind: input, shape index: {}]   ;;  %s1854_s3 = inlined_call_operand.vmem [shape: f32[1,16], index: 3, kind: input, shape index: {}]   ;;  %s1855_s4 = inlined_call_operand.vmem [shape: f32[16,128], index: 4, kind: input, shape index: {}]   ;;  %s1856_s5 = inlined_call_operand.vmem [shape: f32[1,128], index: 5, kind: input, shape index: {}]   ;;  %s1857_s6 = inlined_call_operand.vmem [shape: f32[2,128], index: 6, kind: output, shape index: {}]  }
   0x1   :  { %v90_v0 = vld [vmem:[%s1851_s2 + $0x18] sm:$0x7]  ;;  %v89_v1 = vld [vmem:[%s1851_s2 + $0x10] sm:$0xff]  ;;  %v23_v2 = vld [vmem:[%s1852_s0] sm:$0xff] }
   0x2   :  { %1205 = vmatprep.subr.msk.mxu0 %vm291_vm0, %v90_v0  ;;  %1316 = vmatprep.subr.msk.mxu1 %vm291_vm0, %v90_v0  ;;  %v88_v3 = vld [vmem:[%s1851_s2 + $0x8] sm:$0xff]  ;;  %v87_v4 = vld [vmem:[%s1851_s2] sm:$0xff]  ;;  %v25_v6 = vld [vmem:[%s1852_s0 + $0x10] sm:$0xff] }
   0x3   :  { %1206 = vmatpush3.msk.msra.mxu0 %vm291_vm0, %v90_v0  ;;  %1213 = vmatprep.mubr.msk.f32.mxu0 %vm98_vm1, %v23_v2  ;;  %v24_v5 = vld [vmem:[%s1852_s0 + $0x8] sm:$0xff]  ;;  %v26_v7 = vld [vmem:[%s1852_s0 + $0x18] sm:$0xff]  ;;  %v65_v8 = vld [vmem:[%s1852_s0 + $0x150] sm:$0xff] }
   0x4   :  { %1207 = vmatprep.subr.mxu0 %v89_v1  ;;  %1320 = vmatpush3.msk.msra.mxu1 %vm291_vm0, %v90_v0  ;;  %v27_v9 = vld [vmem:[%s1852_s0 + $0x20] sm:$0xff]  ;;  %v66_v10 = vld [vmem:[%s1852_s0 + $0x158] sm:$0xff]  ;;  %v68_v12 = vld [vmem:[%s1852_s0 + $0x168] sm:$0xff] }
   0x5   :  { %1208 = vmatpush3.msra.mxu0 %v89_v1  ;;  %1317 = vmatprep.subr.mxu1 %v89_v1  ;;  %v67_v11 = vld [vmem:[%s1852_s0 + $0x160] sm:$0xff]  ;;  %v28_v13 = vld [vmem:[%s1852_s0 + $0x28] sm:$0xff]  ;;  %v69_v14 = vld [vmem:[%s1852_s0 + $0x170] sm:$0xff] }
   0x6   :  { %1209 = vmatprep.subr.mxu0 %v88_v3  ;;  %1321 = vmatpush3.msra.mxu1 %v89_v1  ;;  %v29_v15 = vld [vmem:[%s1852_s0 + $0x30] sm:$0xff]  ;;  %v70_v16 = vld [vmem:[%s1852_s0 + $0x178] sm:$0xff]  ;;  %v71_v18 = vld [vmem:[%s1852_s0 + $0x180] sm:$0xff] }
   0x7   :  { %1210 = vmatpush3.msra.mxu0 %v88_v3  ;;  %1318 = vmatprep.subr.mxu1 %v88_v3  ;;  %v30_v17 = vld [vmem:[%s1852_s0 + $0x38] sm:$0xff]  ;;  %v31_v19 = vld [vmem:[%s1852_s0 + $0x40] sm:$0xff]  ;;  %v72_v20 = vld [vmem:[%s1852_s0 + $0x188] sm:$0xff] }
   0x8   :  { %1211 = vmatprep.subr.mxu0 %v87_v4  ;;  %1322 = vmatpush3.msra.mxu1 %v88_v3  ;;  %v32_v21 = vld [vmem:[%s1852_s0 + $0x48] sm:$0xff]  ;;  %v73_v22 = vld [vmem:[%s1852_s0 + $0x190] sm:$0xff]  ;;  %v74_v24 = vld [vmem:[%s1852_s0 + $0x198] sm:$0xff] }
   0x9   :  { %1212 = vmatpush3.msra.mxu0 %v87_v4  ;;  %1319 = vmatprep.subr.mxu1 %v87_v4  ;;  %v33_v23 = vld [vmem:[%s1852_s0 + $0x50] sm:$0xff]  ;;  %v34_v25 = vld [vmem:[%s1852_s0 + $0x58] sm:$0xff]  ;;  %v75_v26 = vld [vmem:[%s1852_s0 + $0x1a0] sm:$0xff] }
   0xa   :  { %1214 = vmatmul.mubr.msk.f32.vlgmr.msra.gmra.mxu0 %vm98_vm1, %v24_v5  ;;  %1323 = vmatpush3.msra.mxu1 %v87_v4  ;;  %v35_v27 = vld [vmem:[%s1852_s0 + $0x60] sm:$0xff]  ;;  %v76_v28 = vld [vmem:[%s1852_s0 + $0x1a8] sm:$0xff]  ;;  %v77_v30 = vld [vmem:[%s1852_s0 + $0x1b0] sm:$0xff]  ;;  %v1328_v4 = vmov 1983009808  }
   0xb   :  { %1216 = vmatprep.mubr.msk.f32.mxu0 %vm98_vm1, %v25_v6  ;;  %1276 = vmatprep.mubr.msk.f32.mxu1 %vm98_vm1, %v65_v8  ;;  %v36_v29 = vld [vmem:[%s1852_s0 + $0x68] sm:$0xff]  ;;  %v37_v31 = vld [vmem:[%s1852_s0 + $0x70] sm:$0xff]  ;;  %v78_v32 = vld [vmem:[%s1852_s0 + $0x1b8] sm:$0xff]  ;;  %v748_v5 = vunpack.c.l.s4 %v1328_v4  ;;  %v750_v6 = vlaneseq }
   0xc   :  { %1277 = vmatmul.mubr.msk.f32.vlgmr.msra.gmra.mxu1 %vm98_vm1, %v66_v10  ;;  %v38_v33 = vld [vmem:[%s1852_s0 + $0x78] sm:$0xff]  ;;  %v79_v34 = vld [vmem:[%s1852_s0 + $0x1c0] sm:$0xff]  ;;  %v80_v36 = vld [vmem:[%s1852_s0 + $0x1c8] sm:$0xff] }
   0xd   :  { %1279 = vmatprep.mubr.msk.f32.mxu1 %vm98_vm1, %v67_v11  ;;  %v39_v35 = vld [vmem:[%s1852_s0 + $0x80] sm:$0xff]  ;;  %v40_v37 = vld [vmem:[%s1852_s0 + $0x88] sm:$0xff]  ;;  %v81_v38 = vld [vmem:[%s1852_s0 + $0x1d0] sm:$0xff]  ;;  %v751_v8 = vshrl.u32 %v750_v6, 7 }
   0xe   :  { %1217 = vmatmul.mubr.msk.f32.gmra.mxu0 %vm98_vm1, %v26_v7  ;;  %v41_v39 = vld [vmem:[%s1852_s0 + $0x90] sm:$0xff]  ;;  %v82_v40 = vld [vmem:[%s1852_s0 + $0x1d8] sm:$0xff]  ;;  %v83_v42 = vld [vmem:[%s1852_s0 + $0x1e0] sm:$0xff]  ;;  %v749_v7 = vunpack.c.0.s8 %v748_v5 }
   0xf   :  { %1219 = vmatprep.mubr.msk.f32.mxu0 %vm98_vm1, %v27_v9  ;;  %v42_v41 = vld [vmem:[%s1852_s0 + $0x98] sm:$0xff]  ;;  %v43_v43 = vld [vmem:[%s1852_s0 + $0xa0] sm:$0xff]  ;;  %v84_v44 = vld [vmem:[%s1852_s0 + $0x1e8] sm:$0xff] }
  0x10   :  { %1280 = vmatmul.mubr.msk.f32.gmra.mxu1 %vm98_vm1, %v68_v12  ;;  %v44_v45 = vld [vmem:[%s1852_s0 + $0xa8] sm:$0xff]  ;;  %v85_v46 = vld [vmem:[%s1852_s0 + $0x1f0] sm:$0xff]  ;;  %v86_v48 = vld [vmem:[%s1852_s0 + $0x1f8] sm:$0xff]  ;;  %v752_v9 = vsub.s32 %v749_v7, %v751_v8 }
  0x11   :  { %1282 = vmatprep.mubr.msk.f32.mxu1 %vm98_vm1, %v69_v14  ;;  %v45_v47 = vld [vmem:[%s1852_s0 + $0xb0] sm:$0xff]  ;;  %v46_v49 = vld [vmem:[%s1852_s0 + $0xb8] sm:$0xff]  ;;  %v47_v50 = vld [vmem:[%s1852_s0 + $0xc0] sm:$0xff] }
  0x12   :  { %1220 = vmatmul.mubr.msk.f32.gmra.mxu0 %vm98_vm1, %v28_v13  ;;  %v48_v51 = vld [vmem:[%s1852_s0 + $0xc8] sm:$0xff]  ;;  %v49_v52 = vld [vmem:[%s1852_s0 + $0xd0] sm:$0xff]  ;;  %v50_v53 = vld [vmem:[%s1852_s0 + $0xd8] sm:$0xff] }
  0x13   :  { %1222 = vmatprep.mubr.msk.f32.mxu0 %vm98_vm1, %v29_v15  ;;  %v51_v54 = vld [vmem:[%s1852_s0 + $0xe0] sm:$0xff]  ;;  %v52_v55 = vld [vmem:[%s1852_s0 + $0xe8] sm:$0xff]  ;;  %v53_v56 = vld [vmem:[%s1852_s0 + $0xf0] sm:$0xff] }
  0x14   :  { %1283 = vmatmul.mubr.msk.f32.gmra.mxu1 %vm98_vm1, %v70_v16  ;;  %v54_v57 = vld [vmem:[%s1852_s0 + $0xf8] sm:$0xff]  ;;  %v55_v58 = vld [vmem:[%s1852_s0 + $0x100] sm:$0xff]  ;;  %v56_v59 = vld [vmem:[%s1852_s0 + $0x108] sm:$0xff] }
  0x15   :  { %1285 = vmatprep.mubr.msk.f32.mxu1 %vm98_vm1, %v71_v18  ;;  %v57_v60 = vld [vmem:[%s1852_s0 + $0x110] sm:$0xff]  ;;  %v58_v61 = vld [vmem:[%s1852_s0 + $0x118] sm:$0xff]  ;;  %v59_v62 = vld [vmem:[%s1852_s0 + $0x120] sm:$0xff] }
  0x16   :  { %1223 = vmatmul.mubr.msk.f32.gmra.mxu0 %vm98_vm1, %v30_v17  ;;  %v60_v63 = vld [vmem:[%s1852_s0 + $0x128] sm:$0xff]  ;;  %v61_v0 = vld [vmem:[%s1852_s0 + $0x130] sm:$0xff]  ;;  %v62_v1 = vld [vmem:[%s1852_s0 + $0x138] sm:$0xff] }
  0x17   :  { %1225 = vmatprep.mubr.msk.f32.mxu0 %vm98_vm1, %v31_v19  ;;  %v63_v2 = vld [vmem:[%s1852_s0 + $0x140] sm:$0xff]  ;;  %v64_v3 = vld [vmem:[%s1852_s0 + $0x148] sm:$0xff] }
  0x18   :  { %1286 = vmatmul.mubr.msk.f32.gmra.mxu1 %vm98_vm1, %v72_v20  ;;  %v744_v10 = vld [vmem:[%s1853_s1] sm:$0xff] }
  0x19   :  { %1288 = vmatprep.mubr.msk.f32.mxu1 %vm98_vm1, %v73_v22  ;;  %v1637_v11 = vrot.slane %v744_v10, %v752_v9  ;;  %v746_v13 = vcombine.high %v744_v10, %v744_v10 }
  0x1a   :  { %1226 = vmatmul.mubr.msk.f32.gmra.mxu0 %vm98_vm1, %v32_v21 }
  0x1b   :  { %1228 = vmatprep.mubr.msk.f32.mxu0 %vm98_vm1, %v33_v23  ;;  %v761_v12 = vcombine.high %v1637_v11, %v1637_v11  ;;  %v1641_v14 = vrot.slane %v746_v13, %v752_v9 }
  0x1c   :  { %1289 = vmatmul.mubr.msk.f32.gmra.mxu1 %vm98_vm1, %v74_v24 }
  0x1d   :  { %1291 = vmatprep.mubr.msk.f32.mxu1 %vm98_vm1, %v75_v26 }
  0x1e   :  { %1229 = vmatmul.mubr.msk.f32.gmra.mxu0 %vm98_vm1, %v34_v25 }
  0x1f   :  { %1231 = vmatprep.mubr.msk.f32.mxu0 %vm98_vm1, %v35_v27 }
  0x20   :  { %1292 = vmatmul.mubr.msk.f32.gmra.mxu1 %vm98_vm1, %v76_v28 }
  0x21   :  { %1294 = vmatprep.mubr.msk.f32.mxu1 %vm98_vm1, %v77_v30 }
  0x22   :  { %1232 = vmatmul.mubr.msk.f32.gmra.mxu0 %vm98_vm1, %v36_v29 }
  0x23   :  { %1234 = vmatprep.mubr.msk.f32.mxu0 %vm98_vm1, %v37_v31 }
  0x24   :  { %1295 = vmatmul.mubr.msk.f32.gmra.mxu1 %vm98_vm1, %v78_v32 }
  0x25   :  { %1297 = vmatprep.mubr.msk.f32.mxu1 %vm98_vm1, %v79_v34 }
  0x26   :  { %1235 = vmatmul.mubr.msk.f32.gmra.mxu0 %vm98_vm1, %v38_v33 }
  0x27   :  { %1237 = vmatprep.mubr.msk.f32.mxu0 %vm98_vm1, %v39_v35 }
  0x28   :  { %1298 = vmatmul.mubr.msk.f32.gmra.mxu1 %vm98_vm1, %v80_v36 }
  0x29   :  { %1300 = vmatprep.mubr.msk.f32.mxu1 %vm98_vm1, %v81_v38 }
  0x2a   :  { %1238 = vmatmul.mubr.msk.f32.gmra.mxu0 %vm98_vm1, %v40_v37 }
  0x2b   :  { %1240 = vmatprep.mubr.msk.f32.mxu0 %vm98_vm1, %v41_v39 }
  0x2c   :  { %1301 = vmatmul.mubr.msk.f32.gmra.mxu1 %vm98_vm1, %v82_v40 }
  0x2d   :  { %1303 = vmatprep.mubr.msk.f32.mxu1 %vm98_vm1, %v83_v42 }
  0x2e   :  { %1241 = vmatmul.mubr.msk.f32.gmra.mxu0 %vm98_vm1, %v42_v41 }
  0x2f   :  { %1243 = vmatprep.mubr.msk.f32.mxu0 %vm98_vm1, %v43_v43 }
  0x30   :  { %1304 = vmatmul.mubr.msk.f32.gmra.mxu1 %vm98_vm1, %v84_v44 }
  0x31   :  { %1306 = vmatprep.mubr.msk.f32.mxu1 %vm98_vm1, %v85_v46 }
  0x32   :  { %1244 = vmatmul.mubr.msk.f32.gmra.mxu0 %vm98_vm1, %v44_v45 }
  0x33   :  { %1246 = vmatprep.mubr.msk.f32.mxu0 %vm98_vm1, %v45_v47 }
  0x34   :  { %1307 = vmatmul.mubr.msk.f32.gmra.mxu1 %vm98_vm1, %v86_v48 }
  0x35   :  { %831 = vmatprep.mubr.f32.mxu1 %v761_v12 }
  0x36   :  { %1247 = vmatmul.mubr.msk.f32.gmra.mxu0 %vm98_vm1, %v46_v49 }
  0x37   :  { %1249 = vmatprep.mubr.msk.f32.mxu0 %vm98_vm1, %v47_v50 }
  0x3a   :  { %1250 = vmatmul.mubr.msk.f32.gmra.mxu0 %vm98_vm1, %v48_v51 }
  0x3b   :  { %1252 = vmatprep.mubr.msk.f32.mxu0 %vm98_vm1, %v49_v52 }
  0x3e   :  { %1253 = vmatmul.mubr.msk.f32.gmra.mxu0 %vm98_vm1, %v50_v53 }
  0x3f   :  { %1255 = vmatprep.mubr.msk.f32.mxu0 %vm98_vm1, %v51_v54 }
  0x42   :  { %1256 = vmatmul.mubr.msk.f32.gmra.mxu0 %vm98_vm1, %v52_v55 }
  0x43   :  { %1258 = vmatprep.mubr.msk.f32.mxu0 %vm98_vm1, %v53_v56 }
  0x46   :  { %1259 = vmatmul.mubr.msk.f32.gmra.mxu0 %vm98_vm1, %v54_v57 }
  0x47   :  { %1261 = vmatprep.mubr.msk.f32.mxu0 %vm98_vm1, %v55_v58 }
  0x4a   :  { %1262 = vmatmul.mubr.msk.f32.gmra.mxu0 %vm98_vm1, %v56_v59  ;;  %v1708_v59 = vld [vmem:[%s1854_s3] ss:$0 sm:$0xff] }
  0x4b   :  { %1264 = vmatprep.mubr.msk.f32.mxu0 %vm98_vm1, %v57_v60 }
  0x4e   :  { %1265 = vmatmul.mubr.msk.f32.gmra.mxu0 %vm98_vm1, %v58_v61 }
  0x4f   :  { %1267 = vmatprep.mubr.msk.f32.mxu0 %vm98_vm1, %v59_v62 }
  0x52   :  { %1268 = vmatmul.mubr.msk.f32.gmra.mxu0 %vm98_vm1, %v60_v63 }
  0x53   :  { %1270 = vmatprep.mubr.msk.f32.mxu0 %vm98_vm1, %v61_v0 }
  0x56   :  { %1271 = vmatmul.mubr.msk.f32.gmra.mxu0 %vm98_vm1, %v62_v1 }
  0x57   :  { %1273 = vmatprep.mubr.msk.f32.mxu0 %vm98_vm1, %v63_v2 }
  0x5a   :  { %1274 = vmatmul.mubr.msk.f32.gmra.mxu0 %vm98_vm1, %v64_v3 }
  0xca   :  { %v1643_v15 = vpop.f32.mrf.mxu0 }
  0xcc   :  { %v1645_v16 = vpop.f32.mrf.mxu0  ;;  %v1651_v19 = vpop.f32.mrf.mxu1 }
  0xce   :  { %v1647_v17 = vpop.f32.mrf.mxu0  ;;  %v1657_v22 = vpop.f32.mrf.mxu1 }
  0xd0   :  { %v1649_v18 = vpop.f32.mrf.mxu0  ;;  %v1663_v25 = vpop.f32.mrf.mxu1 }
  0xd2   :  { %v1653_v20 = vpop.f32.mrf.mxu0  ;;  %v1669_v28 = vpop.f32.mrf.mxu1 }
  0xd4   :  { %v1655_v21 = vpop.f32.mrf.mxu0  ;;  %v1671_v31 = vpop.f32.mrf.mxu1 }
  0xd6   :  { %v1659_v23 = vpop.f32.mrf.mxu0  ;;  %v1673_v34 = vpop.f32.mrf.mxu1 }
  0xd8   :  { %v1661_v24 = vpop.f32.mrf.mxu0  ;;  %v1675_v37 = vpop.f32.mrf.mxu1 }
  0xda   :  { %v1665_v26 = vpop.f32.mrf.mxu0  ;;  %v1681_v40 = vpop.f32.mrf.mxu1 }
  0xdc   :  { %v1667_v27 = vpop.f32.mrf.mxu0  ;;  %v1687_v43 = vpop.f32.mrf.mxu1 }
  0xde   :  { %v1230_v29 = vpop.f32.mrf.mxu0  ;;  %v1693_v46 = vpop.f32.mrf.mxu1 }
  0xe0   :  { %v411_v30 = vpop.f32.mrf.mxu0  ;;  %v1697_v49 = vpop.f32.mrf.mxu1 }
  0xe2   :  { %v1233_v32 = vpop.f32.mrf.mxu0  ;;  %v1699_v52 = vpop.f32.mrf.mxu1 }
  0xe3   :  { %v427_v5 = vadd.f32 %v1233_v32, %v1708_v59 }
  0xe4   :  { %v421_v33 = vpop.f32.mrf.mxu0  ;;  %v1701_v55 = vpop.f32.mrf.mxu1 }
  0xe5   :  { %v422_v9 = vadd.f32 %v1708_v59, %v421_v33  ;;  %v693_v32 = vmax.f32 %v427_v5, 0.0  ;;  %v412_v33 = vadd.f32 %v1708_v59, %v411_v30  ;;  %v402_v30 = vadd.f32 %v1708_v59, %v1667_v27 }
  0xe6   :  { %v1236_v35 = vpop.f32.mrf.mxu0  ;;  %v1703_v58 = vpop.f32.mrf.mxu1  ;;  %v392_v27 = vadd.f32 %v1708_v59, %v1661_v24  ;;  %v382_v24 = vadd.f32 %v1708_v59, %v1655_v21  ;;  %v372_v21 = vadd.f32 %v1708_v59, %v1649_v18 }
  0xe7   :  { %v437_v60 = vadd.f32 %v1236_v35, %v1708_v59 }
  0xe8   :  { %v431_v36 = vpop.f32.mrf.mxu0  ;;  %v1713_v1 = vpop.f32.mrf.mxu1 }
  0xe9   :  { %v432_v63 = vadd.f32 %v1708_v59, %v431_v36  ;;  %v695_v6 = vmax.f32 %v437_v60, 0.0 }
  0xea   :  { %v1677_v38 = vpop.f32.mrf.mxu0  ;;  %v1720_v12 = vpop.f32.mrf.mxu1 }
  0xeb   :  { %v694_v10 = vmax.f32 %v432_v63, 0.0 }
  0xec   :  { %v1679_v39 = vpop.f32.mrf.mxu0 }
  0xee   :  { %v1683_v41 = vpop.f32.mrf.mxu0 }
  0xf0   :  { %v1685_v42 = vpop.f32.mrf.mxu0 }
  0xf2   :  { %v1689_v44 = vpop.f32.mrf.mxu0 }
  0xf4   :  { %v1691_v45 = vpop.f32.mrf.mxu0 }
  0xf6   :  { %v1248_v47 = vpop.f32.mrf.mxu0 }
  0xf8   :  { %v1695_v48 = vpop.f32.mrf.mxu0 }
  0xfa   :  { %v1251_v50 = vpop.f32.mrf.mxu0 }
  0xfc   :  { %v481_v51 = vpop.f32.mrf.mxu0 }
  0xfe   :  { %v1254_v53 = vpop.f32.mrf.mxu0 }
  0xff   :  { %v497_v13 = vadd.f32 %v1254_v53, %v1708_v59  ;;  %v487_v53 = vadd.f32 %v1251_v50, %v1708_v59  ;;  %v477_v50 = vadd.f32 %v1248_v47, %v1708_v59 }
 0x100   :  { %v491_v54 = vpop.f32.mrf.mxu0 }
 0x101   :  { %v707_v63 = vmax.f32 %v497_v13, 0.0  ;;  %v467_v13 = vadd.f32 %v1689_v44, %v1708_v59 }
 0x102   :  { %v1257_v56 = vpop.f32.mrf.mxu0 }
 0x103   :  { %v507_v2 = vadd.f32 %v1257_v56, %v1708_v59  ;;  %v417_v56 = vadd.f32 %v1230_v29, %v1708_v59  ;;  %v407_v29 = vadd.f32 %v1665_v26, %v1708_v59  ;;  %v397_v26 = vadd.f32 %v1659_v23, %v1708_v59 }
 0x104   :  { %v501_v57 = vpop.f32.mrf.mxu0  ;;  %v387_v23 = vadd.f32 %v1653_v20, %v1708_v59  ;;  %v377_v20 = vadd.f32 %v1647_v17, %v1708_v59  ;;  %v367_v17 = vadd.f32 %v1643_v15, %v1708_v59  ;;  %v597_v15 = vadd.f32 %v1671_v31, %v1708_v59 }
 0x105   :  { %v502_v7 = vadd.f32 %v1708_v59, %v501_v57  ;;  %v709_v35 = vmax.f32 %v507_v2, 0.0  ;;  %v492_v57 = vadd.f32 %v1708_v59, %v491_v54  ;;  %v691_v2 = vmax.f32 %v417_v56, 0.0 }
 0x106   :  { %v1260_v61 = vpop.f32.mrf.mxu0  ;;  %v482_v54 = vadd.f32 %v1708_v59, %v481_v51  ;;  %v472_v51 = vadd.f32 %v1708_v59, %v1695_v48  ;;  %v462_v48 = vadd.f32 %v1708_v59, %v1691_v45  ;;  %v452_v45 = vadd.f32 %v1708_v59, %v1685_v42 }
 0x107   :  { %v517_v62 = vadd.f32 %v1260_v61, %v1708_v59  ;;  %v708_v60 = vmax.f32 %v502_v7, 0.0  ;;  %v692_v61 = vmax.f32 %v422_v9, 0.0  ;;  %v442_v42 = vadd.f32 %v1708_v59, %v1679_v39 }
 0x108   :  { %v511_v0 = vpop.f32.mrf.mxu0  ;;  %v704_v9 = vmax.f32 %v482_v54, 0.0  ;;  %v447_v54 = vadd.f32 %v1677_v38, %v1708_v59  ;;  %v682_v38 = vmax.f32 %v372_v21, 0.0  ;;  %v587_v31 = vadd.f32 %v1663_v25, %v1708_v59 }
 0x109   :  { %v711_v3 = vmax.f32 %v517_v62, 0.0  ;;  %v512_v4 = vadd.f32 %v1708_v59, %v511_v0  ;;  %v1728_v62 = vpop.f32.mrf.mxu1 }
 0x10a   :  { %v1723_v36 = vpop.f32.mrf.mxu0 }
 0x10b   :  { %v710_v8 = vmax.f32 %v512_v4, 0.0  ;;  %1132 = vmatprep.subr.mxu1 %v711_v3  ;;  %v706_v3 = vmax.f32 %v492_v57, 0.0  ;;  %v690_v4 = vmax.f32 %v412_v33, 0.0  ;;  %v1738_v5 = vpop.f32.mrf.mxu1  ;;  %v702_v57 = vmax.f32 %v472_v51, 0.0 }
 0x10c   :  { %1133 = vmatpush3.msra.mxu1 %v695_v6  ;;  %v1731_v0 = vpop.f32.mrf.mxu0  ;;  %v705_v6 = vmax.f32 %v487_v53, 0.0  ;;  %v457_v33 = vadd.f32 %v1683_v41, %v1708_v59 }
 0x10d   :  { %1134 = vmatprep.subr.mxu1 %v710_v8  ;;  %v689_v8 = vmax.f32 %v407_v29, 0.0  ;;  %v1305_v47 = vpop.f32.mrf.mxu1  ;;  %v700_v29 = vmax.f32 %v462_v48, 0.0  ;;  %v727_v48 = vmax.f32 %v597_v15, 0.0 }
 0x10e   :  { %1135 = vmatpush3.msra.mxu1 %v694_v10  ;;  %v1741_v7 = vpop.f32.mrf.mxu0  ;;  %v688_v10 = vmax.f32 %v402_v30, 0.0 }
 0x10f   :  { %1136 = vmatprep.subr.mxu1 %v709_v35  ;;  %v703_v35 = vmax.f32 %v477_v50, 0.0  ;;  %v661_v44 = vpop.f32.mrf.mxu1  ;;  %v698_v50 = vmax.f32 %v452_v45, 0.0  ;;  %v647_v45 = vadd.f32 %v1713_v1, %v1708_v59 }
 0x110   :  { %1137 = vmatpush3.msra.mxu1 %v693_v32  ;;  %v1751_v56 = vpop.f32.mrf.mxu0  ;;  %v687_v32 = vmax.f32 %v397_v26, 0.0 }
 0x111   :  { %1138 = vmatprep.subr.mxu1 %v708_v60  ;;  %v686_v60 = vmax.f32 %v392_v27, 0.0  ;;  %v1308_v41 = vpop.f32.mrf.mxu1  ;;  %v696_v27 = vmax.f32 %v442_v42, 0.0 }
 0x112   :  { %1139 = vmatpush3.msra.mxu1 %v692_v61  ;;  %v701_v61 = vmax.f32 %v467_v13, 0.0  ;;  %v1761_v53 = vpop.f32.mrf.mxu0  ;;  %v677_v18 = vadd.f32 %v1308_v41, %v1708_v59 }
 0x113   :  { %1140 = vmatprep.subr.mxu1 %v707_v63  ;;  %v685_v63 = vmax.f32 %v387_v23, 0.0  ;;  %v671_v26 = vpop.f32.mrf.mxu1  ;;  %v667_v23 = vadd.f32 %v1305_v47, %v1708_v59  ;;  %v657_v47 = vadd.f32 %v1728_v62, %v1708_v59 }
 0x114   :  { %1141 = vmatpush3.msra.mxu1 %v691_v2  ;;  %v684_v2 = vmax.f32 %v382_v24, 0.0  ;;  %v1771_v30 = vpop.f32.mrf.mxu0  ;;  %v743_v39 = vmax.f32 %v677_v18, 0.0  ;;  %v627_v18 = vadd.f32 %v1697_v49, %v1708_v59  ;;  %v617_v49 = vadd.f32 %v1687_v43, %v1708_v59 }
 0x115   :  { %1142 = vmatprep.subr.mxu1 %v706_v3  ;;  %v699_v3 = vmax.f32 %v457_v33, 0.0  ;;  %v741_v33 = vmax.f32 %v667_v23, 0.0  ;;  %v607_v43 = vadd.f32 %v1675_v37, %v1708_v59 }
 0x116   :  { %1143 = vmatpush3.msra.mxu1 %v690_v4  ;;  %v683_v4 = vmax.f32 %v377_v20, 0.0  ;;  %v1272_v51 = vpop.f32.mrf.mxu0 }
 0x117   :  { %1144 = vmatprep.subr.mxu1 %v705_v6  ;;  %v362_v6 = vadd.f32 %v1708_v59, %v1645_v16  ;;  %v592_v16 = vadd.f32 %v1708_v59, %v1673_v34  ;;  %v582_v34 = vadd.f32 %v1708_v59, %v1669_v28  ;;  %v572_v28 = vadd.f32 %v1708_v59, %v1657_v22 }
 0x118   :  { %1145 = vmatpush3.msra.mxu1 %v689_v8  ;;  %v697_v8 = vmax.f32 %v447_v54, 0.0  ;;  %v557_v1 = vadd.f32 %v1272_v51, %v1708_v59  ;;  %v729_v23 = vmax.f32 %v607_v43, 0.0 }
 0x119   :  { %1146 = vmatprep.subr.mxu1 %v704_v9  ;;  %v681_v9 = vmax.f32 %v367_v17, 0.0  ;;  %v680_v13 = vmax.f32 %v362_v6, 0.0  ;;  %v722_v41 = vmax.f32 %v572_v28, 0.0  ;;  %v737_v17 = vmax.f32 %v647_v45, 0.0 }
 0x11a   :  { %1147 = vmatpush3.msra.mxu1 %v688_v10  ;;  %v672_v10 = vadd.f32 %v1708_v59, %v671_v26  ;;  %v622_v26 = vadd.f32 %v1708_v59, %v1699_v52  ;;  %v612_v52 = vadd.f32 %v1708_v59, %v1693_v46  ;;  %v602_v46 = vadd.f32 %v1708_v59, %v1681_v40 }
 0x11b   :  { %1148 = vmatprep.subr.mxu1 %v703_v35  ;;  %v762_v35 = vcombine.high %v1641_v14, %v1641_v14  ;;  %v1329_v40 = vmov 0.0  }
 0x11c   :  { %1149 = vmatpush3.msra.mxu1 %v687_v32  ;;  %v551_v32 = vpop.f32.mrf.mxu0  ;;  %v742_v24 = vmax.f32 %v672_v10, 0.0  ;;  %v731_v10 = vmax.f32 %v617_v49, 0.0 }
 0x11d   :  { %1150 = vmatprep.subr.mxu1 %v702_v57  ;;  %v662_v57 = vadd.f32 %v1708_v59, %v661_v44  ;;  %v725_v44 = vmax.f32 %v587_v31, 0.0 }
 0x11e   :  { %1151 = vmatpush3.msra.mxu1 %v686_v60  ;;  %v726_v60 = vmax.f32 %v592_v16, 0.0  ;;  %v1275_v25 = vpop.f32.mrf.mxu0  ;;  %v730_v16 = vmax.f32 %v612_v52, 0.0 }
 0x11f   :  { %1152 = vmatprep.subr.mxu1 %v701_v61  ;;  %v577_v61 = vadd.f32 %v1651_v19, %v1708_v59  ;;  %v740_v20 = vmax.f32 %v662_v57, 0.0  ;;  %v567_v62 = vadd.f32 %v1275_v25, %v1708_v59 }
 0x120   :  { %1153 = vmatpush3.msra.mxu1 %v685_v63  ;;  %v724_v63 = vmax.f32 %v582_v34, 0.0  ;;  %v561_v19 = vpop.f32.mrf.mxu0 }
 0x121   :  { %1154 = vmatprep.subr.mxu1 %v700_v29  ;;  %v739_v29 = vmax.f32 %v657_v47, 0.0  ;;  %v723_v21 = vmax.f32 %v577_v61, 0.0  ;;  %v721_v54 = vmax.f32 %v567_v62, 0.0  ;;  %v562_v22 = vadd.f32 %v1708_v59, %v561_v19  ;;  %v1062_v47 = vld [vmem:[%s1856_s5] ss:$0 sm:$0xff] }
 0x122   :  { %1155 = vmatpush3.msra.mxu1 %v684_v2 }
 0x123   :  { %1156 = vmatprep.subr.mxu1 %v699_v3  ;;  %v637_v3 = vadd.f32 %v1701_v55, %v1708_v59  ;;  %v547_v55 = vadd.f32 %v1761_v53, %v1708_v59  ;;  %v537_v53 = vadd.f32 %v1741_v7, %v1708_v59  ;;  %v527_v7 = vadd.f32 %v1723_v36, %v1708_v59  ;;  %v907_v36 = vld [vmem:[%s1855_s4] sm:$0xff] }
 0x124   :  { %1157 = vmatpush3.msra.mxu1 %v683_v4  ;;  %v632_v4 = vadd.f32 %v1708_v59, %v1703_v58 }
 0x125   :  { %1158 = vmatprep.subr.mxu1 %v698_v50  ;;  %v720_v50 = vmax.f32 %v562_v22, 0.0  ;;  %v735_v6 = vmax.f32 %v637_v3, 0.0  ;;  %v717_v15 = vmax.f32 %v547_v55, 0.0  ;;  %v713_v37 = vmax.f32 %v527_v7, 0.0 }
 0x126   :  { %1159 = vmatpush3.msra.mxu1 %v682_v38  ;;  %v719_v38 = vmax.f32 %v557_v1, 0.0  ;;  %v734_v58 = vmax.f32 %v632_v4, 0.0 }
 0x127   :  { %1160 = vmatprep.subr.mxu1 %v697_v8  ;;  %v542_v8 = vadd.f32 %v1708_v59, %v1771_v30  ;;  %v532_v30 = vadd.f32 %v1708_v59, %v1751_v56  ;;  %v522_v56 = vadd.f32 %v1708_v59, %v1731_v0 }
 0x128   :  { %1161 = vmatpush3.msra.mxu1 %v681_v9  ;;  %v733_v9 = vmax.f32 %v627_v18, 0.0 }
 0x129   :  { %1162 = vmatprep.subr.mxu1 %v696_v27  ;;  %v732_v27 = vmax.f32 %v622_v26, 0.0  ;;  %v712_v31 = vmax.f32 %v522_v56, 0.0 }
 0x12a   :  { %1163 = vmatpush3.msra.mxu1 %v680_v13  ;;  %v715_v13 = vmax.f32 %v537_v53, 0.0 }
 0x12b   :  { %1167 = vmatprep.subr.mxu1 %v743_v39  ;;  %832 = vmatmul.mubr.f32.vlgmr.msra.gmra.mxu1 %v1637_v11  ;;  %v652_v11 = vadd.f32 %v1708_v59, %v1738_v5  ;;  %v642_v5 = vadd.f32 %v1708_v59, %v1720_v12  ;;  %v552_v12 = vadd.f32 %v1708_v59, %v551_v32  ;;  %v716_v39 = vmax.f32 %v542_v8, 0.0  ;;  %v908_v59 = vld [vmem:[%s1855_s4 + $0x8] sm:$0xff] }
 0x12c   :  { %1168 = vmatpush3.msra.mxu1 %v727_v48  ;;  %901 = vmatprep.mubr.f32.mxu1 %v762_v35  ;;  %v714_v35 = vmax.f32 %v532_v30, 0.0  ;;  %v728_v32 = vmax.f32 %v602_v46, 0.0 }
 0x12d   :  { %1169 = vmatprep.subr.mxu1 %v742_v24  ;;  %v738_v2 = vmax.f32 %v652_v11, 0.0  ;;  %v736_v42 = vmax.f32 %v642_v5, 0.0  ;;  %v718_v51 = vmax.f32 %v552_v12, 0.0 }
 0x12e   :  { %1170 = vmatpush3.msra.mxu1 %v726_v60 }
 0x12f   :  { %1171 = vmatprep.subr.mxu1 %v741_v33 }
 0x130   :  { %1172 = vmatpush3.msra.mxu1 %v725_v44 }
 0x131   :  { %1173 = vmatprep.subr.mxu1 %v740_v20 }
 0x132   :  { %1174 = vmatpush3.msra.mxu1 %v724_v63 }
 0x133   :  { %1175 = vmatprep.subr.mxu1 %v739_v29 }
 0x134   :  { %1176 = vmatpush3.msra.mxu1 %v723_v21 }
 0x135   :  { %1177 = vmatprep.subr.mxu1 %v738_v2 }
 0x136   :  { %1178 = vmatpush3.msra.mxu1 %v722_v41 }
 0x137   :  { %1179 = vmatprep.subr.mxu1 %v737_v17 }
 0x138   :  { %1180 = vmatpush3.msra.mxu1 %v721_v54 }
 0x139   :  { %1181 = vmatprep.subr.mxu1 %v736_v42 }
 0x13a   :  { %1182 = vmatpush3.msra.mxu1 %v720_v50 }
 0x13b   :  { %1183 = vmatprep.subr.mxu1 %v735_v6 }
 0x13c   :  { %1184 = vmatpush3.msra.mxu1 %v719_v38 }
 0x13d   :  { %1185 = vmatprep.subr.mxu1 %v734_v58 }
 0x13e   :  { %1186 = vmatpush3.msra.mxu1 %v718_v51 }
 0x13f   :  { %1187 = vmatprep.subr.mxu1 %v733_v9 }
 0x140   :  { %1188 = vmatpush3.msra.mxu1 %v717_v15 }
 0x141   :  { %1189 = vmatprep.subr.mxu1 %v732_v27 }
 0x142   :  { %1190 = vmatpush3.msra.mxu1 %v716_v39 }
 0x143   :  { %1191 = vmatprep.subr.mxu1 %v731_v10 }
 0x144   :  { %1192 = vmatpush3.msra.mxu1 %v715_v13 }
 0x145   :  { %1193 = vmatprep.subr.mxu1 %v730_v16 }
 0x146   :  { %1194 = vmatpush3.msra.mxu1 %v714_v35 }
 0x147   :  { %1195 = vmatprep.subr.mxu1 %v729_v23 }
 0x148   :  { %1196 = vmatpush3.msra.mxu1 %v713_v37 }
 0x149   :  { %1197 = vmatprep.subr.mxu1 %v728_v32 }
 0x14a   :  { %1198 = vmatpush3.msra.mxu1 %v712_v31 }
 0x14b   :  { %902 = vmatmul.mubr.f32.vlgmr.msra.gmra.mxu1 %v1641_v14  ;;  %1309 = vmatprep.subr.mxu1 %v1329_v40 }
 0x14c   :  { %1310 = vmatpush3.msra.mxu1 %v908_v59  ;;  %1313 = vmatprep.mubr.msk.f32.mxu1 %vm1330_vm2, %v1329_v40 }
 0x14d   :  { %1311 = vmatprep.subr.mxu1 %v1329_v40 }
 0x14e   :  { %1312 = vmatpush3.msra.mxu1 %v907_v36 }
 0x1eb   :  { %v1164_v0 = vpop.f32.mrf.mxu1 }
 0x1ed   :  { %v1165_v48 = vpop.f32.mrf.mxu1 }
 0x1ee   :  { %v1166_v14 = vadd.f32 %v1165_v48, %v1164_v0 }
 0x20b   :  { %v1199_v57 = vpop.f32.mrf.mxu1 }
 0x20d   :  { %v1200_v24 = vpop.f32.mrf.mxu1 }
 0x20e   :  { %v1201_v34 = vadd.f32 %v1200_v24, %v1199_v57 }
 0x210   :  { %v904_v60 = vadd.f32 %v1201_v34, %v1166_v14 }
 0x212   :  { %1314 = vmatmul.mubr.msk.f32.vlgmr.msra.gmra.mxu1 %vm916_vm3, %v904_v60 }
 0x2d2   :  { %v986_v33 = vpop.f32.mrf.mxu1 }
 0x2d3   :  { %v987_v25 = vadd.f32 %v1062_v47, %v986_v33 }
 0x2d4   :  { %v1315_v61 = vpop.f32.mrf.mxu1 }
 0x2d5   :  { %v990_v44 = vmax.f32 %v987_v25, 0.0 }
 0x2d7   :  { %991 = vst [vmem:[%s1857_s6] sm:$0x3] %v990_v44 }

// kernel: cloth_model_forward.3
= control target key start
LH: loop header
LB: loop body
LE: loop exit
PB: predicated region body
PF: predicated region fallthrough
CT: control target
= control target key end

     0   :  { %s4541_s27 = smov 0   ;;  %s6002_s0 = inlined_call_operand.vmem [shape: f32[2,1,128], index: 0, kind: input, shape index: {}]   ;;  %s6003_s1 = inlined_call_operand.vmem [shape: f32[16,3], index: 1, kind: input, shape index: {}]   ;;  %s6004_s2 = inlined_call_operand.vmem [shape: f32[48,16], index: 2, kind: input, shape index: {}]   ;;  %s6005_s3 = inlined_call_operand.vmem [shape: f32[48,16], index: 3, kind: input, shape index: {}]   ;;  %s6006_s4 = inlined_call_operand.vmem [shape: f32[16,48], index: 4, kind: input, shape index: {}]   ;;  %s6007_s5 = inlined_call_operand.vmem [shape: f32[3,128], index: 5, kind: input, shape index: {}]   ;;  %s6008_s6 = inlined_call_operand.vmem [shape: f32[1,128], index: 6, kind: input, shape index: {}]   ;;  %s6009_s7 = inlined_call_operand.vmem [shape: f32[128,128], index: 7, kind: input, shape index: {}]   ;;  %s6010_s8 = inlined_call_operand.vmem [shape: f32[1,128], index: 8, kind: input, shape index: {}]   ;;  %s6011_s9 = inlined_call_operand.vmem [shape: f32[3,128], index: 9, kind: input, shape index: {}]   ;;  %s6012_s10 = inlined_call_operand.vmem [shape: f32[1,128], index: 10, kind: input, shape index: {}]   ;;  %s6013_s11 = inlined_call_operand.vmem [shape: f32[1,128], index: 11, kind: input, shape index: {}]   ;;  %s6014_s12 = inlined_call_operand.vmem [shape: f32[128,128], index: 12, kind: input, shape index: {}]   ;;  %s6015_s13 = inlined_call_operand.vmem [shape: f32[1,128], index: 13, kind: input, shape index: {}]   ;;  %s6016_s14 = inlined_call_operand.vmem [shape: f32[128,128], index: 14, kind: input, shape index: {}]   ;;  %s6017_s15 = inlined_call_operand.vmem [shape: f32[1,128], index: 15, kind: input, shape index: {}]   ;;  %s6018_s16 = inlined_call_operand.vmem [shape: f32[384,128], index: 16, kind: input, shape index: {}]   ;;  %s6019_s17 = inlined_call_operand.vmem [shape: f32[1,128], index: 17, kind: input, shape index: {}]   ;;  %s6020_s18 = inlined_call_operand.vmem [shape: f32[128,1], index: 18, kind: input, shape index: {}]   ;;  %s6021_s19 = inlined_call_operand.vmem [shape: f32[128,1], index: 19, kind: input, shape index: {}]   ;;  %s6022_s20 = inlined_call_operand.vmem [shape: f32[256,128], index: 20, kind: input, shape index: {}]   ;;  %s6023_s21 = inlined_call_operand.vmem [shape: f32[1,128], index: 21, kind: input, shape index: {}]   ;;  %s6024_s22 = inlined_call_operand.vmem [shape: f32[128,128], index: 22, kind: input, shape index: {}]   ;;  %s6025_s23 = inlined_call_operand.vmem [shape: f32[1,128], index: 23, kind: input, shape index: {}]   ;;  %s6026_s24 = inlined_call_operand.vmem [shape: f32[128,128], index: 24, kind: input, shape index: {}]   ;;  %s6027_s25 = inlined_call_operand.vmem [shape: f32[1,128], index: 25, kind: input, shape index: {}]   ;;  %s6028_s26 = inlined_call_operand.vmem [shape: f32[2,16,128], index: 26, kind: output, shape index: {}]  }
   0x1   :  { %6140 = sst [smem:[#allocation113_spill]] %s6002_s0 }
   0x2   :  { %6141 = sst [smem:[#allocation114_spill]] %s6003_s1 }
   0x3   :  { %6142 = sst [smem:[#allocation115_spill]] %s6004_s2 }
   0x4   :  { %6143 = sst [smem:[#allocation116_spill]] %s6005_s3 }
   0x5   :  { %6144 = sst [smem:[#allocation117_spill]] %s6006_s4 }
   0x6   :  { %6145 = sst [smem:[#allocation118_spill]] %s6007_s5 }
   0x7   :  { %6146 = sst [smem:[#allocation119_spill]] %s6008_s6 }
   0x8   :  { %6147 = sst [smem:[#allocation120_spill]] %s6009_s7 }
   0x9   :  { %6148 = sst [smem:[#allocation121_spill]] %s6010_s8 }
   0xa   :  { %6149 = sst [smem:[#allocation122_spill]] %s6011_s9 }
   0xb   :  { %6150 = sst [smem:[#allocation123_spill]] %s6012_s10 }
   0xc LB: > { %p3357_p0 = scmp.ge.s32.totalorder %s4365_s27, 1  ;;  %p710_p1 = scmp.lt.s32.totalorder %s4365_s27, 3  ;;  %s4365_s27 = sphi %s4541_s27, %s36_s27  }
   0xe   : > { %p711_p2 = pnand %p3357_p0, %p710_p1 }
  0x10   : > { %714 = sbr.rel (%p711_p2) target bundleno = 2887 (0xb47), region = 124 }
  0x15   : > { %s6151_s8 = sld [smem:[#allocation114_spill]]  ;;  %vm802_vm0 = vcmask 130048   ;;  %vm1041_vm1 = vcmask 23552   ;;  %vm1116_vm2 = vcmask 1042432   ;;  %vm1316_vm3 = vcmask 1040384   ;;  %s6168_s10 = sadd.s32 4294967295, %s4365_s27  }
  0x16   : > { %s6152_s0 = sld [smem:[#allocation117_spill]]  ;;  %p778_p3 = scmp.lt.s32.totalorder %s6168_s10, 1  ;;  %vm4404_vm4 = vmmov 0   ;;  %vm1297_vm6 = vcmask 7168  }
  0x17   : > { %s6155_s1 = sld [smem:[#allocation115_spill]]  ;;  %s6169_s28 = smov %s6168_s10 }
  0x18   : > { %s6157_s4 = sld [smem:[#allocation116_spill]]  ;;  %s6396_s28 = smov (!%p778_p3, %s6169_s28), 1 }
  0x19   : > { %s6164_s5 = sld [smem:[#allocation118_spill]]  ;;  %s3433_s3 = sshll.u32 %s6396_s28, 4 }
  0x1a   : > { %s6165_s7 = sld [smem:[#allocation123_spill]]  ;;  %s4718_s2 = scalar_lea.vmem %s6028_s26, %s3433_s3 }
  0x1b   : > { %v787_v0 = vld [vmem:[%s6151_s8 + $0x8] sm:$0xff]  ;;  %v786_v3 = vld [vmem:[%s6151_s8] sm:$0xff]  ;;  %s6166_s9 = sld [smem:[#allocation122_spill]]  ;;  %s5483_s6 = smov 0  }
  0x1c   : > { %v4555_v1 = vld [vmem:[%s6152_s0] sm:$0xff]  ;;  %v4560_v2 = vld [vmem:[%s6152_s0 + $0x8] sm:$0xff]  ;;  %3762 = vmatprep.subr.mxu0 %v787_v0  ;;  %3775 = vmatprep.subr.mxu1 %v787_v0  ;;  %s6170_s29 = sld [smem:[#allocation119_spill]] }
  0x1d   : > { %6153 = vst [vmem:[#allocation2_spill] sm:$0xff] %v4555_v1  ;;  %6154 = vst [vmem:[#allocation3_spill] sm:$0xff] %v4560_v2  ;;  %v4568_v4 = vld [vmem:[%s6155_s1] sm:$0xff]  ;;  %3763 = vmatpush3.msra.mxu0 %v787_v0  ;;  %3776 = vmatpush3.msra.mxu1 %v787_v0  ;;  %v4578_v6 = vld [vmem:[%s6155_s1 + $0x8] sm:$0xff] }
  0x1e   : > { %6156 = vst [vmem:[#allocation4_spill] sm:$0xff] %v4568_v4  ;;  %v4573_v5 = vld [vmem:[%s6157_s4] sm:$0xff]  ;;  %3764 = vmatprep.subr.mxu0 %v786_v3  ;;  %3777 = vmatprep.subr.mxu1 %v786_v3  ;;  %6159 = vst [vmem:[#allocation6_spill] sm:$0xff] %v4578_v6  ;;  %v4583_v7 = vld [vmem:[%s6157_s4 + $0x8] sm:$0xff] }
  0x1f   : > { %6158 = vst [vmem:[#allocation5_spill] sm:$0xff] %v4573_v5  ;;  %3765 = vmatpush3.msra.mxu0 %v786_v3  ;;  %3766 = vmatprep.mubr.msk.f32.mxu0 %vm802_vm0, %v4568_v4  ;;  %v4590_v8 = vld [vmem:[%s6155_s1 + $0x10] sm:$0xff]  ;;  %v4610_v10 = vld [vmem:[%s6155_s1 + $0x18] sm:$0xff]  ;;  %v4620_v12 = vld [vmem:[%s6155_s1 + $0x20] sm:$0xff] }
  0x20   : > { %6160 = vst [vmem:[#allocation7_spill] sm:$0xff] %v4590_v8  ;;  %v4595_v9 = vld [vmem:[%s6157_s4 + $0x10] sm:$0xff]  ;;  %3778 = vmatpush3.msra.mxu1 %v786_v3  ;;  %3779 = vmatprep.mubr.msk.f32.mxu1 %vm802_vm0, %v4573_v5  ;;  %6161 = vst [vmem:[#allocation8_spill] sm:$0xff] %v4610_v10  ;;  %v4615_v11 = vld [vmem:[%s6157_s4 + $0x18] sm:$0xff] }
  0x21   : > { %3767 = vmatmul.mubr.msk.f32.vlgmr.msra.gmra.mxu0 %vm802_vm0, %v4578_v6  ;;  %3780 = vmatmul.mubr.msk.f32.vlgmr.msra.gmra.mxu1 %vm802_vm0, %v4583_v7  ;;  %6162 = vst [vmem:[#allocation9_spill] sm:$0xff] %v4620_v12  ;;  %v4625_v13 = vld [vmem:[%s6157_s4 + $0x20] sm:$0xff]  ;;  %v4638_v14 = vld [vmem:[%s6155_s1 + $0x28] sm:$0xff] }
  0x22   : > { %3769 = vmatprep.mubr.msk.f32.mxu0 %vm802_vm0, %v4590_v8  ;;  %3782 = vmatprep.mubr.msk.f32.mxu1 %vm802_vm0, %v4595_v9  ;;  %6163 = vst [vmem:[#allocation10_spill] sm:$0xff] %v4638_v14  ;;  %v4643_v15 = vld [vmem:[%s6157_s4 + $0x28] sm:$0xff]  ;;  %v1102_v16 = vld [vmem:[%s6164_s5] sm:$0x7]  ;;  %s6167_s5 = sld [smem:[#allocation120_spill]] }
  0x23   : > { %3788 = vmatprep.subr.msk.mxu0 %vm1116_vm2, %v1102_v16  ;;  %v1296_v47 = vld [vmem:[%s6165_s7] sm:$0x1] }
  0x24   : > { %3789 = vmatpush3.msk.msra.mxu0 %vm1116_vm2, %v1102_v16  ;;  %v4692_v48 = vld [vmem:[%s6166_s9] sm:$0x7]  ;;  %s6171_s9 = sld [smem:[#allocation113_spill]] }
  0x25   : > { %3770 = vmatmul.mubr.msk.f32.gmra.mxu0 %vm802_vm0, %v4610_v10  ;;  %3783 = vmatmul.mubr.msk.f32.gmra.mxu1 %vm802_vm0, %v4615_v11  ;;  %v3372_v63 = vld [vmem:[%s6170_s29] ss:$0 sm:$0xff] }
  0x26   : > { %3772 = vmatprep.mubr.msk.f32.mxu0 %vm802_vm0, %v4620_v12  ;;  %3785 = vmatprep.mubr.msk.f32.mxu1 %vm802_vm0, %v4625_v13  ;;  %v5135_v2 = vld [vmem:[%s6019_s17] ss:$0 sm:$0xff] }
  0x27   : > { %3828 = vmatprep.subr.msk.mxu0 %vm1316_vm3, %v1296_v47  ;;  %6209 = vst [vmem:[#allocation47_spill] sm:$0xff] %v5135_v2  ;;  %v5140_v1 = vld [vmem:[%s6022_s20] sm:$0xff] }
  0x28   : > { %v1212_v49 = vld [vmem:[%s6167_s5 + $0x78] sm:$0xff]  ;;  %v1211_v50 = vld [vmem:[%s6167_s5 + $0x70] sm:$0xff]  ;;  %v1210_v51 = vld [vmem:[%s6167_s5 + $0x68] sm:$0xff]  ;;  %6210 = vst [vmem:[#allocation48_spill] sm:$0xff] %v5140_v1 }
  0x29   : > { %3773 = vmatmul.mubr.msk.f32.gmra.mxu0 %vm802_vm0, %v4638_v14  ;;  %3786 = vmatmul.mubr.msk.f32.gmra.mxu1 %vm802_vm0, %v4643_v15  ;;  %v1209_v52 = vld [vmem:[%s6167_s5 + $0x60] sm:$0xff]  ;;  %v1208_v53 = vld [vmem:[%s6167_s5 + $0x58] sm:$0xff]  ;;  %v1207_v54 = vld [vmem:[%s6167_s5 + $0x50] sm:$0xff] }
  0x2a   : > { %3790 = vmatprep.mubr.msk.f32.mxu0 %vm1041_vm1, %v786_v3  ;;  %3793 = vmatprep.subr.mxu1 %v1212_v49  ;;  %v1206_v55 = vld [vmem:[%s6167_s5 + $0x48] sm:$0xff]  ;;  %v1205_v56 = vld [vmem:[%s6167_s5 + $0x40] sm:$0xff]  ;;  %v1204_v57 = vld [vmem:[%s6167_s5 + $0x38] sm:$0xff]  ;;  %s780_s4 = scalar_lea.vmem %s6171_s9, %s6396_s28  ;;  %s6172_s28 = sld [smem:[#allocation121_spill]] }
  0x2b   : > { %3794 = vmatpush3.msra.mxu1 %v1212_v49  ;;  %v1203_v58 = vld [vmem:[%s6167_s5 + $0x30] sm:$0xff]  ;;  %v1202_v59 = vld [vmem:[%s6167_s5 + $0x28] sm:$0xff]  ;;  %v1201_v60 = vld [vmem:[%s6167_s5 + $0x20] sm:$0xff] }
  0x2c   : > { %3795 = vmatprep.subr.mxu1 %v1211_v50  ;;  %v1200_v61 = vld [vmem:[%s6167_s5 + $0x18] sm:$0xff]  ;;  %v1199_v62 = vld [vmem:[%s6167_s5 + $0x10] sm:$0xff]  ;;  %v5160_v2 = vld [vmem:[%s6022_s20 + $0x20] sm:$0xff] }
  0x2d   : > { %3791 = vmatmul.mubr.msk.f32.vlgmr.msra.gmra.mxu0 %vm1041_vm1, %v787_v0  ;;  %3796 = vmatpush3.msra.mxu1 %v1211_v50  ;;  %v1198_v0 = vld [vmem:[%s6167_s5 + $0x8] sm:$0xff]  ;;  %6214 = vst [vmem:[#allocation52_spill] sm:$0xff] %v5160_v2 }
  0x2e   : > { %3829 = vmatpush3.msk.msra.mxu0 %vm1316_vm3, %v1296_v47  ;;  %3797 = vmatprep.subr.mxu1 %v1210_v51  ;;  %v5165_v1 = vld [vmem:[%s6022_s20 + $0x28] sm:$0xff] }
  0x2f   : > { %3839 = vmatprep.subr.msk.mxu0 %vm1116_vm2, %v4692_v48  ;;  %3798 = vmatpush3.msra.mxu1 %v1210_v51  ;;  %6215 = vst [vmem:[#allocation53_spill] sm:$0xff] %v5165_v1  ;;  %v5185_v2 = vld [vmem:[%s6022_s20 + $0x48] sm:$0xff]  ;;  %v5190_v1 = vld [vmem:[%s6022_s20 + $0x50] sm:$0xff] }
  0x30   : > { %3799 = vmatprep.subr.mxu1 %v1209_v52  ;;  %6219 = vst [vmem:[#allocation57_spill] sm:$0xff] %v5185_v2  ;;  %6220 = vst [vmem:[#allocation58_spill] sm:$0xff] %v5190_v1  ;;  %v5210_v2 = vld [vmem:[%s6022_s20 + $0x70] sm:$0xff]  ;;  %v5215_v1 = vld [vmem:[%s6022_s20 + $0x78] sm:$0xff] }
  0x31   : > { %3800 = vmatpush3.msra.mxu1 %v1209_v52  ;;  %6224 = vst [vmem:[#allocation62_spill] sm:$0xff] %v5210_v2  ;;  %6225 = vst [vmem:[#allocation63_spill] sm:$0xff] %v5215_v1  ;;  %v5235_v2 = vld [vmem:[%s6022_s20 + $0x98] sm:$0xff]  ;;  %v5240_v1 = vld [vmem:[%s6022_s20 + $0xa0] sm:$0xff] }
  0x32   : > { %3801 = vmatprep.subr.mxu1 %v1208_v53  ;;  %6229 = vst [vmem:[#allocation67_spill] sm:$0xff] %v5235_v2  ;;  %6230 = vst [vmem:[#allocation68_spill] sm:$0xff] %v5240_v1  ;;  %v5260_v2 = vld [vmem:[%s6022_s20 + $0xc0] sm:$0xff]  ;;  %v5265_v1 = vld [vmem:[%s6022_s20 + $0xc8] sm:$0xff] }
  0x33   : > { %3802 = vmatpush3.msra.mxu1 %v1208_v53  ;;  %6234 = vst [vmem:[#allocation72_spill] sm:$0xff] %v5260_v2  ;;  %6235 = vst [vmem:[#allocation73_spill] sm:$0xff] %v5265_v1  ;;  %v5285_v2 = vld [vmem:[%s6022_s20 + $0xe8] sm:$0xff]  ;;  %v5290_v1 = vld [vmem:[%s6022_s20 + $0xf0] sm:$0xff] }
  0x34   : > { %3803 = vmatprep.subr.mxu1 %v1207_v54  ;;  %6239 = vst [vmem:[#allocation77_spill] sm:$0xff] %v5285_v2  ;;  %6240 = vst [vmem:[#allocation78_spill] sm:$0xff] %v5290_v1  ;;  %v5310_v2 = vld [vmem:[%s6020_s18 + $0x8] sm:$0xff]  ;;  %v5315_v1 = vld [vmem:[%s6020_s18 + $0x10] sm:$0xff] }
  0x35   : > { %3804 = vmatpush3.msra.mxu1 %v1207_v54  ;;  %6244 = vst [vmem:[#allocation82_spill] sm:$0xff] %v5310_v2  ;;  %6245 = vst [vmem:[#allocation83_spill] sm:$0xff] %v5315_v1  ;;  %v5335_v2 = vld [vmem:[%s6020_s18 + $0x30] sm:$0xff]  ;;  %v5340_v1 = vld [vmem:[%s6020_s18 + $0x38] sm:$0xff] }
  0x36   : > { %3805 = vmatprep.subr.mxu1 %v1206_v55  ;;  %6249 = vst [vmem:[#allocation87_spill] sm:$0xff] %v5335_v2  ;;  %6250 = vst [vmem:[#allocation88_spill] sm:$0xff] %v5340_v1  ;;  %v5360_v2 = vld [vmem:[%s6020_s18 + $0x58] sm:$0xff]  ;;  %v5365_v1 = vld [vmem:[%s6020_s18 + $0x60] sm:$0xff] }
  0x37   : > { %3806 = vmatpush3.msra.mxu1 %v1206_v55  ;;  %6254 = vst [vmem:[#allocation92_spill] sm:$0xff] %v5360_v2  ;;  %6255 = vst [vmem:[#allocation93_spill] sm:$0xff] %v5365_v1  ;;  %v5385_v2 = vld [vmem:[%s6021_s19] sm:$0xff]  ;;  %v5390_v1 = vld [vmem:[%s6021_s19 + $0x8] sm:$0xff] }
  0x38   : > { %3807 = vmatprep.subr.mxu1 %v1205_v56  ;;  %6259 = vst [vmem:[#allocation97_spill] sm:$0xff] %v5385_v2  ;;  %6260 = vst [vmem:[#allocation98_spill] sm:$0xff] %v5390_v1  ;;  %v5410_v2 = vld [vmem:[%s6021_s19 + $0x28] sm:$0xff]  ;;  %v5415_v1 = vld [vmem:[%s6021_s19 + $0x30] sm:$0xff] }
  0x39   : > { %3808 = vmatpush3.msra.mxu1 %v1205_v56  ;;  %6264 = vst [vmem:[#allocation102_spill] sm:$0xff] %v5410_v2  ;;  %6265 = vst [vmem:[#allocation103_spill] sm:$0xff] %v5415_v1  ;;  %v5435_v2 = vld [vmem:[%s6021_s19 + $0x50] sm:$0xff]  ;;  %v5440_v1 = vld [vmem:[%s6021_s19 + $0x58] sm:$0xff] }
  0x3a   : > { %3809 = vmatprep.subr.mxu1 %v1204_v57  ;;  %6269 = vst [vmem:[#allocation107_spill] sm:$0xff] %v5435_v2  ;;  %6270 = vst [vmem:[#allocation108_spill] sm:$0xff] %v5440_v1  ;;  %v5460_v2 = vld [vmem:[%s6021_s19 + $0x78] sm:$0xff]  ;;  %v3392_v1 = vld [vmem:[%s6015_s13] ss:$0 sm:$0xff] }
  0x3b   : > { %3810 = vmatpush3.msra.mxu1 %v1204_v57  ;;  %6274 = vst [vmem:[#allocation112_spill] sm:$0xff] %v5460_v2 }
  0x3c   : > { %3811 = vmatprep.subr.mxu1 %v1203_v58 }
  0x3d   : > { %3812 = vmatpush3.msra.mxu1 %v1203_v58 }
  0x3e   : > { %3813 = vmatprep.subr.mxu1 %v1202_v59 }
  0x3f   : > { %3814 = vmatpush3.msra.mxu1 %v1202_v59 }
  0x40   : > { %3815 = vmatprep.subr.mxu1 %v1201_v60 }
  0x41   : > { %3816 = vmatpush3.msra.mxu1 %v1201_v60 }
  0x42   : > { %3817 = vmatprep.subr.mxu1 %v1200_v61 }
  0x43   : > { %3818 = vmatpush3.msra.mxu1 %v1200_v61 }
  0x44   : > { %3819 = vmatprep.subr.mxu1 %v1199_v62 }
  0x45   : > { %3820 = vmatpush3.msra.mxu1 %v1199_v62 }
  0x46   : > { %3821 = vmatprep.subr.mxu1 %v1198_v0 }
  0x47   : > { %3822 = vmatpush3.msra.mxu1 %v1198_v0 }
  0xe1   : > { %v3768_v17 = vpop.f32.mrf.mxu0  ;;  %v3781_v18 = vpop.f32.mrf.mxu1 }
  0xe2   : > { %v4656_v19 = vsub.f32 %v3768_v17, %v3781_v18  ;;  %v1197_v17 = vld [vmem:[%s6167_s5] sm:$0xff] }
  0xe3   : > { %v887_v20 = vpop.f32.mrf.mxu0  ;;  %v1000_v21 = vpop.f32.mrf.mxu1  ;;  %3823 = vmatprep.subr.mxu1 %v1197_v17 }
  0xe4   : > { %v4658_v22 = vsub.f32 %v887_v20, %v1000_v21  ;;  %v1036_v28 = vmul.f32 %v4656_v19, %v4656_v19  ;;  %3824 = vmatpush3.msra.mxu1 %v1197_v17 }
  0xe5   : > { %v3771_v23 = vpop.f32.mrf.mxu0  ;;  %v3784_v24 = vpop.f32.mrf.mxu1 }
  0xe6   : > { %v1035_v25 = vmul.f32 %v4658_v22, %v4658_v22  ;;  %v4664_v29 = vsub.f32 %v3771_v23, %v3784_v24  ;;  %v1045_v37 = vsel %vm1041_vm1, %v1036_v28, 0.0  ;;  %v4403_v24 = vmov 0.0   ;;  %v1681_v28 = vld [vmem:[%s6016_s14 + $0x60] sm:$0xff] }
  0xe7   : > { %v897_v26 = vpop.f32.mrf.mxu0  ;;  %v1010_v27 = vpop.f32.mrf.mxu1  ;;  %3891 = vmatprep.subr.mxu1 %v4403_v24 }
  0xe8   : > { %v4666_v30 = vsub.f32 %v897_v26, %v1010_v27  ;;  %v1042_v31 = vsel %vm1041_vm1, %v1035_v25, 0.0  ;;  %v1038_v41 = vmul.f32 %v4664_v29, %v4664_v29  ;;  %v1684_v25 = vld [vmem:[%s6016_s14 + $0x78] sm:$0xff]  ;;  %v1683_v26 = vld [vmem:[%s6016_s14 + $0x70] sm:$0xff]  ;;  %v1682_v27 = vld [vmem:[%s6016_s14 + $0x68] sm:$0xff] }
  0xe9   : > { %v3787_v32 = vpop.f32.mrf.mxu1  ;;  %1043 = vadd.xlane.f32.xlu0 %v1042_v31  ;;  %v3774_v33 = vpop.f32.mrf.mxu0  ;;  %v1680_v31 = vld [vmem:[%s6016_s14 + $0x58] sm:$0xff] }
  0xea   : > { %v1037_v34 = vmul.f32 %v4666_v30, %v4666_v30  ;;  %v4672_v38 = vsub.f32 %v3774_v33, %v3787_v32  ;;  %v1051_v43 = vsel %vm1041_vm1, %v1038_v41, 0.0  ;;  %v1679_v32 = vld [vmem:[%s6016_s14 + $0x50] sm:$0xff]  ;;  %v1678_v33 = vld [vmem:[%s6016_s14 + $0x48] sm:$0xff]  ;;  %v1672_v41 = vld [vmem:[%s6016_s14 + $0x18] sm:$0xff] }
  0xeb   : > { %v907_v35 = vpop.f32.mrf.mxu0  ;;  %v1020_v36 = vpop.f32.mrf.mxu1 }
  0xec   : > { %v4674_v39 = vsub.f32 %v907_v35, %v1020_v36  ;;  %v1048_v40 = vsel %vm1041_vm1, %v1037_v34, 0.0  ;;  %v1040_v45 = vmul.f32 %v4672_v38, %v4672_v38  ;;  %v1677_v34 = vld [vmem:[%s6016_s14 + $0x40] sm:$0xff]  ;;  %v1676_v35 = vld [vmem:[%s6016_s14 + $0x38] sm:$0xff]  ;;  %v1675_v36 = vld [vmem:[%s6016_s14 + $0x30] sm:$0xff] }
  0xed   : > { %1046 = vadd.xlane.f32.xlu0 %v1045_v37  ;;  %1049 = vadd.xlane.f32.xlu1 %v1048_v40  ;;  %v3792_v3 = vpop.f32.mrf.mxu0  ;;  %v1674_v37 = vld [vmem:[%s6016_s14 + $0x28] sm:$0xff]  ;;  %v1673_v40 = vld [vmem:[%s6016_s14 + $0x20] sm:$0xff] }
  0xee   : > { %v1039_v42 = vmul.f32 %v4674_v39, %v4674_v39  ;;  %v1057_v46 = vsel %vm1041_vm1, %v1040_v45, 0.0  ;;  %v1192_v16 = vadd.f32 %v3792_v3, %v3372_v63  ;;  %v1668_v45 = vld [vmem:[%s780_s4] sm:$0x1] }
  0xef   : > { %v1186_v18 = vpop.f32.mrf.mxu0 }
  0xf0   : > { %v1054_v44 = vsel %vm1041_vm1, %v1039_v42, 0.0  ;;  %v1187_v20 = vadd.f32 %v3372_v63, %v1186_v18  ;;  %v1196_v21 = vmax.f32 %v1192_v16, 0.0  ;;  %v1671_v42 = vld [vmem:[%s6016_s14 + $0x10] sm:$0xff]  ;;  %v1565_v18 = vld [vmem:[%s6014_s12 + $0x78] sm:$0xff] }
  0xf1   : > { %1052 = vadd.xlane.f32.xlu1 %v1051_v43  ;;  %1055 = vadd.xlane.f32.xlu0 %v1054_v44  ;;  %v1670_v43 = vld [vmem:[%s6016_s14 + $0x8] sm:$0xff]  ;;  %v1669_v44 = vld [vmem:[%s6016_s14] sm:$0xff] }
  0xf2   : > { %v1195_v23 = vmax.f32 %v1187_v20, 0.0 }
  0xf4   : > { %3825 = vmatprep.mubr.f32.mxu1 %v1195_v23 }
  0xf5   : > { %1058 = vadd.xlane.f32.xlu1 %v1057_v46  ;;  %3826 = vmatmul.mubr.f32.vlgmr.msra.gmra.mxu1 %v1196_v21 }
  0xf6   : > { %3892 = vmatpush3.msra.mxu1 %v1684_v25  ;;  %3923 = vmatprep.mubr.msk.f32.mxu1 %vm4404_vm4, %v4403_v24 }
  0xf7   : > { %3893 = vmatprep.subr.mxu1 %v4403_v24 }
  0xf8   : > { %3894 = vmatpush3.msra.mxu1 %v1683_v26 }
  0xf9   : > { %3895 = vmatprep.subr.mxu1 %v4403_v24 }
  0xfa   : > { %3896 = vmatpush3.msra.mxu1 %v1682_v27 }
  0xfb   : > { %3897 = vmatprep.subr.mxu1 %v4403_v24 }
  0xfc   : > { %3898 = vmatpush3.msra.mxu1 %v1681_v28 }
  0xfd   : > { %3899 = vmatprep.subr.mxu1 %v4403_v24 }
  0xfe   : > { %3900 = vmatpush3.msra.mxu1 %v1680_v31 }
  0xff   : > { %3901 = vmatprep.subr.mxu1 %v4403_v24 }
 0x100   : > { %3902 = vmatpush3.msra.mxu1 %v1679_v32 }
 0x101   : > { %3903 = vmatprep.subr.mxu1 %v4403_v24 }
 0x102   : > { %3904 = vmatpush3.msra.mxu1 %v1678_v33 }
 0x103   : > { %3905 = vmatprep.subr.mxu1 %v4403_v24 }
 0x104   : > { %3906 = vmatpush3.msra.mxu1 %v1677_v34 }
 0x105   : > { %3907 = vmatprep.subr.mxu1 %v4403_v24 }
 0x106   : > { %3908 = vmatpush3.msra.mxu1 %v1676_v35 }
 0x107   : > { %3909 = vmatprep.subr.mxu1 %v4403_v24 }
 0x108   : > { %3910 = vmatpush3.msra.mxu1 %v1675_v36 }
 0x109   : > { %3911 = vmatprep.subr.mxu1 %v4403_v24 }
 0x10a   : > { %3912 = vmatpush3.msra.mxu1 %v1674_v37  ;;  %v1564_v37 = vld [vmem:[%s6014_s12 + $0x70] sm:$0xff] }
 0x10b   : > { %3913 = vmatprep.subr.mxu1 %v4403_v24 }
 0x10c   : > { %3914 = vmatpush3.msra.mxu1 %v1673_v40  ;;  %v1563_v40 = vld [vmem:[%s6014_s12 + $0x68] sm:$0xff] }
 0x10d   : > { %3915 = vmatprep.subr.mxu1 %v4403_v24 }
 0x10e   : > { %3916 = vmatpush3.msra.mxu1 %v1672_v41  ;;  %v1556_v41 = vld [vmem:[%s6014_s12 + $0x30] sm:$0xff] }
 0x10f   : > { %3917 = vmatprep.subr.mxu1 %v4403_v24 }
 0x110   : > { %3918 = vmatpush3.msra.mxu1 %v1671_v42  ;;  %v1555_v42 = vld [vmem:[%s6014_s12 + $0x28] sm:$0xff] }
 0x111   : > { %3919 = vmatprep.subr.mxu1 %v4403_v24 }
 0x112   : > { %3920 = vmatpush3.msra.mxu1 %v1670_v43  ;;  %v1554_v43 = vld [vmem:[%s6014_s12 + $0x20] sm:$0xff] }
 0x113   : > { %3921 = vmatprep.subr.mxu1 %v4403_v24 }
 0x114   : > { %3922 = vmatpush3.msra.mxu1 %v1669_v44  ;;  %v1553_v44 = vld [vmem:[%s6014_s12 + $0x18] sm:$0xff] }
 0x115   : > { %3924 = vmatmul.mubr.f32.vlgmr.msra.gmra.mxu1 %v1668_v45  ;;  %v1552_v45 = vld [vmem:[%s6014_s12 + $0x10] sm:$0xff] }
 0x172   : > { %v1044_v46 = vpop.xlane.xlu0 %1043 }
 0x173   : > { %4285 = vrsqrt.f32 %v1044_v46  ;;  %vm1062_vm5 = vcmp.eq.f32.partialorder %v1044_v46, inf  ;;  %v1065_v55 = vand.u32 2147483648, %v1044_v46  ;;  %vm1064_vm7 = vcmp.eq.f32.partialorder %v1044_v46, 0.0 }
 0x176   : > { %v1047_v47 = vpop.xlane.xlu0 %1046  ;;  %v1050_v49 = vpop.xlane.xlu1 %1049 }
 0x177   : > { %4287 = vrsqrt.f32 %v1047_v47  ;;  %vm1069_vm8 = vcmp.eq.f32.partialorder %v1047_v47, inf  ;;  %v1072_v61 = vand.u32 2147483648, %v1047_v47  ;;  %vm1071_vm9 = vcmp.eq.f32.partialorder %v1047_v47, 0.0 }
 0x178   : > { %4289 = vrsqrt.f32 %v1050_v49  ;;  %vm1076_vm10 = vcmp.eq.f32.partialorder %v1050_v49, inf  ;;  %v1079_v0 = vand.u32 2147483648, %v1050_v49  ;;  %vm1078_vm11 = vcmp.eq.f32.partialorder %v1050_v49, 0.0 }
 0x17a   : > { %v1053_v50 = vpop.xlane.xlu1 %1052  ;;  %v1056_v51 = vpop.xlane.xlu0 %1055 }
 0x17b   : > { %4291 = vrsqrt.f32 %v1053_v50  ;;  %vm1083_vm12 = vcmp.eq.f32.partialorder %v1053_v50, inf  ;;  %v1086_v25 = vand.u32 2147483648, %v1053_v50  ;;  %vm1085_vm13 = vcmp.eq.f32.partialorder %v1053_v50, 0.0 }
 0x17c   : > { %4293 = vrsqrt.f32 %v1056_v51  ;;  %vm1090_vm14 = vcmp.eq.f32.partialorder %v1056_v51, inf  ;;  %v1093_v27 = vand.u32 2147483648, %v1056_v51  ;;  %vm1092_vm15 = vcmp.eq.f32.partialorder %v1056_v51, 0.0 }
 0x17e   : > { %v1059_v52 = vpop.xlane.xlu1 %1058 }
 0x17f   : > { %4295 = vrsqrt.f32 %v1059_v52  ;;  %vm1099_vm3 = vcmp.eq.f32.partialorder %v1059_v52, 0.0 }
 0x180   : > { %v4286_v53 = vpop.eup %4285 }
 0x181   : > { %v1061_v54 = vmul.f32 %v4286_v53, %v1044_v46  ;;  %v3376_v53 = vld [vmem:[%s6172_s28] ss:$0 sm:$0xff] }
 0x183   : > { %v1063_v56 = vsel %vm1062_vm5, %v1044_v46, %v1061_v54  ;;  %v1551_v46 = vld [vmem:[%s6014_s12 + $0x8] sm:$0xff]  ;;  %v1685_v54 = vld [vmem:[%s6017_s15] sm:$0x1] }
 0x184   : > { %v4288_v57 = vpop.eup %4287  ;;  %v1066_v58 = vsel %vm1064_vm7, %v1065_v55, %v1063_v56 }
 0x185   : > { %v4290_v59 = vpop.eup %4289  ;;  %v1068_v60 = vmul.f32 %v4288_v57, %v1047_v47  ;;  %3830 = vmatprep.mubr.msk.f32.mxu0 %vm1297_vm6, %v1066_v58 }
 0x186   : > { %v1075_v62 = vmul.f32 %v4290_v59, %v1050_v49 }
 0x187   : > { %v1070_v63 = vsel %vm1069_vm8, %v1047_v47, %v1068_v60  ;;  %v1550_v47 = vld [vmem:[%s6014_s12] sm:$0xff] }
 0x188   : > { %v4292_v3 = vpop.eup %4291  ;;  %v1073_v16 = vsel %vm1071_vm9, %v1072_v61, %v1070_v63  ;;  %v1077_v17 = vsel %vm1076_vm10, %v1050_v49, %v1075_v62  ;;  %v1756_v49 = vlaneseq }
 0x189   : > { %v4294_v20 = vpop.eup %4293  ;;  %3831 = vmatmul.mubr.msk.f32.vlgmr.msra.gmra.mxu0 %vm1297_vm6, %v1073_v16  ;;  %v1080_v21 = vsel %vm1078_vm11, %v1079_v0, %v1077_v17  ;;  %v1082_v23 = vmul.f32 %v4292_v3, %v1053_v50 }
 0x18a   : > { %v1089_v24 = vmul.f32 %v4294_v20, %v1056_v51  ;;  %3840 = vmatpush3.msk.msra.mxu0 %vm1116_vm2, %v4692_v48  ;;  %3833 = vmatprep.mubr.msk.f32.mxu0 %vm1297_vm6, %v1080_v21  ;;  %vm1097_vm2 = vcmp.eq.f32.partialorder %v1059_v52, inf  ;;  %v1100_v48 = vand.u32 2147483648, %v1059_v52 }
 0x18b   : > { %v1084_v26 = vsel %vm1083_vm12, %v1053_v50, %v1082_v23  ;;  %3850 = vmatprep.subr.mxu0 %v1565_v18 }
 0x18c   : > { %v4296_v28 = vpop.eup %4295  ;;  %v1087_v31 = vsel %vm1085_vm13, %v1086_v25, %v1084_v26  ;;  %v1091_v32 = vsel %vm1090_vm14, %v1056_v51, %v1089_v24  ;;  %v1757_v51 = vshrl.u32 %v1756_v49, 7  ;;  %v3391_v24 = vld [vmem:[%s6013_s11] ss:$0 sm:$0xff] }
 0x18d   : > { %v1096_v33 = vmul.f32 %v4296_v28, %v1059_v52  ;;  %3834 = vmatmul.mubr.msk.f32.gmra.mxu0 %vm1297_vm6, %v1087_v31  ;;  %v1094_v34 = vsel %vm1092_vm15, %v1093_v27, %v1091_v32  ;;  %v4915_v49 = vld [vmem:[%s6018_s16 + $0x20] sm:$0xff] }
 0x18e   : > { %3836 = vmatprep.mubr.msk.f32.mxu0 %vm1297_vm6, %v1094_v34  ;;  %v1758_v55 = vsub.s32 0, %v1757_v51  ;;  %6177 = vst [vmem:[#allocation15_spill] sm:$0xff] %v4915_v49  ;;  %v4925_v51 = vld [vmem:[%s6018_s16 + $0x30] sm:$0xff] }
 0x18f   : > { %v1098_v35 = vsel %vm1097_vm2, %v1059_v52, %v1096_v33 }
 0x190   : > { %v1101_v36 = vsel %vm1099_vm3, %v1100_v48, %v1098_v35 }
 0x191   : > { %3837 = vmatmul.mubr.msk.f32.gmra.mxu0 %vm1297_vm6, %v1101_v36 }
 0x192   : > { %3841 = vmatprep.mubr.msk.f32.mxu0 %vm1041_vm1, %v4658_v22  ;;  %v1562_v22 = vld [vmem:[%s6014_s12 + $0x60] sm:$0xff] }
 0x195   : > { %3842 = vmatmul.mubr.msk.f32.vlgmr.msra.gmra.mxu0 %vm1041_vm1, %v4656_v19  ;;  %v1561_v19 = vld [vmem:[%s6014_s12 + $0x58] sm:$0xff] }
 0x196   : > { %3844 = vmatprep.mubr.msk.f32.mxu0 %vm1041_vm1, %v4666_v30  ;;  %3851 = vmatpush3.msra.mxu0 %v1565_v18  ;;  %v1559_v30 = vld [vmem:[%s6014_s12 + $0x48] sm:$0xff] }
 0x197   : > { %3852 = vmatprep.subr.mxu0 %v1564_v37 }
 0x198   : > { %3853 = vmatpush3.msra.mxu0 %v1564_v37 }
 0x199   : > { %3845 = vmatmul.mubr.msk.f32.gmra.mxu0 %vm1041_vm1, %v4664_v29  ;;  %3854 = vmatprep.subr.mxu0 %v1563_v40  ;;  %v1560_v29 = vld [vmem:[%s6014_s12 + $0x50] sm:$0xff] }
 0x19a   : > { %3847 = vmatprep.mubr.msk.f32.mxu0 %vm1041_vm1, %v4674_v39  ;;  %3855 = vmatpush3.msra.mxu0 %v1563_v40  ;;  %v1558_v39 = vld [vmem:[%s6014_s12 + $0x40] sm:$0xff] }
 0x19b   : > { %3856 = vmatprep.subr.mxu0 %v1562_v22 }
 0x19c   : > { %3857 = vmatpush3.msra.mxu0 %v1562_v22 }
 0x19d   : > { %3848 = vmatmul.mubr.msk.f32.gmra.mxu0 %vm1041_vm1, %v4672_v38  ;;  %3858 = vmatprep.subr.mxu0 %v1561_v19  ;;  %v1557_v38 = vld [vmem:[%s6014_s12 + $0x38] sm:$0xff] }
 0x19e   : > { %3859 = vmatpush3.msra.mxu0 %v1561_v19 }
 0x19f   : > { %3860 = vmatprep.subr.mxu0 %v1560_v29 }
 0x1a0   : > { %3861 = vmatpush3.msra.mxu0 %v1560_v29 }
 0x1a1   : > { %3862 = vmatprep.subr.mxu0 %v1559_v30 }
 0x1a2   : > { %3863 = vmatpush3.msra.mxu0 %v1559_v30 }
 0x1a3   : > { %3864 = vmatprep.subr.mxu0 %v1558_v39 }
 0x1a4   : > { %3865 = vmatpush3.msra.mxu0 %v1558_v39 }
 0x1a5   : > { %3866 = vmatprep.subr.mxu0 %v1557_v38 }
 0x1a6   : > { %3867 = vmatpush3.msra.mxu0 %v1557_v38 }
 0x1a7   : > { %3868 = vmatprep.subr.mxu0 %v1556_v41 }
 0x1a8   : > { %3869 = vmatpush3.msra.mxu0 %v1556_v41 }
 0x1a9   : > { %3870 = vmatprep.subr.mxu0 %v1555_v42 }
 0x1aa   : > { %3871 = vmatpush3.msra.mxu0 %v1555_v42 }
 0x1ab   : > { %3872 = vmatprep.subr.mxu0 %v1554_v43 }
 0x1ac   : > { %3873 = vmatpush3.msra.mxu0 %v1554_v43 }
 0x1ad   : > { %3874 = vmatprep.subr.mxu0 %v1553_v44 }
 0x1ae   : > { %3875 = vmatpush3.msra.mxu0 %v1553_v44  ;;  %v4895_v44 = vld [vmem:[%s6018_s16] sm:$0xff] }
 0x1af   : > { %3876 = vmatprep.subr.mxu0 %v1552_v45  ;;  %6173 = vst [vmem:[#allocation11_spill] sm:$0xff] %v4895_v44  ;;  %v5145_v44 = vld [vmem:[%s6022_s20 + $0x8] sm:$0xff] }
 0x1b0   : > { %3877 = vmatpush3.msra.mxu0 %v1552_v45  ;;  %v4900_v45 = vld [vmem:[%s6018_s16 + $0x8] sm:$0xff]  ;;  %6211 = vst [vmem:[#allocation49_spill] sm:$0xff] %v5145_v44  ;;  %v5170_v44 = vld [vmem:[%s6022_s20 + $0x30] sm:$0xff] }
 0x1b1   : > { %3878 = vmatprep.subr.mxu0 %v1551_v46  ;;  %6174 = vst [vmem:[#allocation12_spill] sm:$0xff] %v4900_v45  ;;  %v5155_v45 = vld [vmem:[%s6022_s20 + $0x18] sm:$0xff]  ;;  %6216 = vst [vmem:[#allocation54_spill] sm:$0xff] %v5170_v44 }
 0x1b2   : > { %3879 = vmatpush3.msra.mxu0 %v1551_v46  ;;  %v4905_v46 = vld [vmem:[%s6018_s16 + $0x10] sm:$0xff]  ;;  %6213 = vst [vmem:[#allocation51_spill] sm:$0xff] %v5155_v45  ;;  %v5180_v45 = vld [vmem:[%s6022_s20 + $0x40] sm:$0xff]  ;;  %v5195_v44 = vld [vmem:[%s6022_s20 + $0x58] sm:$0xff] }
 0x1b3   : > { %3880 = vmatprep.subr.mxu0 %v1550_v47  ;;  %6175 = vst [vmem:[#allocation13_spill] sm:$0xff] %v4905_v46  ;;  %6218 = vst [vmem:[#allocation56_spill] sm:$0xff] %v5180_v45  ;;  %v5205_v45 = vld [vmem:[%s6022_s20 + $0x68] sm:$0xff] }
 0x1b4   : > { %3881 = vmatpush3.msra.mxu0 %v1550_v47  ;;  %v4910_v47 = vld [vmem:[%s6018_s16 + $0x18] sm:$0xff]  ;;  %6221 = vst [vmem:[#allocation59_spill] sm:$0xff] %v5195_v44  ;;  %6223 = vst [vmem:[#allocation61_spill] sm:$0xff] %v5205_v45  ;;  %v5220_v44 = vld [vmem:[%s6022_s20 + $0x80] sm:$0xff] }
 0x1b5   : > { %v3827_v50 = vpop.f32.mrf.mxu1  ;;  %6176 = vst [vmem:[#allocation14_spill] sm:$0xff] %v4910_v47  ;;  %6226 = vst [vmem:[#allocation64_spill] sm:$0xff] %v5220_v44  ;;  %v5230_v45 = vld [vmem:[%s6022_s20 + $0x90] sm:$0xff]  ;;  %v5245_v44 = vld [vmem:[%s6022_s20 + $0xa8] sm:$0xff] }
 0x1b6   : > { %v1292_v57 = vadd.f32 %v3827_v50, %v3376_v53  ;;  %v4920_v50 = vld [vmem:[%s6018_s16 + $0x28] sm:$0xff]  ;;  %6228 = vst [vmem:[#allocation66_spill] sm:$0xff] %v5230_v45  ;;  %6231 = vst [vmem:[#allocation69_spill] sm:$0xff] %v5245_v44  ;;  %v5255_v45 = vld [vmem:[%s6022_s20 + $0xb8] sm:$0xff] }
 0x1b7   : > { %v1286_v52 = vpop.f32.mrf.mxu1  ;;  %6233 = vst [vmem:[#allocation71_spill] sm:$0xff] %v5255_v45  ;;  %v5270_v44 = vld [vmem:[%s6022_s20 + $0xd0] sm:$0xff]  ;;  %v5280_v45 = vld [vmem:[%s6022_s20 + $0xe0] sm:$0xff] }
 0x1b8   : > { %v1287_v58 = vadd.f32 %v3376_v53, %v1286_v52  ;;  %v4930_v52 = vld [vmem:[%s6018_s16 + $0x38] sm:$0xff]  ;;  %v4935_v53 = vld [vmem:[%s6018_s16 + $0x40] sm:$0xff]  ;;  %6236 = vst [vmem:[#allocation74_spill] sm:$0xff] %v5270_v44  ;;  %6238 = vst [vmem:[#allocation76_spill] sm:$0xff] %v5280_v45 }
 0x1b9   : > { %v5295_v44 = vld [vmem:[%s6022_s20 + $0xf8] sm:$0xff]  ;;  %v5305_v45 = vld [vmem:[%s6020_s18] sm:$0xff] }
 0x1ba   : > { %6241 = vst [vmem:[#allocation79_spill] sm:$0xff] %v5295_v44  ;;  %6243 = vst [vmem:[#allocation81_spill] sm:$0xff] %v5305_v45  ;;  %v5320_v44 = vld [vmem:[%s6020_s18 + $0x18] sm:$0xff]  ;;  %v5330_v45 = vld [vmem:[%s6020_s18 + $0x28] sm:$0xff] }
 0x1bb   : > { %6246 = vst [vmem:[#allocation84_spill] sm:$0xff] %v5320_v44  ;;  %6248 = vst [vmem:[#allocation86_spill] sm:$0xff] %v5330_v45  ;;  %v5345_v44 = vld [vmem:[%s6020_s18 + $0x40] sm:$0xff]  ;;  %v5355_v45 = vld [vmem:[%s6020_s18 + $0x50] sm:$0xff] }
 0x1bc   : > { %6251 = vst [vmem:[#allocation89_spill] sm:$0xff] %v5345_v44  ;;  %6253 = vst [vmem:[#allocation91_spill] sm:$0xff] %v5355_v45  ;;  %v5370_v44 = vld [vmem:[%s6020_s18 + $0x68] sm:$0xff]  ;;  %v5380_v45 = vld [vmem:[%s6020_s18 + $0x78] sm:$0xff] }
 0x1bd   : > { %6256 = vst [vmem:[#allocation94_spill] sm:$0xff] %v5370_v44  ;;  %6258 = vst [vmem:[#allocation96_spill] sm:$0xff] %v5380_v45  ;;  %v5395_v44 = vld [vmem:[%s6021_s19 + $0x10] sm:$0xff]  ;;  %v5405_v45 = vld [vmem:[%s6021_s19 + $0x20] sm:$0xff] }
 0x1be   : > { %6261 = vst [vmem:[#allocation99_spill] sm:$0xff] %v5395_v44  ;;  %6263 = vst [vmem:[#allocation101_spill] sm:$0xff] %v5405_v45  ;;  %v5420_v44 = vld [vmem:[%s6021_s19 + $0x38] sm:$0xff]  ;;  %v5430_v45 = vld [vmem:[%s6021_s19 + $0x48] sm:$0xff] }
 0x1bf   : > { %6266 = vst [vmem:[#allocation104_spill] sm:$0xff] %v5420_v44  ;;  %6268 = vst [vmem:[#allocation106_spill] sm:$0xff] %v5430_v45  ;;  %v5445_v44 = vld [vmem:[%s6021_s19 + $0x60] sm:$0xff]  ;;  %v5455_v45 = vld [vmem:[%s6021_s19 + $0x70] sm:$0xff] }
 0x1c0   : > { %6271 = vst [vmem:[#allocation109_spill] sm:$0xff] %v5445_v44  ;;  %6273 = vst [vmem:[#allocation111_spill] sm:$0xff] %v5455_v45 }
 0x1d5   : > { %v1752_v56 = vpop.f32.mrf.mxu1 }
 0x1d6   : > { %v1753_v59 = vadd.f32 %v1752_v56, %v1685_v54  ;;  %v4940_v54 = vld [vmem:[%s6018_s16 + $0x48] sm:$0xff]  ;;  %v4950_v56 = vld [vmem:[%s6018_s16 + $0x58] sm:$0xff] }
 0x1d7   : > { %v3925_v60 = vpop.f32.mrf.mxu1 }
 0x1d8   : > { %v1759_v61 = vrot.slane %v1753_v59, %v1758_v55  ;;  %v4945_v55 = vld [vmem:[%s6018_s16 + $0x50] sm:$0xff]  ;;  %v4970_v60 = vld [vmem:[%s6018_s16 + $0x78] sm:$0xff] }
 0x1d9   : > { %v4965_v59 = vld [vmem:[%s6018_s16 + $0x70] sm:$0xff] }
 0x1da   : > { %v4885_v62 = vadd.f32 %v1759_v61, %v1287_v58   ;;  %v4887_v63 = vadd.f32 %v1759_v61, %v1292_v57   ;;  %v4955_v57 = vld [vmem:[%s6018_s16 + $0x60] sm:$0xff]  ;;  %v4960_v58 = vld [vmem:[%s6018_s16 + $0x68] sm:$0xff] }
 0x1db   : > { %v4975_v61 = vld [vmem:[%s6018_s16 + $0x80] sm:$0xff] }
 0x1dc   : > { %6178 = vst [vmem:[#allocation16_spill] sm:$0xff] %v4975_v61  ;;  %v5150_v61 = vld [vmem:[%s6022_s20 + $0x10] sm:$0xff] }
 0x1dd   : > { %6212 = vst [vmem:[#allocation50_spill] sm:$0xff] %v5150_v61  ;;  %v5175_v61 = vld [vmem:[%s6022_s20 + $0x38] sm:$0xff] }
 0x1de   : > { %6217 = vst [vmem:[#allocation55_spill] sm:$0xff] %v5175_v61  ;;  %v5200_v61 = vld [vmem:[%s6022_s20 + $0x60] sm:$0xff] }
 0x1df   : > { %6222 = vst [vmem:[#allocation60_spill] sm:$0xff] %v5200_v61  ;;  %v5225_v61 = vld [vmem:[%s6022_s20 + $0x88] sm:$0xff] }
 0x1e0   : > { %6227 = vst [vmem:[#allocation65_spill] sm:$0xff] %v5225_v61  ;;  %v5250_v61 = vld [vmem:[%s6022_s20 + $0xb0] sm:$0xff] }
 0x1e1   : > { %6232 = vst [vmem:[#allocation70_spill] sm:$0xff] %v5250_v61  ;;  %v5275_v61 = vld [vmem:[%s6022_s20 + $0xd8] sm:$0xff] }
 0x1e2   : > { %6237 = vst [vmem:[#allocation75_spill] sm:$0xff] %v5275_v61  ;;  %v5300_v61 = vld [vmem:[%s6023_s21] ss:$0 sm:$0xff] }
 0x1e3   : > { %6242 = vst [vmem:[#allocation80_spill] sm:$0xff] %v5300_v61  ;;  %v5325_v61 = vld [vmem:[%s6020_s18 + $0x20] sm:$0xff] }
 0x1e4   : > { %6247 = vst [vmem:[#allocation85_spill] sm:$0xff] %v5325_v61  ;;  %v5350_v61 = vld [vmem:[%s6020_s18 + $0x48] sm:$0xff] }
 0x1e5   : > { %6252 = vst [vmem:[#allocation90_spill] sm:$0xff] %v5350_v61  ;;  %v5375_v61 = vld [vmem:[%s6020_s18 + $0x70] sm:$0xff] }
 0x1e6   : > { %6257 = vst [vmem:[#allocation95_spill] sm:$0xff] %v5375_v61  ;;  %v5400_v61 = vld [vmem:[%s6021_s19 + $0x18] sm:$0xff] }
 0x1e7   : > { %6262 = vst [vmem:[#allocation100_spill] sm:$0xff] %v5400_v61  ;;  %v5425_v61 = vld [vmem:[%s6021_s19 + $0x40] sm:$0xff] }
 0x1e8   : > { %6267 = vst [vmem:[#allocation105_spill] sm:$0xff] %v5425_v61  ;;  %v5450_v61 = vld [vmem:[%s6021_s19 + $0x68] sm:$0xff] }
 0x1e9   : > { %6272 = vst [vmem:[#allocation110_spill] sm:$0xff] %v5450_v61 }
 0x249   : > { %v3832_v0 = vpop.f32.mrf.mxu0 }
 0x24b   : > { %v1386_v3 = vpop.f32.mrf.mxu0 }
 0x24d   : > { %v3835_v16 = vpop.f32.mrf.mxu0 }
 0x24f   : > { %v1396_v17 = vpop.f32.mrf.mxu0 }
 0x251   : > { %v3838_v18 = vpop.f32.mrf.mxu0 }
 0x253   : > { %v1406_v20 = vpop.f32.mrf.mxu0 }
 0x255   : > { %v3843_v21 = vpop.f32.mrf.mxu0 }
 0x256   : > { %v1508_v23 = vadd.f32 %v3843_v21, %v3832_v0  ;;  %v4980_v0 = vld [vmem:[%s6018_s16 + $0x88] sm:$0xff]  ;;  %v5010_v21 = vld [vmem:[%s6018_s16 + $0xb8] sm:$0xff] }
 0x257   : > { %v1502_v25 = vpop.f32.mrf.mxu0  ;;  %6179 = vst [vmem:[#allocation17_spill] sm:$0xff] %v4980_v0  ;;  %6185 = vst [vmem:[#allocation23_spill] sm:$0xff] %v5010_v21 }
 0x258   : > { %v1503_v26 = vadd.f32 %v1502_v25, %v1386_v3  ;;  %v1539_v27 = vadd.f32 %v3391_v24, %v1508_v23  ;;  %v4985_v3 = vld [vmem:[%s6018_s16 + $0x90] sm:$0xff]  ;;  %v5015_v23 = vld [vmem:[%s6018_s16 + $0xc0] sm:$0xff] }
 0x259   : > { %v3846_v28 = vpop.f32.mrf.mxu0  ;;  %6180 = vst [vmem:[#allocation18_spill] sm:$0xff] %v4985_v3  ;;  %6186 = vst [vmem:[#allocation24_spill] sm:$0xff] %v5015_v23  ;;  %v5025_v25 = vld [vmem:[%s6018_s16 + $0xd0] sm:$0xff] }
 0x25a   : > { %v1538_v31 = vadd.f32 %v3391_v24, %v1503_v26  ;;  %v1518_v32 = vadd.f32 %v3846_v28, %v3835_v16  ;;  %v1545_v35 = vmax.f32 %v1539_v27, 0.0  ;;  %v4990_v16 = vld [vmem:[%s6018_s16 + $0x98] sm:$0xff]  ;;  %6188 = vst [vmem:[#allocation26_spill] sm:$0xff] %v5025_v25  ;;  %v5035_v27 = vld [vmem:[%s6018_s16 + $0xe0] sm:$0xff]  ;;  %v5040_v28 = vld [vmem:[%s6018_s16 + $0xe8] sm:$0xff] }
 0x25b   : > { %v1512_v33 = vpop.f32.mrf.mxu0  ;;  %6181 = vst [vmem:[#allocation19_spill] sm:$0xff] %v4990_v16  ;;  %v5030_v26 = vld [vmem:[%s6018_s16 + $0xd8] sm:$0xff]  ;;  %6190 = vst [vmem:[#allocation28_spill] sm:$0xff] %v5035_v27 }
 0x25c   : > { %v1544_v34 = vmax.f32 %v1538_v31, 0.0  ;;  %v1513_v48 = vadd.f32 %v1512_v33, %v1396_v17  ;;  %v1541_v36 = vadd.f32 %v3391_v24, %v1518_v32  ;;  %v4995_v17 = vld [vmem:[%s6018_s16 + $0xa0] sm:$0xff]  ;;  %6189 = vst [vmem:[#allocation27_spill] sm:$0xff] %v5030_v26  ;;  %6191 = vst [vmem:[#allocation29_spill] sm:$0xff] %v5040_v28  ;;  %v5045_v31 = vld [vmem:[%s6018_s16 + $0xf0] sm:$0xff] }
 0x25d   : > { %v3849_v37 = vpop.f32.mrf.mxu0  ;;  %6182 = vst [vmem:[#allocation20_spill] sm:$0xff] %v4995_v17  ;;  %6192 = vst [vmem:[#allocation30_spill] sm:$0xff] %v5045_v31  ;;  %v5050_v32 = vld [vmem:[%s6018_s16 + $0xf8] sm:$0xff]  ;;  %v5055_v33 = vld [vmem:[%s6018_s16 + $0x100] sm:$0xff] }
 0x25e   : > { %v1540_v40 = vadd.f32 %v3391_v24, %v1513_v48  ;;  %v1528_v22 = vadd.f32 %v3849_v37, %v3838_v18  ;;  %3882 = vmatprep.mubr.f32.mxu0 %v1544_v34  ;;  %v1547_v39 = vmax.f32 %v1541_v36, 0.0  ;;  %v5000_v18 = vld [vmem:[%s6018_s16 + $0xa8] sm:$0xff]  ;;  %6193 = vst [vmem:[#allocation31_spill] sm:$0xff] %v5050_v32  ;;  %6194 = vst [vmem:[#allocation32_spill] sm:$0xff] %v5055_v33  ;;  %v5065_v48 = vld [vmem:[%s6018_s16 + $0x110] sm:$0xff] }
 0x25f   : > { %v1522_v19 = vpop.f32.mrf.mxu0  ;;  %3883 = vmatmul.mubr.f32.vlgmr.msra.gmra.mxu0 %v1545_v35  ;;  %6183 = vst [vmem:[#allocation21_spill] sm:$0xff] %v5000_v18  ;;  %v5060_v34 = vld [vmem:[%s6018_s16 + $0x108] sm:$0xff]  ;;  %6196 = vst [vmem:[#allocation34_spill] sm:$0xff] %v5065_v48  ;;  %v5070_v35 = vld [vmem:[%s6018_s16 + $0x118] sm:$0xff] }
 0x260   : > { %v1546_v29 = vmax.f32 %v1540_v40, 0.0  ;;  %v1523_v30 = vadd.f32 %v1522_v19, %v1406_v20  ;;  %v1543_v38 = vadd.f32 %v3391_v24, %v1528_v22  ;;  %v5005_v20 = vld [vmem:[%s6018_s16 + $0xb0] sm:$0xff]  ;;  %6195 = vst [vmem:[#allocation33_spill] sm:$0xff] %v5060_v34  ;;  %6197 = vst [vmem:[#allocation35_spill] sm:$0xff] %v5070_v35  ;;  %v5075_v36 = vld [vmem:[%s6018_s16 + $0x120] sm:$0xff] }
 0x261   : > { %6184 = vst [vmem:[#allocation22_spill] sm:$0xff] %v5005_v20  ;;  %6198 = vst [vmem:[#allocation36_spill] sm:$0xff] %v5075_v36  ;;  %v5080_v37 = vld [vmem:[%s6018_s16 + $0x128] sm:$0xff]  ;;  %v5085_v40 = vld [vmem:[%s6018_s16 + $0x130] sm:$0xff] }
 0x262   : > { %v1542_v41 = vadd.f32 %v3391_v24, %v1523_v30  ;;  %3885 = vmatprep.mubr.f32.mxu0 %v1546_v29  ;;  %v1549_v43 = vmax.f32 %v1543_v38, 0.0  ;;  %v5020_v24 = vld [vmem:[%s6018_s16 + $0xc8] sm:$0xff]  ;;  %6199 = vst [vmem:[#allocation37_spill] sm:$0xff] %v5080_v37  ;;  %6200 = vst [vmem:[#allocation38_spill] sm:$0xff] %v5085_v40  ;;  %v5090_v22 = vld [vmem:[%s6018_s16 + $0x138] sm:$0xff] }
 0x263   : > { %3886 = vmatmul.mubr.f32.gmra.mxu0 %v1547_v39  ;;  %6187 = vst [vmem:[#allocation25_spill] sm:$0xff] %v5020_v24  ;;  %6201 = vst [vmem:[#allocation39_spill] sm:$0xff] %v5090_v22  ;;  %v5095_v19 = vld [vmem:[%s6018_s16 + $0x140] sm:$0xff]  ;;  %v5100_v29 = vld [vmem:[%s6018_s16 + $0x148] sm:$0xff] }
 0x264   : > { %v1548_v42 = vmax.f32 %v1542_v41, 0.0  ;;  %6202 = vst [vmem:[#allocation40_spill] sm:$0xff] %v5095_v19  ;;  %6203 = vst [vmem:[#allocation41_spill] sm:$0xff] %v5100_v29  ;;  %v5105_v30 = vld [vmem:[%s6018_s16 + $0x150] sm:$0xff]  ;;  %v5110_v39 = vld [vmem:[%s6018_s16 + $0x158] sm:$0xff] }
 0x265   : > { %6204 = vst [vmem:[#allocation42_spill] sm:$0xff] %v5105_v30  ;;  %6205 = vst [vmem:[#allocation43_spill] sm:$0xff] %v5110_v39  ;;  %v5115_v38 = vld [vmem:[%s6018_s16 + $0x160] sm:$0xff]  ;;  %v5120_v41 = vld [vmem:[%s6018_s16 + $0x168] sm:$0xff] }
 0x266   : > { %3888 = vmatprep.mubr.f32.mxu0 %v1548_v42  ;;  %6206 = vst [vmem:[#allocation44_spill] sm:$0xff] %v5115_v38  ;;  %6207 = vst [vmem:[#allocation45_spill] sm:$0xff] %v5120_v41  ;;  %v5125_v42 = vld [vmem:[%s6018_s16 + $0x170] sm:$0xff] }
 0x267   : > { %3889 = vmatmul.mubr.f32.gmra.mxu0 %v1549_v43  ;;  %6208 = vst [vmem:[#allocation46_spill] sm:$0xff] %v5125_v42  ;;  %v5130_v43 = vld [vmem:[%s6018_s16 + $0x178] sm:$0xff] }
 0x31f   : > { %v3884_v44 = vpop.f32.mrf.mxu0 }
 0x320   : > { %v1645_v33 = vadd.f32 %v3884_v44, %v3392_v1  }
 0x321   : > { %v1639_v0 = vpop.f32.mrf.mxu0 }
 0x322   : > { %v1640_v46 = vadd.f32 %v3392_v1, %v1639_v0  }
 0x323   : > { %v3887_v34 = vpop.f32.mrf.mxu0 }
 0x324   : > { %v1655_v61 = vadd.f32 %v3887_v34, %v3392_v1  }
 0x325   : > { %v1649_v3 = vpop.f32.mrf.mxu0 }
 0x326   : > { %v1650_v47 = vadd.f32 %v3392_v1, %v1649_v3  }
 0x327   : > { %v3890_v48 = vpop.f32.mrf.mxu0 }
 0x328   : > { %v1665_v16 = vadd.f32 %v3890_v48, %v3392_v1  }
 0x329   : > { %v1659_v45 = vpop.f32.mrf.mxu0 }
 0x32a   : > { %v1660_v49 = vadd.f32 %v3392_v1, %v1659_v45  }
 0x32b LB: >> { %v6275_v42 = vld [vmem:[#allocation46_spill] sm:$0xff]  ;;  %v6276_v41 = vld [vmem:[#allocation45_spill] sm:$0xff]  ;;  %v6278_v39 = vld [vmem:[#allocation43_spill] sm:$0xff]  ;;  %3926 = vmatprep.subr.mxu0 %v4393_v63  ;;  %3939 = vmatprep.subr.mxu1 %v4393_v63  ;;  %vm2681_vm1 = vcmask 392192   ;;  %s1881_s6 = sadd.s32 1, %s4401_s6   ;;  %v4373_v49 = vphi %v1660_v49, %v5744_v49   ;;  %v4369_v16 = vphi %v1665_v16, %v5750_v16   ;;  %s4401_s6 = sphi %s5483_s6, %s1881_s6   ;;  %v4397_v62 = vphi %v4885_v62, %v6394_v62   ;;  %v4393_v63 = vphi %v4887_v63, %v6393_v63   ;;  %v4389_v46 = vphi %v1640_v46, %v5706_v46   ;;  %v4385_v33 = vphi %v1645_v33, %v5717_v33   ;;  %v4381_v47 = vphi %v1650_v47, %v5724_v47   ;;  %v4377_v61 = vphi %v1655_v61, %v5733_v61  }
 0x32c   : >> { %v6277_v40 = vld [vmem:[#allocation38_spill] sm:$0xff]  ;;  %v6279_v38 = vld [vmem:[#allocation44_spill] sm:$0xff]  ;;  %v6280_v37 = vld [vmem:[#allocation37_spill] sm:$0xff]  ;;  %3927 = vmatpush3.msra.mxu0 %v4393_v63  ;;  %3940 = vmatpush3.msra.mxu1 %v4393_v63  ;;  %p1878_p4 = scmp.ge.s32.totalorder %s1881_s6, 15  }
 0x32d   : >> { %v6281_v36 = vld [vmem:[#allocation36_spill] sm:$0xff]  ;;  %v6282_v35 = vld [vmem:[#allocation35_spill] sm:$0xff]  ;;  %v6283_v14 = vld [vmem:[#allocation10_spill] sm:$0xff]  ;;  %3928 = vmatprep.subr.mxu0 %v4397_v62  ;;  %3941 = vmatprep.subr.mxu1 %v4397_v62 }
 0x32e   : >> { %v6284_v12 = vld [vmem:[#allocation9_spill] sm:$0xff]  ;;  %v6285_v10 = vld [vmem:[#allocation8_spill] sm:$0xff]  ;;  %v6286_v8 = vld [vmem:[#allocation7_spill] sm:$0xff]  ;;  %3929 = vmatpush3.msra.mxu0 %v4397_v62  ;;  %3942 = vmatpush3.msra.mxu1 %v4397_v62 }
 0x32f   : >> { %v6287_v6 = vld [vmem:[#allocation6_spill] sm:$0xff]  ;;  %v6288_v4 = vld [vmem:[#allocation4_spill] sm:$0xff]  ;;  %v6290_v29 = vld [vmem:[#allocation41_spill] sm:$0xff]  ;;  %3952 = vmatprep.subr.mxu1 %v5130_v43 }
 0x330   : >> { %v6289_v30 = vld [vmem:[#allocation42_spill] sm:$0xff]  ;;  %v6291_v5 = vld [vmem:[#allocation5_spill] sm:$0xff]  ;;  %v6292_v22 = vld [vmem:[#allocation39_spill] sm:$0xff]  ;;  %3930 = vmatprep.mubr.msk.f32.mxu0 %vm802_vm0, %v6288_v4 }
 0x331   : >> { %v6293_v19 = vld [vmem:[#allocation40_spill] sm:$0xff]  ;;  %3943 = vmatprep.mubr.msk.f32.mxu1 %vm802_vm0, %v6291_v5  ;;  %3931 = vmatmul.mubr.msk.f32.vlgmr.msra.gmra.mxu0 %vm802_vm0, %v6287_v6  ;;  %v6295_v32 = vld [vmem:[#allocation31_spill] sm:$0xff]  ;;  %v6296_v31 = vld [vmem:[#allocation30_spill] sm:$0xff] }
 0x332   : >> { %v6294_v2 = vld [vmem:[#allocation112_spill] sm:$0xff]  ;;  %3944 = vmatmul.mubr.msk.f32.vlgmr.msra.gmra.mxu1 %vm802_vm0, %v4583_v7  ;;  %3933 = vmatprep.mubr.msk.f32.mxu0 %vm802_vm0, %v6286_v8  ;;  %v6297_v28 = vld [vmem:[#allocation29_spill] sm:$0xff]  ;;  %v6299_v26 = vld [vmem:[#allocation27_spill] sm:$0xff] }
 0x333   : >> { %3946 = vmatprep.mubr.msk.f32.mxu1 %vm802_vm0, %v4595_v9  ;;  %3540 = vmatprep.subr.mxu0 %v6295_v32  ;;  %v6298_v27 = vld [vmem:[#allocation28_spill] sm:$0xff]  ;;  %v6300_v25 = vld [vmem:[#allocation26_spill] sm:$0xff]  ;;  %v6301_v24 = vld [vmem:[#allocation25_spill] sm:$0xff] }
 0x334   : >> { %3953 = vmatpush3.msra.mxu1 %v5130_v43  ;;  %3541 = vmatpush3.msra.mxu0 %v4970_v60  ;;  %v6302_v23 = vld [vmem:[#allocation24_spill] sm:$0xff]  ;;  %v6303_v21 = vld [vmem:[#allocation23_spill] sm:$0xff]  ;;  %v6304_v20 = vld [vmem:[#allocation22_spill] sm:$0xff] }
 0x335   : >> { %3934 = vmatmul.mubr.msk.f32.gmra.mxu0 %vm802_vm0, %v6285_v10  ;;  %3954 = vmatprep.subr.mxu1 %v6275_v42  ;;  %v6305_v18 = vld [vmem:[#allocation21_spill] sm:$0xff]  ;;  %v6306_v17 = vld [vmem:[#allocation20_spill] sm:$0xff]  ;;  %v6307_v1 = vld [vmem:[#allocation15_spill] sm:$0xff] }
 0x336   : >> { %3947 = vmatmul.mubr.msk.f32.gmra.mxu1 %vm802_vm0, %v4615_v11  ;;  %3936 = vmatprep.mubr.msk.f32.mxu0 %vm802_vm0, %v6284_v12  ;;  %v6308_v44 = vld [vmem:[#allocation19_spill] sm:$0xff]  ;;  %v6309_v45 = vld [vmem:[#allocation34_spill] sm:$0xff]  ;;  %v6312_v34 = vld [vmem:[#allocation33_spill] sm:$0xff] }
 0x337   : >> { %3949 = vmatprep.mubr.msk.f32.mxu1 %vm802_vm0, %v4625_v13  ;;  %3542 = vmatprep.subr.mxu0 %v6296_v31  ;;  %v6310_v0 = vld [vmem:[#allocation14_spill] sm:$0xff]  ;;  %v6313_v48 = vld [vmem:[#allocation13_spill] sm:$0xff]  ;;  %v3073_v43 = vld [vmem:[%s6024_s22 + $0x8] sm:$0xff] (%p1878_p4) }
 0x338   : >> { %3955 = vmatpush3.msra.mxu1 %v6275_v42  ;;  %3543 = vmatpush3.msra.mxu0 %v4965_v59  ;;  %v6311_v3 = vld [vmem:[#allocation18_spill] sm:$0xff]  ;;  %v3178_v59 = vld [vmem:[%s6026_s24 + $0x30] sm:$0xff] (%p1878_p4)  ;;  %v3075_v60 = vld [vmem:[%s6024_s22 + $0x18] sm:$0xff] (%p1878_p4) }
 0x339   : >> { %3937 = vmatmul.mubr.msk.f32.gmra.mxu0 %vm802_vm0, %v6283_v14  ;;  %3956 = vmatprep.subr.mxu1 %v6276_v41 }
 0x33a   : >> { %3950 = vmatmul.mubr.msk.f32.gmra.mxu1 %vm802_vm0, %v4643_v15  ;;  %3544 = vmatprep.subr.mxu0 %v6297_v28 }
 0x33b   : >> { %3957 = vmatpush3.msra.mxu1 %v6276_v41  ;;  %3545 = vmatpush3.msra.mxu0 %v4960_v58  ;;  %v3076_v58 = vld [vmem:[%s6024_s22 + $0x20] sm:$0xff] (%p1878_p4) }
 0x33c   : >> { %3958 = vmatprep.subr.mxu1 %v6279_v38  ;;  %3546 = vmatprep.subr.mxu0 %v6298_v27 }
 0x33d   : >> { %3959 = vmatpush3.msra.mxu1 %v6279_v38  ;;  %3547 = vmatpush3.msra.mxu0 %v4955_v57  ;;  %v3179_v57 = vld [vmem:[%s6026_s24 + $0x38] sm:$0xff] (%p1878_p4) }
 0x33e   : >> { %3960 = vmatprep.subr.mxu1 %v6278_v39  ;;  %3548 = vmatprep.subr.mxu0 %v6299_v26 }
 0x33f   : >> { %3961 = vmatpush3.msra.mxu1 %v6278_v39  ;;  %3549 = vmatpush3.msra.mxu0 %v4950_v56  ;;  %v3077_v56 = vld [vmem:[%s6024_s22 + $0x28] sm:$0xff] (%p1878_p4) }
 0x340   : >> { %3962 = vmatprep.subr.mxu1 %v6289_v30  ;;  %3550 = vmatprep.subr.mxu0 %v6300_v25 }
 0x341   : >> { %3963 = vmatpush3.msra.mxu1 %v6289_v30  ;;  %3551 = vmatpush3.msra.mxu0 %v4945_v55  ;;  %v3180_v55 = vld [vmem:[%s6026_s24 + $0x40] sm:$0xff] (%p1878_p4) }
 0x342   : >> { %3964 = vmatprep.subr.mxu1 %v6290_v29  ;;  %3552 = vmatprep.subr.mxu0 %v6301_v24 }
 0x343   : >> { %3965 = vmatpush3.msra.mxu1 %v6290_v29  ;;  %3553 = vmatpush3.msra.mxu0 %v4940_v54  ;;  %v3078_v54 = vld [vmem:[%s6024_s22 + $0x30] sm:$0xff] (%p1878_p4) }
 0x344   : >> { %3966 = vmatprep.subr.mxu1 %v6293_v19  ;;  %3554 = vmatprep.subr.mxu0 %v6302_v23  ;;  %v6337_v23 = vld [vmem:[#allocation93_spill] sm:$0xff] }
 0x345   : >> { %3967 = vmatpush3.msra.mxu1 %v6293_v19  ;;  %3555 = vmatpush3.msra.mxu0 %v4935_v53  ;;  %v6335_v19 = vld [vmem:[#allocation95_spill] sm:$0xff] }
 0x346   : >> { %3968 = vmatprep.subr.mxu1 %v6292_v22  ;;  %3556 = vmatprep.subr.mxu0 %v6303_v21  ;;  %v6336_v21 = vld [vmem:[#allocation94_spill] sm:$0xff]  ;;  %v3181_v53 = vld [vmem:[%s6026_s24 + $0x48] sm:$0xff] (%p1878_p4) }
 0x347   : >> { %3969 = vmatpush3.msra.mxu1 %v6292_v22  ;;  %3557 = vmatpush3.msra.mxu0 %v4930_v52  ;;  %v3079_v52 = vld [vmem:[%s6024_s22 + $0x38] sm:$0xff] (%p1878_p4) }
 0x348   : >> { %3970 = vmatprep.subr.mxu1 %v6277_v40  ;;  %3558 = vmatprep.subr.mxu0 %v6304_v20 }
 0x349   : >> { %3971 = vmatpush3.msra.mxu1 %v6277_v40  ;;  %3559 = vmatpush3.msra.mxu0 %v4925_v51  ;;  %v3182_v51 = vld [vmem:[%s6026_s24 + $0x50] sm:$0xff] (%p1878_p4) }
 0x34a   : >> { %3972 = vmatprep.subr.mxu1 %v6280_v37  ;;  %3560 = vmatprep.subr.mxu0 %v6305_v18  ;;  %v6316_v18 = vld [vmem:[#allocation12_spill] sm:$0xff] }
 0x34b   : >> { %3973 = vmatpush3.msra.mxu1 %v6280_v37  ;;  %3984 = vmatprep.mubr.f32.mxu1 %v4389_v46 }
 0x34c   : >> { %3974 = vmatprep.subr.mxu1 %v6281_v36  ;;  %3561 = vmatpush3.msra.mxu0 %v4920_v50  ;;  %v3080_v50 = vld [vmem:[%s6024_s22 + $0x40] sm:$0xff] (%p1878_p4) }
 0x34d   : >> { %3975 = vmatpush3.msra.mxu1 %v6281_v36  ;;  %3562 = vmatprep.subr.mxu0 %v6306_v17  ;;  %v6314_v17 = vld [vmem:[#allocation17_spill] sm:$0xff] }
 0x34e   : >> { %3976 = vmatprep.subr.mxu1 %v6282_v35  ;;  %3563 = vmatpush3.msra.mxu0 %v6307_v1  ;;  %v6315_v1 = vld [vmem:[#allocation32_spill] sm:$0xff] }
 0x34f   : >> { %3977 = vmatpush3.msra.mxu1 %v6282_v35  ;;  %3564 = vmatprep.subr.mxu0 %v6308_v44  ;;  %v6317_v44 = vld [vmem:[#allocation16_spill] sm:$0xff] }
 0x350   : >> { %3978 = vmatprep.subr.mxu1 %v6309_v45  ;;  %3565 = vmatpush3.msra.mxu0 %v6310_v0  ;;  %v6318_v0 = vld [vmem:[#allocation11_spill] sm:$0xff] }
 0x351   : >> { %3979 = vmatpush3.msra.mxu1 %v6309_v45  ;;  %3566 = vmatprep.subr.mxu0 %v6311_v3  ;;  %v6319_v3 = vld [vmem:[#allocation111_spill] sm:$0xff]  ;;  %v3072_v45 = vld [vmem:[%s6024_s22] sm:$0xff] (%p1878_p4) }
 0x352   : >> { %3980 = vmatprep.subr.mxu1 %v6312_v34  ;;  %3567 = vmatpush3.msra.mxu0 %v6313_v48  ;;  %v6320_v48 = vld [vmem:[#allocation96_spill] sm:$0xff] }
 0x353   : >> { %3981 = vmatpush3.msra.mxu1 %v6312_v34  ;;  %3568 = vmatprep.subr.mxu0 %v6314_v17  ;;  %v6321_v17 = vld [vmem:[#allocation110_spill] sm:$0xff] }
 0x354   : >> { %3982 = vmatprep.subr.mxu1 %v6315_v1  ;;  %3569 = vmatpush3.msra.mxu0 %v6316_v18  ;;  %v6322_v18 = vld [vmem:[#allocation109_spill] sm:$0xff] }
 0x355   : >> { %3983 = vmatpush3.msra.mxu1 %v6315_v1  ;;  %3570 = vmatprep.subr.mxu0 %v6317_v44  ;;  %v6323_v44 = vld [vmem:[#allocation108_spill] sm:$0xff]  ;;  %v6324_v1 = vld [vmem:[#allocation107_spill] sm:$0xff] }
 0x356   : >> { %4028 = vmatprep.subr.mxu1 %v6294_v2  ;;  %3985 = vmatmul.mubr.f32.vlgmr.msra.gmra.mxu1 %v4385_v33 }
 0x357   : >> { %4029 = vmatpush3.msra.mxu1 %v6294_v2  ;;  %3571 = vmatpush3.msra.mxu0 %v6318_v0  ;;  %v6325_v0 = vld [vmem:[#allocation106_spill] sm:$0xff]  ;;  %v6326_v2 = vld [vmem:[#allocation105_spill] sm:$0xff] }
 0x358   : >> { %4030 = vmatprep.subr.mxu1 %v6319_v3  ;;  %3993 = vmatprep.subr.mxu0 %v6320_v48 }
 0x359   : >> { %4031 = vmatpush3.msra.mxu1 %v6319_v3  ;;  %v6327_v3 = vld [vmem:[#allocation104_spill] sm:$0xff]  ;;  %3987 = vmatprep.mubr.f32.mxu1 %v4381_v47 }
 0x35a   : >> { %4032 = vmatprep.subr.mxu1 %v6321_v17  ;;  %3988 = vmatmul.mubr.f32.gmra.mxu1 %v4377_v61 }
 0x35b   : >> { %4033 = vmatpush3.msra.mxu1 %v6321_v17  ;;  %v6328_v17 = vld [vmem:[#allocation103_spill] sm:$0xff]  ;;  %3990 = vmatprep.mubr.f32.mxu1 %v4373_v49 }
 0x35c   : >> { %4034 = vmatprep.subr.mxu1 %v6322_v18 }
 0x35d   : >> { %4035 = vmatpush3.msra.mxu1 %v6322_v18  ;;  %v6329_v18 = vld [vmem:[#allocation102_spill] sm:$0xff] }
 0x35e   : >> { %4036 = vmatprep.subr.mxu1 %v6323_v44  ;;  %3991 = vmatmul.mubr.f32.gmra.mxu1 %v4369_v16 }
 0x35f   : >> { %4037 = vmatpush3.msra.mxu1 %v6323_v44  ;;  %4060 = vmatprep.mubr.f32.mxu1 %v4397_v62  ;;  %v3174_v44 = vld [vmem:[%s6026_s24 + $0x10] sm:$0xff] (%p1878_p4) }
 0x360   : >> { %4038 = vmatprep.subr.mxu1 %v6324_v1 }
 0x361   : >> { %4039 = vmatpush3.msra.mxu1 %v6324_v1  ;;  %v6330_v1 = vld [vmem:[#allocation101_spill] sm:$0xff] }
 0x362   : >> { %4040 = vmatprep.subr.mxu1 %v6325_v0 }
 0x363   : >> { %4041 = vmatpush3.msra.mxu1 %v6325_v0  ;;  %v6331_v0 = vld [vmem:[#allocation100_spill] sm:$0xff] }
 0x364   : >> { %4042 = vmatprep.subr.mxu1 %v6326_v2 }
 0x365   : >> { %4043 = vmatpush3.msra.mxu1 %v6326_v2  ;;  %v6332_v2 = vld [vmem:[#allocation99_spill] sm:$0xff] }
 0x366   : >> { %4044 = vmatprep.subr.mxu1 %v6327_v3 }
 0x367   : >> { %4045 = vmatpush3.msra.mxu1 %v6327_v3  ;;  %v6333_v3 = vld [vmem:[#allocation98_spill] sm:$0xff] }
 0x368   : >> { %4046 = vmatprep.subr.mxu1 %v6328_v17 }
 0x369   : >> { %4047 = vmatpush3.msra.mxu1 %v6328_v17  ;;  %v6334_v17 = vld [vmem:[#allocation97_spill] sm:$0xff] }
 0x36a   : >> { %4048 = vmatprep.subr.mxu1 %v6329_v18 }
 0x36b   : >> { %4049 = vmatpush3.msra.mxu1 %v6329_v18 }
 0x36c   : >> { %4050 = vmatprep.subr.mxu1 %v6330_v1 }
 0x36d   : >> { %4051 = vmatpush3.msra.mxu1 %v6330_v1 }
 0x36e   : >> { %4052 = vmatprep.subr.mxu1 %v6331_v0 }
 0x36f   : >> { %4053 = vmatpush3.msra.mxu1 %v6331_v0 }
 0x370   : >> { %4054 = vmatprep.subr.mxu1 %v6332_v2 }
 0x371   : >> { %4055 = vmatpush3.msra.mxu1 %v6332_v2 }
 0x372   : >> { %4056 = vmatprep.subr.mxu1 %v6333_v3 }
 0x373   : >> { %4057 = vmatpush3.msra.mxu1 %v6333_v3 }
 0x374   : >> { %4058 = vmatprep.subr.mxu1 %v6334_v17 }
 0x375   : >> { %4059 = vmatpush3.msra.mxu1 %v6334_v17 }
 0x376   : >> { %4061 = vmatmul.mubr.f32.vlgmr.msra.gmra.mxu1 %v4393_v63 }
 0x377   : >> { %4108 = vmatprep.mubr.msk.f32.mxu1 %vm802_vm0, %v6291_v5 }
 0x3f1   : >> { %v3932_v0 = vpop.f32.mrf.mxu0 }
 0x3f2   : >> { %v3945_v1 = vpop.f32.mrf.mxu1 }
 0x3f3   : >> { %v1956_v2 = vpop.f32.mrf.mxu0 }
 0x3f4   : >> { %v2051_v3 = vpop.f32.mrf.mxu1 }
 0x3f5   : >> { %2150 = vmatprep.mubr.f32.mxu0 %v2051_v3  ;;  %v3935_v18 = vpop.f32.mrf.mxu0  ;;  %v6338_v3 = vld [vmem:[#allocation92_spill] sm:$0xff] }
 0x3f6   : >> { %2151 = vmatmul.mubr.f32.vlgmr.msra.gmra.mxu0 %v1956_v2  ;;  %v3948_v17 = vpop.f32.mrf.mxu1 }
 0x3f7   : >> { %3994 = vmatpush3.msra.mxu0 %v6320_v48  ;;  %2155 = vmatprep.mubr.f32.mxu0 %v3945_v1  ;;  %v1966_v22 = vpop.f32.mrf.mxu0  ;;  %v3175_v48 = vld [vmem:[%s6026_s24 + $0x18] sm:$0xff] (%p1878_p4) }
 0x3f8   : >> { %3995 = vmatprep.subr.mxu0 %v6335_v19  ;;  %v2061_v20 = vpop.f32.mrf.mxu1 }
 0x3f9   : >> { %3996 = vmatpush3.msra.mxu0 %v6335_v19  ;;  %v3938_v1 = vpop.f32.mrf.mxu0  ;;  %v6339_v19 = vld [vmem:[#allocation91_spill] sm:$0xff] }
 0x3fa   : >> { %3997 = vmatprep.subr.mxu0 %v6336_v21  ;;  %2156 = vmatmul.mubr.f32.gmra.mxu0 %v3932_v0  ;;  %v3951_v2 = vpop.f32.mrf.mxu1  ;;  %v6340_v0 = vld [vmem:[#allocation90_spill] sm:$0xff] }
 0x3fb   : >> { %3998 = vmatpush3.msra.mxu0 %v6336_v21  ;;  %2160 = vmatprep.mubr.f32.mxu0 %v2061_v20  ;;  %v1976_v20 = vpop.f32.mrf.mxu0  ;;  %v6341_v21 = vld [vmem:[#allocation89_spill] sm:$0xff] }
 0x3fc   : >> { %3999 = vmatprep.subr.mxu0 %v6337_v23  ;;  %v2071_v24 = vpop.f32.mrf.mxu1 }
 0x3fd   : >> { %4000 = vmatpush3.msra.mxu0 %v6337_v23 }
 0x3fe   : >> { %4001 = vmatprep.subr.mxu0 %v6338_v3  ;;  %2161 = vmatmul.mubr.f32.gmra.mxu0 %v1966_v22  ;;  %v6342_v22 = vld [vmem:[#allocation88_spill] sm:$0xff] }
 0x3ff   : >> { %4002 = vmatpush3.msra.mxu0 %v6338_v3  ;;  %2165 = vmatprep.mubr.f32.mxu0 %v3948_v17  ;;  %v6343_v17 = vld [vmem:[#allocation87_spill] sm:$0xff]  ;;  %v6344_v3 = vld [vmem:[#allocation86_spill] sm:$0xff] }
 0x400   : >> { %4003 = vmatprep.subr.mxu0 %v6339_v19 }
 0x401   : >> { %4004 = vmatpush3.msra.mxu0 %v6339_v19 }
 0x402   : >> { %4005 = vmatprep.subr.mxu0 %v6340_v0  ;;  %2166 = vmatmul.mubr.f32.gmra.mxu0 %v3935_v18  ;;  %v6346_v18 = vld [vmem:[#allocation84_spill] sm:$0xff] }
 0x403   : >> { %4006 = vmatpush3.msra.mxu0 %v6340_v0  ;;  %2170 = vmatprep.mubr.f32.mxu0 %v2071_v24  ;;  %v6345_v24 = vld [vmem:[#allocation85_spill] sm:$0xff] }
 0x404   : >> { %4007 = vmatprep.subr.mxu0 %v6341_v21 }
 0x405   : >> { %4008 = vmatpush3.msra.mxu0 %v6341_v21 }
 0x406   : >> { %4009 = vmatprep.subr.mxu0 %v6342_v22  ;;  %2171 = vmatmul.mubr.f32.gmra.mxu0 %v1976_v20  ;;  %v6348_v20 = vld [vmem:[#allocation82_spill] sm:$0xff] }
 0x407   : >> { %4010 = vmatpush3.msra.mxu0 %v6342_v22  ;;  %2175 = vmatprep.mubr.f32.mxu0 %v3951_v2  ;;  %v6347_v2 = vld [vmem:[#allocation83_spill] sm:$0xff] }
 0x408   : >> { %4011 = vmatprep.subr.mxu0 %v6343_v17 }
 0x409   : >> { %4012 = vmatpush3.msra.mxu0 %v6343_v17 }
 0x40a   : >> { %4013 = vmatprep.subr.mxu0 %v6344_v3  ;;  %2176 = vmatmul.mubr.f32.gmra.mxu0 %v3938_v1  ;;  %v6349_v1 = vld [vmem:[#allocation81_spill] sm:$0xff] }
 0x40b   : >> { %4014 = vmatpush3.msra.mxu0 %v6344_v3  ;;  %4025 = vmatprep.mubr.f32.mxu0 %v4397_v62 }
 0x40c   : >> { %4015 = vmatprep.subr.mxu0 %v6345_v24 }
 0x40d   : >> { %4016 = vmatpush3.msra.mxu0 %v6345_v24 }
 0x40e   : >> { %4017 = vmatprep.subr.mxu0 %v6346_v18 }
 0x40f   : >> { %4018 = vmatpush3.msra.mxu0 %v6346_v18 }
 0x410   : >> { %4019 = vmatprep.subr.mxu0 %v6347_v2 }
 0x411   : >> { %4020 = vmatpush3.msra.mxu0 %v6347_v2 }
 0x412   : >> { %4021 = vmatprep.subr.mxu0 %v6348_v20 }
 0x413   : >> { %4022 = vmatpush3.msra.mxu0 %v6348_v20  ;;  %v6350_v20 = vld [vmem:[#allocation47_spill] sm:$0xff] }
 0x414   : >> { %4023 = vmatprep.subr.mxu0 %v6349_v1 }
 0x415   : >> { %4024 = vmatpush3.msra.mxu0 %v6349_v1 }
 0x416   : >> { %4026 = vmatmul.mubr.f32.vlgmr.msra.gmra.mxu0 %v4393_v63  ;;  %v3986_v0 = vpop.f32.mrf.mxu1 }
 0x417   : >> { %4067 = vmatprep.mubr.msk.f32.mxu0 %vm802_vm0, %v6291_v5 }
 0x418   : >> { %v2247_v3 = vpop.f32.mrf.mxu1 }
 0x41a   : >> { %v3989_v17 = vpop.f32.mrf.mxu1 }
 0x41c   : >> { %v2257_v18 = vpop.f32.mrf.mxu1 }
 0x41e   : >> { %v3992_v19 = vpop.f32.mrf.mxu1 }
 0x420   : >> { %v2267_v21 = vpop.f32.mrf.mxu1 }
 0x436   : >> { %v4062_v2 = vpop.f32.mrf.mxu1 }
 0x437   : >> { %4063 = vmatprep.subr.mxu0 %v4062_v2 }
 0x438   : >> { %v2429_v22 = vpop.f32.mrf.mxu1  ;;  %4064 = vmatpush3.msra.mxu0 %v4062_v2 }
 0x439   : >> { %4065 = vmatprep.subr.mxu0 %v2429_v22 }
 0x43a   : >> { %4066 = vmatpush3.msra.mxu0 %v2429_v22 }
 0x43b   : >> { %4068 = vmatmul.mubr.msk.f32.vlgmr.msra.gmra.mxu0 %vm802_vm0, %v4583_v7 }
 0x43c   : >> { %4070 = vmatprep.mubr.msk.f32.mxu0 %vm802_vm0, %v4595_v9 }
 0x43f   : >> { %4071 = vmatmul.mubr.msk.f32.gmra.mxu0 %vm802_vm0, %v4615_v11 }
 0x440   : >> { %4073 = vmatprep.mubr.msk.f32.mxu0 %vm802_vm0, %v4625_v13 }
 0x443   : >> { %4074 = vmatmul.mubr.msk.f32.gmra.mxu0 %vm802_vm0, %v4643_v15 }
 0x444   : >> { %4080 = vmatprep.mubr.msk.f32.mxu0 %vm802_vm0, %v6288_v4 }
 0x4b6   : >> { %v3572_v2 = vpop.f32.mrf.mxu0 }
 0x4b8   : >> { %v3573_v22 = vpop.f32.mrf.mxu0 }
 0x4b9   : >> { %v3574_v1 = vadd.f32 %v3573_v22, %v3572_v2 }
 0x4ba   : >> { %v3575_v5 = vpop.f32.mrf.mxu0 }
 0x4bb   : >> { %v2153_v23 = vadd.f32 %v3574_v1, %v6350_v20 }
 0x4bc   : >> { %v3576_v24 = vpop.f32.mrf.mxu0 }
 0x4bd   : >> { %v3577_v25 = vadd.f32 %v3576_v24, %v3575_v5  ;;  %v5699_v26 = vadd.f32 %v2247_v3, %v2153_v23 }
 0x4be   : >> { %v3578_v27 = vpop.f32.mrf.mxu0 }
 0x4bf   : >> { %v2158_v28 = vadd.f32 %v3577_v25, %v6350_v20  ;;  %v6112_v29 = vmax.f32 %v5699_v26, 0.0 }
 0x4c0   : >> { %v3579_v30 = vpop.f32.mrf.mxu0 }
 0x4c1   : >> { %v3580_v31 = vadd.f32 %v3579_v30, %v3578_v27  ;;  %v5706_v46 = vadd.f32 %v4389_v46, %v6112_v29   ;;  %v5708_v2 = vadd.f32 %v3986_v0, %v2158_v28 }
 0x4c2   : >> { %v3581_v22 = vpop.f32.mrf.mxu0  ;;  %v3184_v46 = vld [vmem:[%s6026_s24 + $0x60] sm:$0xff] (%p1878_p4) }
 0x4c3   : >> { %v2163_v1 = vadd.f32 %v3580_v31, %v6350_v20  ;;  %v6113_v5 = vmax.f32 %v5708_v2, 0.0 }
 0x4c4   : >> { %v3582_v23 = vpop.f32.mrf.mxu0 }
 0x4c5   : >> { %v5712_v3 = vadd.f32 %v2257_v18, %v2163_v1  ;;  %v3583_v25 = vadd.f32 %v3582_v23, %v3581_v22  ;;  %v5717_v33 = vadd.f32 %v4385_v33, %v6113_v5  }
 0x4c6   : >> { %v3584_v27 = vpop.f32.mrf.mxu0  ;;  %v3176_v33 = vld [vmem:[%s6026_s24 + $0x20] sm:$0xff] (%p1878_p4) }
 0x4c7   : >> { %v6114_v30 = vmax.f32 %v5712_v3, 0.0  ;;  %v2168_v28 = vadd.f32 %v3583_v25, %v6350_v20 }
 0x4c8   : >> { %v3585_v0 = vpop.f32.mrf.mxu0 }
 0x4c9   : >> { %v5724_v47 = vadd.f32 %v4381_v47, %v6114_v30   ;;  %v3586_v31 = vadd.f32 %v3585_v0, %v3584_v27  ;;  %v5726_v24 = vadd.f32 %v3989_v17, %v2168_v28 }
 0x4ca   : >> { %v3587_v18 = vpop.f32.mrf.mxu0  ;;  %v3081_v47 = vld [vmem:[%s6024_s22 + $0x48] sm:$0xff] (%p1878_p4) }
 0x4cb   : >> { %v2173_v22 = vadd.f32 %v3586_v31, %v6350_v20  ;;  %v6115_v1 = vmax.f32 %v5726_v24, 0.0 }
 0x4cc   : >> { %v3588_v23 = vpop.f32.mrf.mxu0 }
 0x4cd   : >> { %v3589_v29 = vadd.f32 %v3588_v23, %v3587_v18  ;;  %v5733_v61 = vadd.f32 %v4377_v61, %v6115_v1   ;;  %v5735_v25 = vadd.f32 %v2267_v21, %v2173_v22 }
 0x4ce   : > { %v3177_v61 = vld [vmem:[%s6026_s24 + $0x28] sm:$0xff] (%p1878_p4) }
 0x4cf   : >> { %v2178_v5 = vadd.f32 %v3589_v29, %v6350_v20  ;;  %v6116_v27 = vmax.f32 %v5735_v25, 0.0 }
 0x4d1   : >> { %v5739_v17 = vadd.f32 %v3992_v19, %v2178_v5  ;;  %v5744_v49 = vadd.f32 %v4373_v49, %v6116_v27   ;;  %v6351_v19 = vld [vmem:[#allocation2_spill] sm:$0xff] }
 0x4d2   : > { %v3183_v49 = vld [vmem:[%s6026_s24 + $0x58] sm:$0xff] (%p1878_p4) }
 0x4d3   : >> { %v6117_v28 = vmax.f32 %v5739_v17, 0.0 }
 0x4d5   : >> { %v5750_v16 = vadd.f32 %v4369_v16, %v6117_v28  }
 0x4d6   : >> { %v4027_v21 = vpop.f32.mrf.mxu0  ;;  %v3074_v16 = vld [vmem:[%s6024_s22 + $0x10] sm:$0xff] (%p1878_p4) }
 0x4d7   : >> { %4076 = vmatprep.subr.mxu0 %v4027_v21 }
 0x4d8   : >> { %v2354_v0 = vpop.f32.mrf.mxu0  ;;  %4077 = vmatpush3.msra.mxu0 %v4027_v21 }
 0x4d9   : >> { %4078 = vmatprep.subr.mxu0 %v2354_v0 }
 0x4da   : >> { %4079 = vmatpush3.msra.mxu0 %v2354_v0 }
 0x4db   : >> { %4081 = vmatmul.mubr.msk.f32.vlgmr.msra.gmra.mxu0 %vm802_vm0, %v6287_v6 }
 0x4dc   : >> { %4083 = vmatprep.mubr.msk.f32.mxu0 %vm802_vm0, %v6286_v8 }
 0x4df   : >> { %4084 = vmatmul.mubr.msk.f32.gmra.mxu0 %vm802_vm0, %v6285_v10 }
 0x4e0   : >> { %4086 = vmatprep.mubr.msk.f32.mxu0 %vm802_vm0, %v6284_v12 }
 0x4e3   : >> { %4087 = vmatmul.mubr.msk.f32.gmra.mxu0 %vm802_vm0, %v6283_v14 }
 0x4e4   : >> { %4101 = vmatprep.mubr.msk.f32.mxu0 %vm2681_vm1, %v6351_v19 }
 0x4fb   : >> { %v4069_v29 = vpop.f32.mrf.mxu0 }
 0x4fd   : >> { %v2504_v5 = vpop.f32.mrf.mxu0 }
 0x4ff   : >> { %v4072_v31 = vpop.f32.mrf.mxu0 }
 0x501   : >> { %v2514_v18 = vpop.f32.mrf.mxu0 }
 0x503   : >> { %v4075_v22 = vpop.f32.mrf.mxu0 }
 0x505   : >> { %v2524_v23 = vpop.f32.mrf.mxu0 }
 0x59b   : >> { %v4082_v21 = vpop.f32.mrf.mxu0 }
 0x59c   : >> { %v2605_v30 = vadd.f32 %v4082_v21, %v4069_v29 }
 0x59d   : >> { %v2599_v0 = vpop.f32.mrf.mxu0 }
 0x59e   : >> { %v2600_v1 = vadd.f32 %v2599_v0, %v2504_v5  ;;  %v2635_v8 = vmul.f32 0.2, %v2605_v30  ;;  %vm2629_vm4 = vcmp.gt.f32.partialorder %v2605_v30, 0.0 }
 0x59f   : >> { %v4085_v27 = vpop.f32.mrf.mxu0 }
 0x5a0   : >> { %v2615_v4 = vadd.f32 %v4085_v27, %v4072_v31  ;;  %v2634_v10 = vmul.f32 0.2, %v2600_v1  ;;  %vm2628_vm5 = vcmp.gt.f32.partialorder %v2600_v1, 0.0  ;;  %v2641_v37 = vsel %vm2629_vm4, %v2605_v30, %v2635_v8 }
 0x5a1   : >> { %v2609_v28 = vpop.f32.mrf.mxu0  ;;  %v2647_v0 = vsel %vm1297_vm6, %v2641_v37, -inf }
 0x5a2   : >> { %v2610_v6 = vadd.f32 %v2609_v28, %v2514_v18  ;;  %v2637_v34 = vmul.f32 0.2, %v2615_v4  ;;  %v2640_v29 = vsel %vm2628_vm5, %v2600_v1, %v2634_v10  ;;  %vm2631_vm9 = vcmp.gt.f32.partialorder %v2615_v4, 0.0 }
 0x5a3   : >> { %v4088_v12 = vpop.f32.mrf.mxu0 }
 0x5a4   : >> { %v2636_v14 = vmul.f32 0.2, %v2610_v6  ;;  %v2625_v20 = vadd.f32 %v4088_v12, %v4075_v22  ;;  %vm2630_vm7 = vcmp.gt.f32.partialorder %v2610_v6, 0.0  ;;  %v2643_v31 = vsel %vm2631_vm9, %v2615_v4, %v2637_v34 }
 0x5a5   : >> { %v2619_v32 = vpop.f32.mrf.mxu0  ;;  %v2646_v12 = vsel %vm1297_vm6, %v2640_v29, -inf  ;;  %v2649_v10 = vsel %vm1297_vm6, %v2643_v31, -inf }
 0x5a6   : >> { %vm2633_vm8 = vcmp.gt.f32.partialorder %v2625_v20, 0.0  ;;  %v2639_v35 = vmul.f32 0.2, %v2625_v20  ;;  %v2620_v36 = vadd.f32 %v2619_v32, %v2524_v23  ;;  %v2642_v5 = vsel %vm2630_vm7, %v2610_v6, %v2636_v14 }
 0x5a7   : >> { %v2648_v22 = vsel %vm1297_vm6, %v2642_v5, -inf }
 0x5a8   : >> { %v2645_v21 = vsel %vm2633_vm8, %v2625_v20, %v2639_v35  ;;  %vm2632_vm10 = vcmp.gt.f32.partialorder %v2620_v36, 0.0  ;;  %v2638_v27 = vmul.f32 0.2, %v2620_v36  ;;  %v2655_v6 = vmax.f32 %v2648_v22, %v2649_v10  ;;  %v6355_v10 = vld [vmem:[#allocation78_spill] sm:$0xff] }
 0x5a9   : >> { %v2652_v28 = vsel %vm1297_vm6, %v2645_v21, -inf }
 0x5aa   : >> { %v2644_v18 = vsel %vm2632_vm10, %v2620_v36, %v2638_v27  ;;  %v2653_v32 = vmax.f32 %v2647_v0, %v2652_v28 }
 0x5ab   : >> { %v2650_v38 = vsel %vm1297_vm6, %v2644_v18, -inf }
 0x5ac   : >> { %v2651_v8 = vmax.f32 %v2646_v12, %v2650_v38 }
 0x5ae   : >> { %v2654_v14 = vmax.f32 %v2651_v8, %v2653_v32 }
 0x5b0   : >> { %v2656_v35 = vmax.f32 %v2654_v14, %v2655_v6  ;;  %v6356_v6 = vld [vmem:[#allocation62_spill] sm:$0xff]  ;;  %v6357_v14 = vld [vmem:[#allocation77_spill] sm:$0xff] }
 0x5b2   : >> { %v2657_v20 = vrot.slane %v2656_v35, 4 }
 0x5b4   : >> { %v2658_v30 = vmax.f32 %v2656_v35, %v2657_v20  ;;  %v6358_v35 = vld [vmem:[#allocation61_spill] sm:$0xff]  ;;  %v6359_v20 = vld [vmem:[#allocation76_spill] sm:$0xff] }
 0x5b6   : >> { %v2659_v1 = vrot.slane %v2658_v30, 2 }
 0x5b8   : >> { %v2660_v4 = vmax.f32 %v2658_v30, %v2659_v1  ;;  %v6360_v30 = vld [vmem:[#allocation60_spill] sm:$0xff]  ;;  %v6361_v1 = vld [vmem:[#allocation75_spill] sm:$0xff] }
 0x5ba   : >> { %v2661_v36 = vrot.slane %v2660_v4, 1 }
 0x5bc   : >> { %v2662_v34 = vmax.f32 %v2660_v4, %v2661_v36  ;;  %v6362_v4 = vld [vmem:[#allocation59_spill] sm:$0xff]  ;;  %v6363_v36 = vld [vmem:[#allocation74_spill] sm:$0xff] }
 0x5be   : >> { %v2667_v23 = vsub.f32 %v2644_v18, %v2662_v34  ;;  %v2668_v27 = vsub.f32 %v2645_v21, %v2662_v34  ;;  %v2666_v39 = vsub.f32 %v2643_v31, %v2662_v34  ;;  %v2665_v42 = vsub.f32 %v2642_v5, %v2662_v34  ;;  %v6353_v31 = vld [vmem:[#allocation79_spill] sm:$0xff] }
 0x5bf   : >> { %v2664_v38 = vsub.f32 %v2641_v37, %v2662_v34  ;;  %v2663_v12 = vsub.f32 %v2640_v29, %v2662_v34  ;;  %v6354_v18 = vld [vmem:[#allocation63_spill] sm:$0xff]  ;;  %v6364_v34 = vld [vmem:[#allocation58_spill] sm:$0xff] }
 0x5c0   : >> { %v2679_v40 = vmul.f32 1.442695, %v2668_v27  ;;  %v2677_v41 = vmul.f32 1.442695, %v2667_v23  ;;  %v2675_v28 = vmul.f32 1.442695, %v2666_v39 }
 0x5c1   : >> { %v2673_v0 = vmul.f32 1.442695, %v2665_v42  ;;  %v2671_v22 = vmul.f32 1.442695, %v2664_v38  ;;  %v2669_v32 = vmul.f32 1.442695, %v2663_v12 }
 0x5c2   : >> { %4299 = vpow2.f32 %v2679_v40  ;;  %v6352_v42 = vld [vmem:[#allocation3_spill] sm:$0xff]  ;;  %v6365_v23 = vld [vmem:[#allocation73_spill] sm:$0xff]  ;;  %v6368_v38 = vld [vmem:[#allocation56_spill] sm:$0xff] }
 0x5c3   : >> { %4301 = vpow2.f32 %v2677_v41  ;;  %v6366_v27 = vld [vmem:[#allocation57_spill] sm:$0xff]  ;;  %v6370_v12 = vld [vmem:[#allocation55_spill] sm:$0xff] }
 0x5c4   : >> { %4303 = vpow2.f32 %v2675_v28  ;;  %v6367_v28 = vld [vmem:[#allocation72_spill] sm:$0xff] }
 0x5c5   : >> { %4305 = vpow2.f32 %v2673_v0  ;;  %v6369_v0 = vld [vmem:[#allocation71_spill] sm:$0xff] }
 0x5c6   : >> { %4307 = vpow2.f32 %v2671_v22  ;;  %v6371_v22 = vld [vmem:[#allocation70_spill] sm:$0xff] }
 0x5c7   : >> { %4309 = vpow2.f32 %v2669_v32  ;;  %v6372_v32 = vld [vmem:[#allocation54_spill] sm:$0xff] }
 0x5cf   : >> { %v5770_v8 = vpop.eup %4299 }
 0x5d0   : >> { %4089 = vmatprep.subr.mxu0 %v5770_v8  ;;  %v5773_v21 = vpop.eup %4301 }
 0x5d1   : >> { %4090 = vmatpush3.msra.mxu0 %v5770_v8  ;;  %v5777_v37 = vpop.eup %4303 }
 0x5d2   : >> { %4091 = vmatprep.subr.mxu0 %v5773_v21  ;;  %v5781_v40 = vpop.eup %4305 }
 0x5d3   : >> { %4092 = vmatpush3.msra.mxu0 %v5773_v21  ;;  %v5785_v39 = vpop.eup %4307 }
 0x5d4   : >> { %4093 = vmatprep.subr.mxu0 %v5777_v37  ;;  %v5789_v41 = vpop.eup %4309 }
 0x5d5   : >> { %4094 = vmatpush3.msra.mxu0 %v5777_v37 }
 0x5d6   : >> { %4095 = vmatprep.subr.mxu0 %v5781_v40 }
 0x5d7   : >> { %4096 = vmatpush3.msra.mxu0 %v5781_v40 }
 0x5d8   : >> { %4097 = vmatprep.subr.mxu0 %v5785_v39 }
 0x5d9   : >> { %4098 = vmatpush3.msra.mxu0 %v5785_v39 }
 0x5da   : >> { %4099 = vmatprep.subr.mxu0 %v5789_v41 }
 0x5db   : >> { %4100 = vmatpush3.msra.mxu0 %v5789_v41 }
 0x5dc   : >> { %4102 = vmatmul.mubr.msk.f32.vlgmr.msra.gmra.mxu0 %vm2681_vm1, %v6352_v42 }
 0x5dd   : >> { %4129 = vmatprep.mubr.msk.f32.mxu0 %vm2681_vm1, %v6351_v19  ;;  %v3173_v19 = vld [vmem:[%s6026_s24 + $0x8] sm:$0xff] (%p1878_p4) }
 0x69c   : >> { %v4103_v29 = vpop.f32.mrf.mxu0 }
 0x69d   : >> { %4104 = vmatprep.subr.mxu1 %v4103_v29 }
 0x69e   : >> { %v2754_v5 = vpop.f32.mrf.mxu0  ;;  %4105 = vmatpush3.msra.mxu1 %v4103_v29  ;;  %v6373_v29 = vld [vmem:[#allocation69_spill] sm:$0xff] }
 0x69f   : >> { %4106 = vmatprep.subr.mxu1 %v2754_v5 }
 0x6a0   : >> { %4107 = vmatpush3.msra.mxu1 %v2754_v5  ;;  %v6374_v5 = vld [vmem:[#allocation53_spill] sm:$0xff] }
 0x6a1   : >> { %4109 = vmatmul.mubr.msk.f32.vlgmr.msra.gmra.mxu1 %vm802_vm0, %v4583_v7  ;;  %3688 = vmatprep.subr.mxu1 %v6353_v31  ;;  %v6375_v31 = vld [vmem:[#allocation68_spill] sm:$0xff]  ;;  %v3084_v7 = vld [vmem:[%s6024_s22 + $0x60] sm:$0xff] (%p1878_p4) }
 0x6a2   : >> { %4111 = vmatprep.mubr.msk.f32.mxu1 %vm802_vm0, %v4595_v9  ;;  %3689 = vmatpush3.msra.mxu1 %v6354_v18  ;;  %v6376_v18 = vld [vmem:[#allocation52_spill] sm:$0xff]  ;;  %v3187_v9 = vld [vmem:[%s6026_s24 + $0x78] sm:$0xff] (%p1878_p4) }
 0x6a3   : >> { %3690 = vmatprep.subr.mxu1 %v6355_v10  ;;  %v6377_v10 = vld [vmem:[#allocation67_spill] sm:$0xff] }
 0x6a4   : >> { %3691 = vmatpush3.msra.mxu1 %v6356_v6  ;;  %v6378_v6 = vld [vmem:[#allocation51_spill] sm:$0xff] }
 0x6a5   : >> { %4112 = vmatmul.mubr.msk.f32.gmra.mxu1 %vm802_vm0, %v4615_v11  ;;  %3692 = vmatprep.subr.mxu1 %v6357_v14  ;;  %v6379_v14 = vld [vmem:[#allocation66_spill] sm:$0xff]  ;;  %v3186_v11 = vld [vmem:[%s6026_s24 + $0x70] sm:$0xff] (%p1878_p4) }
 0x6a6   : >> { %4114 = vmatprep.mubr.msk.f32.mxu1 %vm802_vm0, %v4625_v13  ;;  %3693 = vmatpush3.msra.mxu1 %v6358_v35  ;;  %v6380_v35 = vld [vmem:[#allocation50_spill] sm:$0xff]  ;;  %v3083_v13 = vld [vmem:[%s6024_s22 + $0x58] sm:$0xff] (%p1878_p4) }
 0x6a7   : >> { %3694 = vmatprep.subr.mxu1 %v6359_v20  ;;  %v6381_v20 = vld [vmem:[#allocation65_spill] sm:$0xff] }
 0x6a8   : >> { %3695 = vmatpush3.msra.mxu1 %v6360_v30  ;;  %v6382_v30 = vld [vmem:[#allocation49_spill] sm:$0xff] }
 0x6a9   : >> { %4115 = vmatmul.mubr.msk.f32.gmra.mxu1 %vm802_vm0, %v4643_v15  ;;  %3696 = vmatprep.subr.mxu1 %v6361_v1  ;;  %v6383_v1 = vld [vmem:[#allocation64_spill] sm:$0xff]  ;;  %v3185_v15 = vld [vmem:[%s6026_s24 + $0x68] sm:$0xff] (%p1878_p4) }
 0x6aa   : >> { %3697 = vmatpush3.msra.mxu1 %v6362_v4  ;;  %v6384_v4 = vld [vmem:[#allocation48_spill] sm:$0xff] }
 0x6ab   : >> { %3698 = vmatprep.subr.mxu1 %v6363_v36  ;;  %v4405_v36 = vmov 0  }
 0x6ac   : >> { %3699 = vmatpush3.msra.mxu1 %v6364_v34  ;;  %4298 = vset.pattern.permute.xlu1 %v4405_v36 }
 0x6ad   : >> { %3700 = vmatprep.subr.mxu1 %v6365_v23  ;;  %4297 = vset.pattern.permute.xlu0 %v4405_v36 }
 0x6ae   : >> { %3701 = vmatpush3.msra.mxu1 %v6366_v27 }
 0x6af   : >> { %3702 = vmatprep.subr.mxu1 %v6367_v28 }
 0x6b0   : >> { %3703 = vmatpush3.msra.mxu1 %v6368_v38 }
 0x6b1   : >> { %3704 = vmatprep.subr.mxu1 %v6369_v0 }
 0x6b2   : >> { %3705 = vmatpush3.msra.mxu1 %v6370_v12 }
 0x6b3   : >> { %3706 = vmatprep.subr.mxu1 %v6371_v22 }
 0x6b4   : >> { %3707 = vmatpush3.msra.mxu1 %v6372_v32 }
 0x6b5   : >> { %3708 = vmatprep.subr.mxu1 %v6373_v29 }
 0x6b6   : >> { %3709 = vmatpush3.msra.mxu1 %v6374_v5 }
 0x6b7   : >> { %3710 = vmatprep.subr.mxu1 %v6375_v31 }
 0x6b8   : >> { %3711 = vmatpush3.msra.mxu1 %v6376_v18 }
 0x6b9   : >> { %3712 = vmatprep.subr.mxu1 %v6377_v10 }
 0x6ba   : >> { %3713 = vmatpush3.msra.mxu1 %v6378_v6 }
 0x6bb   : >> { %3714 = vmatprep.subr.mxu1 %v6379_v14 }
 0x6bc   : >> { %3715 = vmatpush3.msra.mxu1 %v6380_v35 }
 0x6bd   : >> { %3716 = vmatprep.subr.mxu1 %v6381_v20 }
 0x6be   : >> { %3717 = vmatpush3.msra.mxu1 %v6382_v30 }
 0x6bf   : >> { %3718 = vmatprep.subr.mxu1 %v6383_v1 }
 0x6c0   : >> { %3719 = vmatpush3.msra.mxu1 %v6384_v4 }
 0x6c1   : > { %4167 = vmatprep.subr.mxu1 (%p1878_p4), %v3187_v9 }
 0x761   : >> { %v4110_v34 = vpop.f32.mrf.mxu1 }
 0x762   : >> { %v2859_v31 = vmax.f32 %v4110_v34, 1e-09 }
 0x763   : >> { %v2829_v23 = vpop.f32.mrf.mxu1 }
 0x764   : >> { %v2858_v12 = vmax.f32 %v2829_v23, 1e-09 }
 0x765   : >> { %v4113_v27 = vpop.f32.mrf.mxu1 }
 0x766   : >> { %v2861_v28 = vmax.f32 %v4113_v27, 1e-09 }
 0x767   : >> { %v2839_v38 = vpop.f32.mrf.mxu1 }
 0x768   : >> { %4311 = vrcp.f32 %v2861_v28  ;;  %v2860_v0 = vmax.f32 %v2839_v38, 1e-09  ;;  %v6385_v28 = vmax.f32 %v5739_v17, 0.0  ;;  %v6389_v17 = vmax.f32 %v5708_v2, 0.0 }
 0x769   : >> { %v4116_v22 = vpop.f32.mrf.mxu1 }
 0x76a   : >> { %4313 = vrcp.f32 %v2860_v0  ;;  %v2863_v32 = vmax.f32 %v4116_v22, 1e-09  ;;  %v6386_v0 = vmax.f32 %v5735_v25, 0.0  ;;  %v6390_v25 = vmax.f32 %v5699_v26, 0.0 }
 0x76b   : >> { %v2849_v29 = vpop.f32.mrf.mxu1 }
 0x76c   : >> { %4315 = vrcp.f32 %v2863_v32  ;;  %v2862_v5 = vmax.f32 %v2849_v29, 1e-09 }
 0x76d   : >> { %4317 = vrcp.f32 %v2858_v12 }
 0x76e   : >> { %4319 = vrcp.f32 %v2862_v5 }
 0x76f   : >> { %4321 = vrcp.f32 %v2859_v31 }
 0x775   : >> { %v4312_v18 = vpop.eup %4311 }
 0x776   : >> { %v2873_v10 = vmul.f32 %v4312_v18, %v5777_v37 }
 0x777   : >> { %v4314_v6 = vpop.eup %4313 }
 0x778   : >> { %2893 = vperm.xlu1 %4298, %v2873_v10   ;;  %v2872_v20 = vmul.f32 %v4314_v6, %v5781_v40  ;;  %v6391_v6 = vld [vmem:[#allocation80_spill] sm:$0xff] }
 0x779   : >> { %v4316_v14 = vpop.eup %4315 }
 0x77a   : >> { %v4318_v35 = vpop.eup %4317  ;;  %v2875_v30 = vmul.f32 %v4316_v14, %v5770_v8 }
 0x77b   : >> { %v4320_v1 = vpop.eup %4319  ;;  %v2870_v4 = vmul.f32 %v4318_v35, %v5789_v41 }
 0x77c   : >> { %2888 = vperm.xlu1 %4298, %v2872_v20   ;;  %2903 = vperm.xlu0 %4297, %v2875_v30   ;;  %v2874_v36 = vmul.f32 %v4320_v1, %v5773_v21  ;;  %v4322_v34 = vpop.eup %4321  ;;  %v6387_v21 = vmax.f32 %v5726_v24, 0.0 }
 0x77d   : >> { %v2871_v37 = vmul.f32 %v4322_v34, %v5785_v39  ;;  %v6388_v39 = vmax.f32 %v5712_v3, 0.0 }
 0x780   : >> { %2878 = vperm.xlu1 %4298, %v2870_v4   ;;  %2898 = vperm.xlu0 %4297, %v2874_v36  }
 0x784   : >> { %2883 = vperm.xlu0 %4297, %v2871_v37   ;;  %v3086_v37 = vld [vmem:[%s6024_s22 + $0x70] sm:$0xff] (%p1878_p4) }
 0x7f3   : >> { %v2894_v23 = vpop.permute.xlu1 %2893 }
 0x7f4   : >> { %v2909_v12 = vmul.f32 %v2894_v23, %v6387_v21  ;;  %v3085_v23 = vld [vmem:[%s6024_s22 + $0x68] sm:$0xff] (%p1878_p4)  ;;  %v3430_v21 = vld [vmem:[%s6027_s25] ss:$0 sm:$0xff] (%p1878_p4) }
 0x7f7   : >> { %v2904_v27 = vpop.permute.xlu0 %2903  ;;  %v2889_v8 = vpop.permute.xlu1 %2888 }
 0x7f8   : >> { %v2911_v40 = vmul.f32 %v2904_v27, %v6385_v28  ;;  %v2908_v32 = vmul.f32 %v2889_v8, %v6388_v39  ;;  %v3429_v27 = vld [vmem:[%s6025_s23] ss:$0 sm:$0xff] (%p1878_p4) }
 0x7fa   : >> { %4117 = vmatprep.subr.mxu0 %v2911_v40 }
 0x7fb   : >> { %4118 = vmatpush3.msra.mxu0 %v2911_v40  ;;  %v2899_v38 = vpop.permute.xlu0 %2898  ;;  %v2879_v29 = vpop.permute.xlu1 %2878 }
 0x7fc   : >> { %v2910_v41 = vmul.f32 %v2899_v38, %v6386_v0  ;;  %v2906_v31 = vmul.f32 %v2879_v29, %v6390_v25 }
 0x7fe   : >> { %4119 = vmatprep.subr.mxu0 %v2910_v41 }
 0x7ff   : >> { %v2884_v22 = vpop.permute.xlu0 %2883  ;;  %4120 = vmatpush3.msra.mxu0 %v2910_v41 }
 0x800   : >> { %4121 = vmatprep.subr.mxu0 %v2909_v12  ;;  %v2907_v5 = vmul.f32 %v2884_v22, %v6389_v17 }
 0x801   : >> { %4122 = vmatpush3.msra.mxu0 %v2909_v12 }
 0x802   : >> { %4123 = vmatprep.subr.mxu0 %v2908_v32 }
 0x803   : >> { %4124 = vmatpush3.msra.mxu0 %v2908_v32 }
 0x804   : >> { %4125 = vmatprep.subr.mxu0 %v2907_v5 }
 0x805   : >> { %4126 = vmatpush3.msra.mxu0 %v2907_v5 }
 0x806   : >> { %4127 = vmatprep.subr.mxu0 %v2906_v31 }
 0x807   : >> { %4128 = vmatpush3.msra.mxu0 %v2906_v31 }
 0x808   : >> { %4130 = vmatmul.mubr.msk.f32.vlgmr.msra.gmra.mxu0 %vm2681_vm1, %v6352_v42  ;;  %v3172_v42 = vld [vmem:[%s6026_s24] sm:$0xff] (%p1878_p4) }
 0x8c8   : >> { %v4131_v3 = vpop.f32.mrf.mxu0 }
 0x8ca   : >> { %v2978_v24 = vpop.f32.mrf.mxu0 }
 0x8cb   : >> { %3057 = vmatprep.mubr.f32.mxu1 %v2978_v24 }
 0x8cc   : >> { %3058 = vmatmul.mubr.f32.vlgmr.msra.gmra.mxu1 %v4397_v62 }
 0x8cd   : >> { %3062 = vmatprep.mubr.f32.mxu1 %v4131_v3  ;;  %4168 = vmatpush3.msra.mxu1 (%p1878_p4), %v3187_v9 }
 0x8ce   : > { %4169 = vmatprep.subr.mxu1 (%p1878_p4), %v3186_v11 }
 0x8cf   : > { %4170 = vmatpush3.msra.mxu1 (%p1878_p4), %v3186_v11 }
 0x8d0   : >> { %3063 = vmatmul.mubr.f32.gmra.mxu1 %v4393_v63  ;;  %4171 = vmatprep.subr.mxu1 (%p1878_p4), %v3185_v15 }
 0x8d1   : > { %4172 = vmatpush3.msra.mxu1 (%p1878_p4), %v3185_v15 }
 0x8d2   : > { %4173 = vmatprep.subr.mxu1 (%p1878_p4), %v3184_v46 }
 0x8d3   : > { %4174 = vmatpush3.msra.mxu1 (%p1878_p4), %v3184_v46 }
 0x8d4   : > { %4175 = vmatprep.subr.mxu1 (%p1878_p4), %v3183_v49 }
 0x8d5   : > { %4176 = vmatpush3.msra.mxu1 (%p1878_p4), %v3183_v49 }
 0x8d6   : > { %4177 = vmatprep.subr.mxu1 (%p1878_p4), %v3182_v51 }
 0x8d7   : > { %4178 = vmatpush3.msra.mxu1 (%p1878_p4), %v3182_v51 }
 0x8d8   : > { %4179 = vmatprep.subr.mxu1 (%p1878_p4), %v3181_v53 }
 0x8d9   : > { %4180 = vmatpush3.msra.mxu1 (%p1878_p4), %v3181_v53 }
 0x8da   : > { %4181 = vmatprep.subr.mxu1 (%p1878_p4), %v3180_v55 }
 0x8db   : > { %4182 = vmatpush3.msra.mxu1 (%p1878_p4), %v3180_v55 }
 0x8dc   : > { %4183 = vmatprep.subr.mxu1 (%p1878_p4), %v3179_v57 }
 0x8dd   : > { %4184 = vmatpush3.msra.mxu1 (%p1878_p4), %v3179_v57 }
 0x8de   : > { %4185 = vmatprep.subr.mxu1 (%p1878_p4), %v3178_v59 }
 0x8df   : > { %4186 = vmatpush3.msra.mxu1 (%p1878_p4), %v3178_v59 }
 0x8e0   : > { %4187 = vmatprep.subr.mxu1 (%p1878_p4), %v3177_v61 }
 0x8e1   : > { %4188 = vmatpush3.msra.mxu1 (%p1878_p4), %v3177_v61 }
 0x8e2   : > { %4189 = vmatprep.subr.mxu1 (%p1878_p4), %v3176_v33 }
 0x8e3   : > { %4190 = vmatpush3.msra.mxu1 (%p1878_p4), %v3176_v33 }
 0x8e4   : > { %4191 = vmatprep.subr.mxu1 (%p1878_p4), %v3175_v48 }
 0x8e5   : > { %4192 = vmatpush3.msra.mxu1 (%p1878_p4), %v3175_v48 }
 0x8e6   : > { %4193 = vmatprep.subr.mxu1 (%p1878_p4), %v3174_v44 }
 0x8e7   : > { %4194 = vmatpush3.msra.mxu1 (%p1878_p4), %v3174_v44 }
 0x8e8   : > { %4195 = vmatprep.subr.mxu1 (%p1878_p4), %v3173_v19 }
 0x8e9   : > { %4196 = vmatpush3.msra.mxu1 (%p1878_p4), %v3173_v19 }
 0x8ea   : > { %4197 = vmatprep.subr.mxu1 (%p1878_p4), %v3172_v42 }
 0x8eb   : > { %4198 = vmatpush3.msra.mxu1 (%p1878_p4), %v3172_v42 }
 0x98c   : >> { %v3720_v2 = vpop.f32.mrf.mxu1 }
 0x98e   : >> { %v3721_v18 = vpop.f32.mrf.mxu1 }
 0x98f   : >> { %v3722_v10 = vadd.f32 %v3721_v18, %v3720_v2 }
 0x990   : >> { %v3723_v26 = vpop.f32.mrf.mxu1 }
 0x991   : >> { %v3060_v14 = vadd.f32 %v3722_v10, %v6391_v6 }
 0x992   : >> { %v3724_v35 = vpop.f32.mrf.mxu1 }
 0x993   : >> { %v3068_v20 = vmax.f32 %v3060_v14, 0.0  ;;  %v3725_v30 = vadd.f32 %v3724_v35, %v3723_v26 }
 0x995   : >> { %v3070_v1 = vadd.f32 %v4397_v62, %v3068_v20   ;;  %v3065_v4 = vadd.f32 %v3725_v30, %v6391_v6 }
 0x997   : >> { %v3069_v36 = vmax.f32 %v3065_v4, 0.0  ;;  %v6394_v62 = vmov %v3070_v1  ;;  %4164 = vmatprep.mubr.f32.mxu0 (%p1878_p4), %v3070_v1 }
 0x998   : > { %1880 = sbr.rel (!%p1878_p4) target bundleno = 811 (0x32b), region = 161  ;;  %v3087_v62 = vld [vmem:[%s6024_s22 + $0x78] sm:$0xff] (%p1878_p4) }
 0x999   : >> { %v5866_v63 = vadd.f32 %v4393_v63, %v3069_v36   ;;  %4132 = vmatprep.subr.mxu0 (%p1878_p4), %v3087_v62 }
 0x99a   : > { %4133 = vmatpush3.msra.mxu0 (%p1878_p4), %v3087_v62 }
 0x99b   : >> { %v6392_v34 = vmov %v5866_v63  ;;  %4134 = vmatprep.subr.mxu0 (%p1878_p4), %v3086_v37 }
 0x99c   : >> { %v6393_v63 = vmov %v6392_v34  ;;  %4135 = vmatpush3.msra.mxu0 (%p1878_p4), %v3086_v37 }
 0x99d   : > { %4136 = vmatprep.subr.mxu0 %v3085_v23  ;;  %v3082_v63 = vld [vmem:[%s6024_s22 + $0x50] sm:$0xff] }
 0x99e   : > { %4137 = vmatpush3.msra.mxu0 %v3085_v23 }
 0x99f   : > { %4138 = vmatprep.subr.mxu0 %v3084_v7 }
 0x9a0   : > { %4139 = vmatpush3.msra.mxu0 %v3084_v7 }
 0x9a1   : > { %4140 = vmatprep.subr.mxu0 %v3083_v13 }
 0x9a2   : > { %4141 = vmatpush3.msra.mxu0 %v3083_v13 }
 0x9a3   : > { %4142 = vmatprep.subr.mxu0 %v3082_v63 }
 0x9a4   : > { %4143 = vmatpush3.msra.mxu0 %v3082_v63 }
 0x9a5   : > { %4144 = vmatprep.subr.mxu0 %v3081_v47 }
 0x9a6   : > { %4145 = vmatpush3.msra.mxu0 %v3081_v47 }
 0x9a7   : > { %4146 = vmatprep.subr.mxu0 %v3080_v50 }
 0x9a8   : > { %4147 = vmatpush3.msra.mxu0 %v3080_v50 }
 0x9a9   : > { %4148 = vmatprep.subr.mxu0 %v3079_v52 }
 0x9aa   : > { %4149 = vmatpush3.msra.mxu0 %v3079_v52 }
 0x9ab   : > { %4150 = vmatprep.subr.mxu0 %v3078_v54 }
 0x9ac   : > { %4151 = vmatpush3.msra.mxu0 %v3078_v54 }
 0x9ad   : > { %4152 = vmatprep.subr.mxu0 %v3077_v56 }
 0x9ae   : > { %4153 = vmatpush3.msra.mxu0 %v3077_v56 }
 0x9af   : > { %4154 = vmatprep.subr.mxu0 %v3076_v58 }
 0x9b0   : > { %4155 = vmatpush3.msra.mxu0 %v3076_v58 }
 0x9b1   : > { %4156 = vmatprep.subr.mxu0 %v3075_v60 }
 0x9b2   : > { %4157 = vmatpush3.msra.mxu0 %v3075_v60 }
 0x9b3   : > { %4158 = vmatprep.subr.mxu0 %v3074_v16 }
 0x9b4   : > { %4159 = vmatpush3.msra.mxu0 %v3074_v16 }
 0x9b5   : > { %4160 = vmatprep.subr.mxu0 %v3073_v43 }
 0x9b6   : > { %4161 = vmatpush3.msra.mxu0 %v3073_v43 }
 0x9b7   : > { %4162 = vmatprep.subr.mxu0 %v3072_v45 }
 0x9b8   : > { %4163 = vmatpush3.msra.mxu0 %v3072_v45 }
 0x9b9   : > { %4165 = vmatmul.mubr.f32.vlgmr.msra.gmra.mxu0 %v6392_v34 }
 0xa79   : > { %v4166_v28 = vpop.f32.mrf.mxu0 }
 0xa7a   : > { %v3167_v40 = vadd.f32 %v4166_v28, %v3429_v27 }
 0xa7b   : > { %v3161_v8 = vpop.f32.mrf.mxu0 }
 0xa7c   : > { %v3162_v38 = vadd.f32 %v3429_v27, %v3161_v8  ;;  %v3171_v41 = vmax.f32 %v3167_v40, 0.0 }
 0xa7e   : > { %v3170_v0 = vmax.f32 %v3162_v38, 0.0 }
 0xa80   : > { %4199 = vmatprep.mubr.f32.mxu1 %v3170_v0 }
 0xa81   : > { %4200 = vmatmul.mubr.f32.vlgmr.msra.gmra.mxu1 %v3171_v41 }
 0xb41   : > { %v4201_v12 = vpop.f32.mrf.mxu1 }
 0xb42   : > { %v3267_v22 = vadd.f32 %v4201_v12, %v3430_v21 }
 0xb43   : > { %v3261_v39 = vpop.f32.mrf.mxu1 }
 0xb44   : > { %3271 = vst [vmem:[%s4718_s2 + $0x8] sm:$0xff] %v3267_v22  ;;  %v3262_v32 = vadd.f32 %v3430_v21, %v3261_v39 }
 0xb46   : > { %3270 = vst [vmem:[%s4718_s2] sm:$0xff] %v3262_v32 }
 0xb47 PF: > { %s36_s27 = sadd.s32 1, %s4365_s27  }
 0xb48   : > { %p33_p5 = scmp.ge.s32.totalorder %s36_s27, 4  }
 0xb4a   :  { %35 = sbr.rel (!%p33_p5) target bundleno = 12 (0xc), region = 172 }

</bundles_post_ra>
